<compile_context>
chip_gen: v7x
topology: tpu7x:2x2x1
jax: 0.10.0
libtpu: 0.0.40
codegen_flags: <defaults>
</compile_context>

<pallas_src>
import functools

import jax
import jax.numpy as jnp
import numpy as np
from jax import lax
from jax.experimental import pallas as pl
from jax.experimental.pallas import tpu as pltpu

EPS = 1e-5  # nn.GroupNorm default


def _vmem_limit_bytes():
    """Scoped-VMEM limit derived from physical capacity (32 MiB default is only the default)."""
    try:
        cap = pltpu.get_tpu_info().vmem_capacity_bytes
    except Exception:  # pragma: no cover - older jax / interpret: assume the smallest part (v7x)
        cap = 64 * 1024 * 1024
    return int(min(cap * 3 // 4, 112 * 1024 * 1024))


# ---------------------------------------------------------------------------
# Fused Conv3d(3x3x3, pad=1) + bias + GroupNorm + ReLU
#   grid = (batch, cout_group_tile), both "parallel"
# ---------------------------------------------------------------------------
def _conv3d_gn_relu_kernel(*refs, n_inputs, cpg, H, W, P):
    """refs = [x_0..x_{n-1}, masks, w_big, bias, gamma, beta, out, xpad, kbuf]

      x_i   : (1, C_i, S)         bf16  flat activation (S = D*H*W on the lane axis)
      masks : (9, S)              bf16  0/1 border masks indexed by (kh*3 + kw)
      w_big : (Ct, 27*Ctot)       bf16  packed weight, column index = tap*Ctot + cin
      bias, gamma, beta : (Ct,1)  f32
      out   : (1, Ct, S)
      xpad  : (Ctot, S + 2P)      bf16  VMEM scratch: zero-padded flat slab (halo in VMEM)
      kbuf  : (27*Ctot, S)        bf16  VMEM scratch: packed taps -> one big-K MXU matmul
    """
    x_refs = refs[:n_inputs]
    (mask_ref, w_ref, b_ref, gamma_ref, beta_ref,
     o_ref, xpad_ref, kbuf_ref) = refs[n_inputs:]

    ct = o_ref.shape[1]           # Cout channels handled by this grid step (group-aligned tile)
    S = o_ref.shape[2]
    ctot = xpad_ref.shape[0]      # total input channels (conv1: C2 + C1, fused concat)
    n_groups = ct // cpg
    n_per_group = float(S * cpg)

    # ---- stage activations into the zero-padded VMEM slab (replaces the old HBM jnp.pad) ----
    xpad_ref[:, :P] = jnp.zeros((ctot, P), xpad_ref.dtype)
    xpad_ref[:, P + S:] = jnp.zeros((ctot, P), xpad_ref.dtype)
    coff = 0
    for i in range(n_inputs):
        ci = x_refs[i].shape[1]
        xpad_ref[coff:coff + ci, P:P + S] = x_refs[i][0]     # torch.cat(dim=1) fused here
        coff += ci

    # ---- pack 27 shifted+masked taps into (27*Ctot, S): realign + mask once per tap ---------
    t = 0
    for od in (-1, 0, 1):
        for oh in (-1, 0, 1):
            for ow in (-1, 0, 1):
                off = od * (H * W) + oh * W + ow
                tap = xpad_ref[:, P + off:P + off + S]        # (Ctot, S) bf16
                if (oh != 0) or (ow != 0):                    # D halo covered by the zero pad
                    m_idx = (oh + 1) * 3 + (ow + 1)
                    tap = tap * mask_ref[m_idx:m_idx + 1, :]
                kbuf_ref[t * ctot:(t + 1) * ctot, :] = tap
                t += 1

    # single big-K matmul (K = 27*Ctot), accumulation stays on the MXU in f32
    acc = jnp.dot(w_ref[...], kbuf_ref[...], preferred_element_type=jnp.float32)  # (Ct, S)

    # ---- GroupNorm (conv bias folded analytically; channel-vector math only) + ReLU ---------
    cbias = b_ref[...]
    gamma = gamma_ref[...]
    beta = beta_ref[...]

    # one-hot channel->group membership from iota (no extra DMA streams, no int-div)
    c_ids = lax.broadcasted_iota(jnp.int32, (ct, n_groups), 0)
    g_ids = lax.broadcasted_iota(jnp.int32, (ct, n_groups), 1)
    member = ((c_ids >= g_ids * cpg) & (c_ids < (g_ids + 1) * cpg)).astype(jnp.float32)

    def group_sum_bcast(v):  # (Ct,1) -> per-group sum, broadcast back per channel, (Ct,1)
        per_group = jnp.sum(member * v, axis=0, keepdims=True)        # (1, G)
        return jnp.sum(member * per_group, axis=1, keepdims=True)     # (Ct, 1)

    ch_sum = jnp.sum(acc, axis=1, keepdims=True)                      # (Ct, 1)
    # mean of y = conv + bias over each (group x spatial) slab, broadcast per channel
    mu_y = (group_sum_bcast(ch_sum) + float(S) * group_sum_bcast(cbias)) / n_per_group
    diff = acc - (mu_y - cbias)                                       # == y - mean(y)
    sq = jnp.sum(diff * diff, axis=1, keepdims=True)                  # centered, two-pass
    var_y = group_sum_bcast(sq) / n_per_group                         # biased variance (PyTorch)
    scale = lax.rsqrt(var_y + EPS) * gamma                            # (Ct, 1)
    o_ref[0] = jnp.maximum(diff * scale + beta, 0.0).astype(o_ref.dtype)


def conv3x3x3_gn_relu(xs, ws, bias, gamma, beta, spatial, num_groups, out_dtype):
    """xs: list of (B, C_i, D, H, W); ws: list of (3,3,3,C_i,Cout).

    The channel-concat of `xs` is fused into the conv (split weights stacked in-kernel), so the
    concatenated tensor is never materialized.  Returns (B, Cout, D, H, W) in `out_dtype`.
    """
    D, H, W = spatial
    S = D * H * W
    B = xs[0].shape[0]
    cout = ws[0].shape[-1]
    assert cout % num_groups == 0, "GroupNorm requires out_channels % num_groups == 0"
    cpg = cout // num_groups
    ctot = sum(int(x.shape[1]) for x in xs)
    K = 27 * ctot
    # lane-aligned VMEM halo pad covering the extreme flat tap offset (H*W + W + 1)
    P = ((H * W + W + 1 + 127) // 128) * 128

    # group-aligned Cout tiling: second "parallel" axis so both v7x TensorCores get work even
    # at B == 1.  TODO(synk): at production sizes keep >= 64 output channels per tile.
    half = cout // 2
    cout_tile = half if (cout % 2 == 0 and half % cpg == 0 and half % 8 == 0) else cout
    n_ct = cout // cout_tile

    # flat bf16 activations; NO HBM-side halo pad (the halo lives in the VMEM scratch slab)
    x_flat = [x.reshape(B, x.shape[1], S).astype(jnp.bfloat16) for x in xs]

    # big-K packed weight (Cout, 27*Ctot): column = tap*Ctot + cin, tap = kd*9 + kh*3 + kw
    w_cat = jnp.concatenate(ws, axis=3) if len(ws) > 1 else ws[0]      # (3,3,3,Ctot,Cout)
    w_big = jnp.transpose(w_cat.reshape(27, ctot, cout), (2, 0, 1)).reshape(cout, K)
    w_big = w_big.astype(jnp.bfloat16)

    # 0/1 masks killing the H/W border wrap of the flat shift, one row per (kh, kw)
    hh = (np.arange(S) // W) % H
    ww = np.arange(S) % W
    masks = np.empty((3, 3, S), np.float32)
    for ih, oh in enumerate((-1, 0, 1)):
        for iw, ow in enumerate((-1, 0, 1)):
            m = np.ones(S, np.bool_)
            if oh == -1:
                m &= hh >= 1
            if oh == 1:
                m &= hh <= H - 2
            if ow == -1:
                m &= ww >= 1
            if ow == 1:
                m &= ww <= W - 2
            masks[ih, iw] = m
    masks = jnp.asarray(masks.reshape(9, S), dtype=jnp.bfloat16)

    kernel = functools.partial(_conv3d_gn_relu_kernel, n_inputs=len(xs),
                               cpg=cpg, H=H, W=W, P=P)

    in_specs = (
        [pl.BlockSpec((1, int(xf.shape[1]), S), lambda b, j: (b, 0, 0)) for xf in x_flat]
        + [pl.BlockSpec((9, S), lambda b, j: (0, 0)),
           pl.BlockSpec((cout_tile, K), lambda b, j: (j, 0)),
           pl.BlockSpec((cout_tile, 1), lambda b, j: (j, 0)),
           pl.BlockSpec((cout_tile, 1), lambda b, j: (j, 0)),
           pl.BlockSpec((cout_tile, 1), lambda b, j: (j, 0))]
    )

    out_bytes = B * cout * S * jnp.dtype(out_dtype).itemsize
    in_bytes = (sum(B * int(xf.shape[1]) * S * 2 for xf in x_flat)
                + cout * K * 2 + 9 * S * 2 + 3 * cout * 4)
    cost = pl.CostEstimate(flops=2 * B * cout * K * S, transcendentals=0,
                           bytes_accessed=int(in_bytes + out_bytes))

    out = pl.pallas_call(
        kernel,
        out_shape=jax.ShapeDtypeStruct((B, cout, S), out_dtype),
        grid_spec=pltpu.PrefetchScalarGridSpec(
            num_scalar_prefetch=0,
            grid=(B, n_ct),
            in_specs=in_specs,
            out_specs=pl.BlockSpec((1, cout_tile, S), lambda b, j: (b, j, 0)),
            scratch_shapes=[pltpu.VMEM((ctot, S + 2 * P), jnp.bfloat16),   # zero-padded slab
                            pltpu.VMEM((K, S), jnp.bfloat16)]),            # packed-tap slab
        compiler_params=pltpu.CompilerParams(
            dimension_semantics=("parallel", "parallel"),
            vmem_limit_bytes=_vmem_limit_bytes()),
        cost_estimate=cost,
    )(*x_flat, masks, w_big,
      bias.reshape(cout, 1).astype(jnp.float32),
      gamma.reshape(cout, 1).astype(jnp.float32),
      beta.reshape(cout, 1).astype(jnp.float32))
    return out.reshape(B, cout, D, H, W)


# ---------------------------------------------------------------------------
# Trilinear x2 upsample, align_corners=True (exact, separable)  -- XLA glue
# ---------------------------------------------------------------------------
def _interp_matrix_1d(n_in, n_out):
    pos = np.arange(n_out, dtype=np.float64) * (n_in - 1) / max(n_out - 1, 1)
    lo = np.clip(np.floor(pos).astype(np.int64), 0, n_in - 1)
    hi = np.minimum(lo + 1, n_in - 1)
    frac = (pos - lo).astype(np.float32)
    m = np.zeros((n_out, n_in), np.float32)
    m[np.arange(n_out), lo] += 1.0 - frac
    m[np.arange(n_out), hi] += frac
    return jnp.asarray(m)


def upsample_trilinear_2x(x, compute_dtype=jnp.float32):
    """x: (B, C, D, H, W) -> (B, C, 2D, 2H, 2W), trilinear, align_corners=True."""
    # TODO(synk): fuse into the first conv kernel's input pack at production sizes.
    B, C, D, H, W = x.shape
    md = _interp_matrix_1d(D, 2 * D).astype(compute_dtype)
    mh = _interp_matrix_1d(H, 2 * H).astype(compute_dtype)
    mw = _interp_matrix_1d(W, 2 * W).astype(compute_dtype)
    x = x.astype(compute_dtype)
    y = jnp.einsum("bcdhw,zd->bczhw", x, md)
    y = jnp.einsum("bczhw,yh->bczyw", y, mh)
    y = jnp.einsum("bczyw,xw->bczyx", y, mw)
    return y


# ---------------------------------------------------------------------------
# Up module
# ---------------------------------------------------------------------------
def init_up_params(key, in_channels, out_channels):
    k = jax.random.split(key, 8)
    s1 = 1.0 / np.sqrt(in_channels * 27)
    s2 = 1.0 / np.sqrt(out_channels * 27)
    return dict(
        w1=jax.random.uniform(k[0], (3, 3, 3, in_channels, out_channels), jnp.float32, -s1, s1),
        b1=jax.random.uniform(k[1], (out_channels,), jnp.float32, -s1, s1),
        g1=1.0 + 0.1 * jax.random.normal(k[2], (out_channels,), jnp.float32),
        be1=0.1 * jax.random.normal(k[3], (out_channels,), jnp.float32),
        w2=jax.random.uniform(k[4], (3, 3, 3, out_channels, out_channels), jnp.float32, -s2, s2),
        b2=jax.random.uniform(k[5], (out_channels,), jnp.float32, -s2, s2),
        g2=1.0 + 0.1 * jax.random.normal(k[6], (out_channels,), jnp.float32),
        be2=0.1 * jax.random.normal(k[7], (out_channels,), jnp.float32),
    )


def up_forward(params, x1, x2, num_groups=8):
    """Pallas implementation of Up.forward.

    x1: (B, C1, D1, H1, W1), x2: (B, C2, D2, H2, W2)  ->  (B, out_channels, D2, H2, W2), NCDHW.
    """
    # bf16 upsample (review item): x1u is 8x the volume of x1; never touches HBM in f32
    x1u = upsample_trilinear_2x(x1, compute_dtype=jnp.bfloat16)
    dZ = x2.shape[2] - x1u.shape[2]
    dY = x2.shape[3] - x1u.shape[3]
    dX = x2.shape[4] - x1u.shape[4]
    x1u = jnp.pad(x1u, ((0, 0), (0, 0),
                        (dZ // 2, dZ - dZ // 2),
                        (dY // 2, dY - dY // 2),
                        (dX // 2, dX - dX // 2)))
    B, C2, D, H, W = x2.shape
    # torch.cat([x2, x1], dim=1) fused into conv1: split the weight along the input-channel dim
    w1 = params["w1"]
    h = conv3x3x3_gn_relu([x2, x1u], [w1[:, :, :, :C2, :], w1[:, :, :, C2:, :]],
                          params["b1"], params["g1"], params["be1"],
                          (D, H, W), num_groups, jnp.bfloat16)   # bf16 intermediate
    out = conv3x3x3_gn_relu([h], [params["w2"]],
                            params["b2"], params["g2"], params["be2"],
                            (D, H, W), num_groups, jnp.float32)
    return out


# ---------------------------------------------------------------------------
# Pure-JAX reference (correctness check only; f32 end-to-end)
# ---------------------------------------------------------------------------
def _ref_conv_gn_relu(x, w, b, gamma, beta, num_groups):
    y = lax.conv_general_dilated(
        x, w, (1, 1, 1), "SAME",
        dimension_numbers=("NCDHW", "DHWIO", "NCDHW"))
    y = y + b.reshape(1, -1, 1, 1, 1)
    B, C, D, H, W = y.shape
    yg = y.reshape(B, num_groups, C // num_groups, D, H, W)
    mean = yg.mean(axis=(2, 3, 4, 5), keepdims=True)
    var = yg.var(axis=(2, 3, 4, 5), keepdims=True)
    yn = ((yg - mean) / jnp.sqrt(var + EPS)).reshape(B, C, D, H, W)
    return jnp.maximum(yn * gamma.reshape(1, -1, 1, 1, 1) + beta.reshape(1, -1, 1, 1, 1), 0.0)


def ref_up(params, x1, x2, num_groups=8):
    x1u = upsample_trilinear_2x(x1)          # f32 reference path
    dZ = x2.shape[2] - x1u.shape[2]
    dY = x2.shape[3] - x1u.shape[3]
    dX = x2.shape[4] - x1u.shape[4]
    x1u = jnp.pad(x1u, ((0, 0), (0, 0),
                        (dZ // 2, dZ - dZ // 2),
                        (dY // 2, dY - dY // 2),
                        (dX // 2, dX - dX // 2)))
    x = jnp.concatenate([x2, x1u], axis=1)
    x = _ref_conv_gn_relu(x, params["w1"], params["b1"], params["g1"], params["be1"], num_groups)
    x = _ref_conv_gn_relu(x, params["w2"], params["b2"], params["g2"], params["be2"], num_groups)
    return x


if __name__ == "__main__":
    key = jax.random.PRNGKey(0)
    k1, k2, kp = jax.random.split(key, 3)

    B, C1, C2, Cout = 2, 4, 4, 16      # in_channels = C1 + C2 = 8, out_channels % 8 == 0
    D1 = H1 = W1 = 4                   # x1 is the low-res decoder feature; x2 is the skip
    x1 = jax.random.normal(k1, (B, C1, D1, H1, W1), jnp.float32)
    x2 = jax.random.normal(k2, (B, C2, 2 * D1, 2 * H1, 2 * W1), jnp.float32)
    params = init_up_params(kp, C1 + C2, Cout)

    out = jax.block_until_ready(up_forward(params, x1, x2))
    assert out.shape == (B, Cout, 2 * D1, 2 * H1, 2 * W1), out.shape

    ref = jax.block_until_ready(ref_up(params, x1, x2))
    # tolerance covers bf16 MXU operands / bf16 upsample (f32 accumulation) vs the f32 reference
    np.testing.assert_allclose(np.asarray(out), np.asarray(ref), rtol=5e-2, atol=5e-2)

    print("KERNEL_OK")
</pallas_src>

<mosaic_0001>
module attributes {stable_mosaic.version = 11 : i64} {
  func.func @_conv3d_gn_relu_kernel(%arg0: i32, %arg1: i32, %arg2: memref<1x4x512xbf16, #tpu.memory_space<vmem>>, %arg3: memref<1x4x512xbf16, #tpu.memory_space<vmem>>, %arg4: memref<9x512xbf16, #tpu.memory_space<vmem>>, %arg5: memref<8x216xbf16, #tpu.memory_space<vmem>>, %arg6: memref<8x1xf32, #tpu.memory_space<vmem>>, %arg7: memref<8x1xf32, #tpu.memory_space<vmem>>, %arg8: memref<8x1xf32, #tpu.memory_space<vmem>>, %arg9: memref<1x8x512xbf16, #tpu.memory_space<vmem>>, %arg10: memref<8x768xbf16, #tpu.memory_space<vmem>>, %arg11: memref<216x512xbf16, #tpu.memory_space<vmem>>) attributes {dimension_semantics = [#tpu.dimension_semantics<parallel>, #tpu.dimension_semantics<parallel>], iteration_bounds = array<i64: 2, 2>, scalar_prefetch = 0 : i64, scratch_operands = 2 : i64, tpu.core_type = #tpu.core_type<tc>, window_params = [{transform_indices = @transform_0, window_bounds = array<i64: 1, 4, 512>}, {transform_indices = @transform_1, window_bounds = array<i64: 1, 4, 512>}, {pipeline_mode = #tpu.pipeline_mode<synchronous>, transform_indices = @transform_2, window_bounds = array<i64: 9, 512>}, {transform_indices = @transform_3, window_bounds = array<i64: 8, 216>}, {transform_indices = @transform_4, window_bounds = array<i64: 8, 1>}, {transform_indices = @transform_5, window_bounds = array<i64: 8, 1>}, {transform_indices = @transform_6, window_bounds = array<i64: 8, 1>}, {transform_indices = @transform_7, window_bounds = array<i64: 1, 8, 512>}]} {
    %cst = arith.constant 0.000000e+00 : bf16
    %0 = vector.broadcast %cst : bf16 to vector<8x128xbf16>
    %c0 = arith.constant 0 : index
    %c0_0 = arith.constant 0 : index
    %1 = vector.load %arg10[%c0, %c0_0] : memref<8x768xbf16, #tpu.memory_space<vmem>>, vector<8x128xbf16>
    tpu.vector_store %arg10[%c0, %c0_0], %0 {strides = array<i32>} : memref<8x768xbf16, #tpu.memory_space<vmem>>, vector<8x128xbf16>,
    %cst_1 = arith.constant 0.000000e+00 : bf16
    %2 = vector.broadcast %cst_1 : bf16 to vector<8x128xbf16>
    %c0_2 = arith.constant 0 : index
    %c640 = arith.constant 640 : index
    %3 = vector.load %arg10[%c0_2, %c640] : memref<8x768xbf16, #tpu.memory_space<vmem>>, vector<8x128xbf16>
    tpu.vector_store %arg10[%c0_2, %c640], %2 {strides = array<i32>} : memref<8x768xbf16, #tpu.memory_space<vmem>>, vector<8x128xbf16>,
    %c0_3 = arith.constant 0 : index
    %c0_4 = arith.constant 0 : index
    %c0_5 = arith.constant 0 : index
    %4 = vector.load %arg2[%c0_3, %c0_4, %c0_5] : memref<1x4x512xbf16, #tpu.memory_space<vmem>>, vector<1x4x512xbf16>
    %5 = vector.shape_cast %4 : vector<1x4x512xbf16> to vector<4x512xbf16>
    %c0_6 = arith.constant 0 : index
    %c128 = arith.constant 128 : index
    %6 = vector.load %arg10[%c0_6, %c128] : memref<8x768xbf16, #tpu.memory_space<vmem>>, vector<4x512xbf16>
    tpu.vector_store %arg10[%c0_6, %c128], %5 {strides = array<i32>} : memref<8x768xbf16, #tpu.memory_space<vmem>>, vector<4x512xbf16>,
    %c0_7 = arith.constant 0 : index
    %c0_8 = arith.constant 0 : index
    %c0_9 = arith.constant 0 : index
    %7 = vector.load %arg3[%c0_7, %c0_8, %c0_9] : memref<1x4x512xbf16, #tpu.memory_space<vmem>>, vector<1x4x512xbf16>
    %8 = vector.shape_cast %7 : vector<1x4x512xbf16> to vector<4x512xbf16>
    %c4 = arith.constant 4 : index
    %c128_10 = arith.constant 128 : index
    %9 = vector.load %arg10[%c4, %c128_10] : memref<8x768xbf16, #tpu.memory_space<vmem>>, vector<4x512xbf16>
    tpu.vector_store %arg10[%c4, %c128_10], %8 {strides = array<i32>} : memref<8x768xbf16, #tpu.memory_space<vmem>>, vector<4x512xbf16>,
    %c0_11 = arith.constant 0 : index
    %c55 = arith.constant 55 : index
    %10 = vector.load %arg10[%c0_11, %c55] : memref<8x768xbf16, #tpu.memory_space<vmem>>, vector<8x512xbf16>
    %c0_12 = arith.constant 0 : index
    %c0_13 = arith.constant 0 : index
    %11 = vector.load %arg4[%c0_12, %c0_13] : memref<9x512xbf16, #tpu.memory_space<vmem>>, vector<1x512xbf16>
    %12 = vector.broadcast %11 : vector<1x512xbf16> to vector<8x512xbf16>
    %13 = arith.mulf %10, %12 : vector<8x512xbf16>
    %c0_14 = arith.constant 0 : index
    %c0_15 = arith.constant 0 : index
    %14 = vector.load %arg11[%c0_14, %c0_15] : memref<216x512xbf16, #tpu.memory_space<vmem>>, vector<8x512xbf16>
    tpu.vector_store %arg11[%c0_14, %c0_15], %13 {strides = array<i32>} : memref<216x512xbf16, #tpu.memory_space<vmem>>, vector<8x512xbf16>,
    %c0_16 = arith.constant 0 : index
    %c56 = arith.constant 56 : index
    %15 = vector.load %arg10[%c0_16, %c56] : memref<8x768xbf16, #tpu.memory_space<vmem>>, vector<8x512xbf16>
    %c1 = arith.constant 1 : index
    %c0_17 = arith.constant 0 : index
    %16 = vector.load %arg4[%c1, %c0_17] : memref<9x512xbf16, #tpu.memory_space<vmem>>, vector<1x512xbf16>
    %17 = vector.broadcast %16 : vector<1x512xbf16> to vector<8x512xbf16>
    %18 = arith.mulf %15, %17 : vector<8x512xbf16>
    %c8 = arith.constant 8 : index
    %c0_18 = arith.constant 0 : index
    %19 = vector.load %arg11[%c8, %c0_18] : memref<216x512xbf16, #tpu.memory_space<vmem>>, vector<8x512xbf16>
    tpu.vector_store %arg11[%c8, %c0_18], %18 {strides = array<i32>} : memref<216x512xbf16, #tpu.memory_space<vmem>>, vector<8x512xbf16>,
    %c0_19 = arith.constant 0 : index
    %c57 = arith.constant 57 : index
    %20 = vector.load %arg10[%c0_19, %c57] : memref<8x768xbf16, #tpu.memory_space<vmem>>, vector<8x512xbf16>
    %c2 = arith.constant 2 : index
    %c0_20 = arith.constant 0 : index
    %21 = vector.load %arg4[%c2, %c0_20] : memref<9x512xbf16, #tpu.memory_space<vmem>>, vector<1x512xbf16>
    %22 = vector.broadcast %21 : vector<1x512xbf16> to vector<8x512xbf16>
    %23 = arith.mulf %20, %22 : vector<8x512xbf16>
    %c16 = arith.constant 16 : index
    %c0_21 = arith.constant 0 : index
    %24 = vector.load %arg11[%c16, %c0_21] : memref<216x512xbf16, #tpu.memory_space<vmem>>, vector<8x512xbf16>
    tpu.vector_store %arg11[%c16, %c0_21], %23 {strides = array<i32>} : memref<216x512xbf16, #tpu.memory_space<vmem>>, vector<8x512xbf16>,
    %c0_22 = arith.constant 0 : index
    %c63 = arith.constant 63 : index
    %25 = vector.load %arg10[%c0_22, %c63] : memref<8x768xbf16, #tpu.memory_space<vmem>>, vector<8x512xbf16>
    %c3 = arith.constant 3 : index
    %c0_23 = arith.constant 0 : index
    %26 = vector.load %arg4[%c3, %c0_23] : memref<9x512xbf16, #tpu.memory_space<vmem>>, vector<1x512xbf16>
    %27 = vector.broadcast %26 : vector<1x512xbf16> to vector<8x512xbf16>
    %28 = arith.mulf %25, %27 : vector<8x512xbf16>
    %c24 = arith.constant 24 : index
    %c0_24 = arith.constant 0 : index
    %29 = vector.load %arg11[%c24, %c0_24] : memref<216x512xbf16, #tpu.memory_space<vmem>>, vector<8x512xbf16>
    tpu.vector_store %arg11[%c24, %c0_24], %28 {strides = array<i32>} : memref<216x512xbf16, #tpu.memory_space<vmem>>, vector<8x512xbf16>,
    %c0_25 = arith.constant 0 : index
    %c64 = arith.constant 64 : index
    %30 = vector.load %arg10[%c0_25, %c64] : memref<8x768xbf16, #tpu.memory_space<vmem>>, vector<8x512xbf16>
    %c32 = arith.constant 32 : index
    %c0_26 = arith.constant 0 : index
    %31 = vector.load %arg11[%c32, %c0_26] : memref<216x512xbf16, #tpu.memory_space<vmem>>, vector<8x512xbf16>
    tpu.vector_store %arg11[%c32, %c0_26], %30 {strides = array<i32>} : memref<216x512xbf16, #tpu.memory_space<vmem>>, vector<8x512xbf16>,
    %c0_27 = arith.constant 0 : index
    %c65 = arith.constant 65 : index
    %32 = vector.load %arg10[%c0_27, %c65] : memref<8x768xbf16, #tpu.memory_space<vmem>>, vector<8x512xbf16>
    %c5 = arith.constant 5 : index
    %c0_28 = arith.constant 0 : index
    %33 = vector.load %arg4[%c5, %c0_28] : memref<9x512xbf16, #tpu.memory_space<vmem>>, vector<1x512xbf16>
    %34 = vector.broadcast %33 : vector<1x512xbf16> to vector<8x512xbf16>
    %35 = arith.mulf %32, %34 : vector<8x512xbf16>
    %c40 = arith.constant 40 : index
    %c0_29 = arith.constant 0 : index
    %36 = vector.load %arg11[%c40, %c0_29] : memref<216x512xbf16, #tpu.memory_space<vmem>>, vector<8x512xbf16>
    tpu.vector_store %arg11[%c40, %c0_29], %35 {strides = array<i32>} : memref<216x512xbf16, #tpu.memory_space<vmem>>, vector<8x512xbf16>,
    %c0_30 = arith.constant 0 : index
    %c71 = arith.constant 71 : index
    %37 = vector.load %arg10[%c0_30, %c71] : memref<8x768xbf16, #tpu.memory_space<vmem>>, vector<8x512xbf16>
    %c6 = arith.constant 6 : index
    %c0_31 = arith.constant 0 : index
    %38 = vector.load %arg4[%c6, %c0_31] : memref<9x512xbf16, #tpu.memory_space<vmem>>, vector<1x512xbf16>
    %39 = vector.broadcast %38 : vector<1x512xbf16> to vector<8x512xbf16>
    %40 = arith.mulf %37, %39 : vector<8x512xbf16>
    %c48 = arith.constant 48 : index
    %c0_32 = arith.constant 0 : index
    %41 = vector.load %arg11[%c48, %c0_32] : memref<216x512xbf16, #tpu.memory_space<vmem>>, vector<8x512xbf16>
    tpu.vector_store %arg11[%c48, %c0_32], %40 {strides = array<i32>} : memref<216x512xbf16, #tpu.memory_space<vmem>>, vector<8x512xbf16>,
    %c0_33 = arith.constant 0 : index
    %c72 = arith.constant 72 : index
    %42 = vector.load %arg10[%c0_33, %c72] : memref<8x768xbf16, #tpu.memory_space<vmem>>, vector<8x512xbf16>
    %c7 = arith.constant 7 : index
    %c0_34 = arith.constant 0 : index
    %43 = vector.load %arg4[%c7, %c0_34] : memref<9x512xbf16, #tpu.memory_space<vmem>>, vector<1x512xbf16>
    %44 = vector.broadcast %43 : vector<1x512xbf16> to vector<8x512xbf16>
    %45 = arith.mulf %42, %44 : vector<8x512xbf16>
    %c56_35 = arith.constant 56 : index
    %c0_36 = arith.constant 0 : index
    %46 = vector.load %arg11[%c56_35, %c0_36] : memref<216x512xbf16, #tpu.memory_space<vmem>>, vector<8x512xbf16>
    tpu.vector_store %arg11[%c56_35, %c0_36], %45 {strides = array<i32>} : memref<216x512xbf16, #tpu.memory_space<vmem>>, vector<8x512xbf16>,
    %c0_37 = arith.constant 0 : index
    %c73 = arith.constant 73 : index
    %47 = vector.load %arg10[%c0_37, %c73] : memref<8x768xbf16, #tpu.memory_space<vmem>>, vector<8x512xbf16>
    %c8_38 = arith.constant 8 : index
    %c0_39 = arith.constant 0 : index
    %48 = vector.load %arg4[%c8_38, %c0_39] : memref<9x512xbf16, #tpu.memory_space<vmem>>, vector<1x512xbf16>
    %49 = vector.broadcast %48 : vector<1x512xbf16> to vector<8x512xbf16>
    %50 = arith.mulf %47, %49 : vector<8x512xbf16>
    %c64_40 = arith.constant 64 : index
    %c0_41 = arith.constant 0 : index
    %51 = vector.load %arg11[%c64_40, %c0_41] : memref<216x512xbf16, #tpu.memory_space<vmem>>, vector<8x512xbf16>
    tpu.vector_store %arg11[%c64_40, %c0_41], %50 {strides = array<i32>} : memref<216x512xbf16, #tpu.memory_space<vmem>>, vector<8x512xbf16>,
    %c0_42 = arith.constant 0 : index
    %c119 = arith.constant 119 : index
    %52 = vector.load %arg10[%c0_42, %c119] : memref<8x768xbf16, #tpu.memory_space<vmem>>, vector<8x512xbf16>
    %c0_43 = arith.constant 0 : index
    %c0_44 = arith.constant 0 : index
    %53 = vector.load %arg4[%c0_43, %c0_44] : memref<9x512xbf16, #tpu.memory_space<vmem>>, vector<1x512xbf16>
    %54 = vector.broadcast %53 : vector<1x512xbf16> to vector<8x512xbf16>
    %55 = arith.mulf %52, %54 : vector<8x512xbf16>
    %c72_45 = arith.constant 72 : index
    %c0_46 = arith.constant 0 : index
    %56 = vector.load %arg11[%c72_45, %c0_46] : memref<216x512xbf16, #tpu.memory_space<vmem>>, vector<8x512xbf16>
    tpu.vector_store %arg11[%c72_45, %c0_46], %55 {strides = array<i32>} : memref<216x512xbf16, #tpu.memory_space<vmem>>, vector<8x512xbf16>,
    %c0_47 = arith.constant 0 : index
    %c120 = arith.constant 120 : index
    %57 = vector.load %arg10[%c0_47, %c120] : memref<8x768xbf16, #tpu.memory_space<vmem>>, vector<8x512xbf16>
    %c1_48 = arith.constant 1 : index
    %c0_49 = arith.constant 0 : index
    %58 = vector.load %arg4[%c1_48, %c0_49] : memref<9x512xbf16, #tpu.memory_space<vmem>>, vector<1x512xbf16>
    %59 = vector.broadcast %58 : vector<1x512xbf16> to vector<8x512xbf16>
    %60 = arith.mulf %57, %59 : vector<8x512xbf16>
    %c80 = arith.constant 80 : index
    %c0_50 = arith.constant 0 : index
    %61 = vector.load %arg11[%c80, %c0_50] : memref<216x512xbf16, #tpu.memory_space<vmem>>, vector<8x512xbf16>
    tpu.vector_store %arg11[%c80, %c0_50], %60 {strides = array<i32>} : memref<216x512xbf16, #tpu.memory_space<vmem>>, vector<8x512xbf16>,
    %c0_51 = arith.constant 0 : index
    %c121 = arith.constant 121 : index
    %62 = vector.load %arg10[%c0_51, %c121] : memref<8x768xbf16, #tpu.memory_space<vmem>>, vector<8x512xbf16>
    %c2_52 = arith.constant 2 : index
    %c0_53 = arith.constant 0 : index
    %63 = vector.load %arg4[%c2_52, %c0_53] : memref<9x512xbf16, #tpu.memory_space<vmem>>, vector<1x512xbf16>
    %64 = vector.broadcast %63 : vector<1x512xbf16> to vector<8x512xbf16>
    %65 = arith.mulf %62, %64 : vector<8x512xbf16>
    %c88 = arith.constant 88 : index
    %c0_54 = arith.constant 0 : index
    %66 = vector.load %arg11[%c88, %c0_54] : memref<216x512xbf16, #tpu.memory_space<vmem>>, vector<8x512xbf16>
    tpu.vector_store %arg11[%c88, %c0_54], %65 {strides = array<i32>} : memref<216x512xbf16, #tpu.memory_space<vmem>>, vector<8x512xbf16>,
    %c0_55 = arith.constant 0 : index
    %c127 = arith.constant 127 : index
    %67 = vector.load %arg10[%c0_55, %c127] : memref<8x768xbf16, #tpu.memory_space<vmem>>, vector<8x512xbf16>
    %c3_56 = arith.constant 3 : index
    %c0_57 = arith.constant 0 : index
    %68 = vector.load %arg4[%c3_56, %c0_57] : memref<9x512xbf16, #tpu.memory_space<vmem>>, vector<1x512xbf16>
    %69 = vector.broadcast %68 : vector<1x512xbf16> to vector<8x512xbf16>
    %70 = arith.mulf %67, %69 : vector<8x512xbf16>
    %c96 = arith.constant 96 : index
    %c0_58 = arith.constant 0 : index
    %71 = vector.load %arg11[%c96, %c0_58] : memref<216x512xbf16, #tpu.memory_space<vmem>>, vector<8x512xbf16>
    tpu.vector_store %arg11[%c96, %c0_58], %70 {strides = array<i32>} : memref<216x512xbf16, #tpu.memory_space<vmem>>, vector<8x512xbf16>,
    %c0_59 = arith.constant 0 : index
    %c128_60 = arith.constant 128 : index
    %72 = vector.load %arg10[%c0_59, %c128_60] : memref<8x768xbf16, #tpu.memory_space<vmem>>, vector<8x512xbf16>
    %c104 = arith.constant 104 : index
    %c0_61 = arith.constant 0 : index
    %73 = vector.load %arg11[%c104, %c0_61] : memref<216x512xbf16, #tpu.memory_space<vmem>>, vector<8x512xbf16>
    tpu.vector_store %arg11[%c104, %c0_61], %72 {strides = array<i32>} : memref<216x512xbf16, #tpu.memory_space<vmem>>, vector<8x512xbf16>,
    %c0_62 = arith.constant 0 : index
    %c129 = arith.constant 129 : index
    %74 = vector.load %arg10[%c0_62, %c129] : memref<8x768xbf16, #tpu.memory_space<vmem>>, vector<8x512xbf16>
    %c5_63 = arith.constant 5 : index
    %c0_64 = arith.constant 0 : index
    %75 = vector.load %arg4[%c5_63, %c0_64] : memref<9x512xbf16, #tpu.memory_space<vmem>>, vector<1x512xbf16>
    %76 = vector.broadcast %75 : vector<1x512xbf16> to vector<8x512xbf16>
    %77 = arith.mulf %74, %76 : vector<8x512xbf16>
    %c112 = arith.constant 112 : index
    %c0_65 = arith.constant 0 : index
    %78 = vector.load %arg11[%c112, %c0_65] : memref<216x512xbf16, #tpu.memory_space<vmem>>, vector<8x512xbf16>
    tpu.vector_store %arg11[%c112, %c0_65], %77 {strides = array<i32>} : memref<216x512xbf16, #tpu.memory_space<vmem>>, vector<8x512xbf16>,
    %c0_66 = arith.constant 0 : index
    %c135 = arith.constant 135 : index
    %79 = vector.load %arg10[%c0_66, %c135] : memref<8x768xbf16, #tpu.memory_space<vmem>>, vector<8x512xbf16>
    %c6_67 = arith.constant 6 : index
    %c0_68 = arith.constant 0 : index
    %80 = vector.load %arg4[%c6_67, %c0_68] : memref<9x512xbf16, #tpu.memory_space<vmem>>, vector<1x512xbf16>
    %81 = vector.broadcast %80 : vector<1x512xbf16> to vector<8x512xbf16>
    %82 = arith.mulf %79, %81 : vector<8x512xbf16>
    %c120_69 = arith.constant 120 : index
    %c0_70 = arith.constant 0 : index
    %83 = vector.load %arg11[%c120_69, %c0_70] : memref<216x512xbf16, #tpu.memory_space<vmem>>, vector<8x512xbf16>
    tpu.vector_store %arg11[%c120_69, %c0_70], %82 {strides = array<i32>} : memref<216x512xbf16, #tpu.memory_space<vmem>>, vector<8x512xbf16>,
    %c0_71 = arith.constant 0 : index
    %c136 = arith.constant 136 : index
    %84 = vector.load %arg10[%c0_71, %c136] : memref<8x768xbf16, #tpu.memory_space<vmem>>, vector<8x512xbf16>
    %c7_72 = arith.constant 7 : index
    %c0_73 = arith.constant 0 : index
    %85 = vector.load %arg4[%c7_72, %c0_73] : memref<9x512xbf16, #tpu.memory_space<vmem>>, vector<1x512xbf16>
    %86 = vector.broadcast %85 : vector<1x512xbf16> to vector<8x512xbf16>
    %87 = arith.mulf %84, %86 : vector<8x512xbf16>
    %c128_74 = arith.constant 128 : index
    %c0_75 = arith.constant 0 : index
    %88 = vector.load %arg11[%c128_74, %c0_75] : memref<216x512xbf16, #tpu.memory_space<vmem>>, vector<8x512xbf16>
    tpu.vector_store %arg11[%c128_74, %c0_75], %87 {strides = array<i32>} : memref<216x512xbf16, #tpu.memory_space<vmem>>, vector<8x512xbf16>,
    %c0_76 = arith.constant 0 : index
    %c137 = arith.constant 137 : index
    %89 = vector.load %arg10[%c0_76, %c137] : memref<8x768xbf16, #tpu.memory_space<vmem>>, vector<8x512xbf16>
    %c8_77 = arith.constant 8 : index
    %c0_78 = arith.constant 0 : index
    %90 = vector.load %arg4[%c8_77, %c0_78] : memref<9x512xbf16, #tpu.memory_space<vmem>>, vector<1x512xbf16>
    %91 = vector.broadcast %90 : vector<1x512xbf16> to vector<8x512xbf16>
    %92 = arith.mulf %89, %91 : vector<8x512xbf16>
    %c136_79 = arith.constant 136 : index
    %c0_80 = arith.constant 0 : index
    %93 = vector.load %arg11[%c136_79, %c0_80] : memref<216x512xbf16, #tpu.memory_space<vmem>>, vector<8x512xbf16>
    tpu.vector_store %arg11[%c136_79, %c0_80], %92 {strides = array<i32>} : memref<216x512xbf16, #tpu.memory_space<vmem>>, vector<8x512xbf16>,
    %c0_81 = arith.constant 0 : index
    %c183 = arith.constant 183 : index
    %94 = vector.load %arg10[%c0_81, %c183] : memref<8x768xbf16, #tpu.memory_space<vmem>>, vector<8x512xbf16>
    %c0_82 = arith.constant 0 : index
    %c0_83 = arith.constant 0 : index
    %95 = vector.load %arg4[%c0_82, %c0_83] : memref<9x512xbf16, #tpu.memory_space<vmem>>, vector<1x512xbf16>
    %96 = vector.broadcast %95 : vector<1x512xbf16> to vector<8x512xbf16>
    %97 = arith.mulf %94, %96 : vector<8x512xbf16>
    %c144 = arith.constant 144 : index
    %c0_84 = arith.constant 0 : index
    %98 = vector.load %arg11[%c144, %c0_84] : memref<216x512xbf16, #tpu.memory_space<vmem>>, vector<8x512xbf16>
    tpu.vector_store %arg11[%c144, %c0_84], %97 {strides = array<i32>} : memref<216x512xbf16, #tpu.memory_space<vmem>>, vector<8x512xbf16>,
    %c0_85 = arith.constant 0 : index
    %c184 = arith.constant 184 : index
    %99 = vector.load %arg10[%c0_85, %c184] : memref<8x768xbf16, #tpu.memory_space<vmem>>, vector<8x512xbf16>
    %c1_86 = arith.constant 1 : index
    %c0_87 = arith.constant 0 : index
    %100 = vector.load %arg4[%c1_86, %c0_87] : memref<9x512xbf16, #tpu.memory_space<vmem>>, vector<1x512xbf16>
    %101 = vector.broadcast %100 : vector<1x512xbf16> to vector<8x512xbf16>
    %102 = arith.mulf %99, %101 : vector<8x512xbf16>
    %c152 = arith.constant 152 : index
    %c0_88 = arith.constant 0 : index
    %103 = vector.load %arg11[%c152, %c0_88] : memref<216x512xbf16, #tpu.memory_space<vmem>>, vector<8x512xbf16>
    tpu.vector_store %arg11[%c152, %c0_88], %102 {strides = array<i32>} : memref<216x512xbf16, #tpu.memory_space<vmem>>, vector<8x512xbf16>,
    %c0_89 = arith.constant 0 : index
    %c185 = arith.constant 185 : index
    %104 = vector.load %arg10[%c0_89, %c185] : memref<8x768xbf16, #tpu.memory_space<vmem>>, vector<8x512xbf16>
    %c2_90 = arith.constant 2 : index
    %c0_91 = arith.constant 0 : index
    %105 = vector.load %arg4[%c2_90, %c0_91] : memref<9x512xbf16, #tpu.memory_space<vmem>>, vector<1x512xbf16>
    %106 = vector.broadcast %105 : vector<1x512xbf16> to vector<8x512xbf16>
    %107 = arith.mulf %104, %106 : vector<8x512xbf16>
    %c160 = arith.constant 160 : index
    %c0_92 = arith.constant 0 : index
    %108 = vector.load %arg11[%c160, %c0_92] : memref<216x512xbf16, #tpu.memory_space<vmem>>, vector<8x512xbf16>
    tpu.vector_store %arg11[%c160, %c0_92], %107 {strides = array<i32>} : memref<216x512xbf16, #tpu.memory_space<vmem>>, vector<8x512xbf16>,
    %c0_93 = arith.constant 0 : index
    %c191 = arith.constant 191 : index
    %109 = vector.load %arg10[%c0_93, %c191] : memref<8x768xbf16, #tpu.memory_space<vmem>>, vector<8x512xbf16>
    %c3_94 = arith.constant 3 : index
    %c0_95 = arith.constant 0 : index
    %110 = vector.load %arg4[%c3_94, %c0_95] : memref<9x512xbf16, #tpu.memory_space<vmem>>, vector<1x512xbf16>
    %111 = vector.broadcast %110 : vector<1x512xbf16> to vector<8x512xbf16>
    %112 = arith.mulf %109, %111 : vector<8x512xbf16>
    %c168 = arith.constant 168 : index
    %c0_96 = arith.constant 0 : index
    %113 = vector.load %arg11[%c168, %c0_96] : memref<216x512xbf16, #tpu.memory_space<vmem>>, vector<8x512xbf16>
    tpu.vector_store %arg11[%c168, %c0_96], %112 {strides = array<i32>} : memref<216x512xbf16, #tpu.memory_space<vmem>>, vector<8x512xbf16>,
    %c0_97 = arith.constant 0 : index
    %c192 = arith.constant 192 : index
    %114 = vector.load %arg10[%c0_97, %c192] : memref<8x768xbf16, #tpu.memory_space<vmem>>, vector<8x512xbf16>
    %c176 = arith.constant 176 : index
    %c0_98 = arith.constant 0 : index
    %115 = vector.load %arg11[%c176, %c0_98] : memref<216x512xbf16, #tpu.memory_space<vmem>>, vector<8x512xbf16>
    tpu.vector_store %arg11[%c176, %c0_98], %114 {strides = array<i32>} : memref<216x512xbf16, #tpu.memory_space<vmem>>, vector<8x512xbf16>,
    %c0_99 = arith.constant 0 : index
    %c193 = arith.constant 193 : index
    %116 = vector.load %arg10[%c0_99, %c193] : memref<8x768xbf16, #tpu.memory_space<vmem>>, vector<8x512xbf16>
    %c5_100 = arith.constant 5 : index
    %c0_101 = arith.constant 0 : index
    %117 = vector.load %arg4[%c5_100, %c0_101] : memref<9x512xbf16, #tpu.memory_space<vmem>>, vector<1x512xbf16>
    %118 = vector.broadcast %117 : vector<1x512xbf16> to vector<8x512xbf16>
    %119 = arith.mulf %116, %118 : vector<8x512xbf16>
    %c184_102 = arith.constant 184 : index
    %c0_103 = arith.constant 0 : index
    %120 = vector.load %arg11[%c184_102, %c0_103] : memref<216x512xbf16, #tpu.memory_space<vmem>>, vector<8x512xbf16>
    tpu.vector_store %arg11[%c184_102, %c0_103], %119 {strides = array<i32>} : memref<216x512xbf16, #tpu.memory_space<vmem>>, vector<8x512xbf16>,
    %c0_104 = arith.constant 0 : index
    %c199 = arith.constant 199 : index
    %121 = vector.load %arg10[%c0_104, %c199] : memref<8x768xbf16, #tpu.memory_space<vmem>>, vector<8x512xbf16>
    %c6_105 = arith.constant 6 : index
    %c0_106 = arith.constant 0 : index
    %122 = vector.load %arg4[%c6_105, %c0_106] : memref<9x512xbf16, #tpu.memory_space<vmem>>, vector<1x512xbf16>
    %123 = vector.broadcast %122 : vector<1x512xbf16> to vector<8x512xbf16>
    %124 = arith.mulf %121, %123 : vector<8x512xbf16>
    %c192_107 = arith.constant 192 : index
    %c0_108 = arith.constant 0 : index
    %125 = vector.load %arg11[%c192_107, %c0_108] : memref<216x512xbf16, #tpu.memory_space<vmem>>, vector<8x512xbf16>
    tpu.vector_store %arg11[%c192_107, %c0_108], %124 {strides = array<i32>} : memref<216x512xbf16, #tpu.memory_space<vmem>>, vector<8x512xbf16>,
    %c0_109 = arith.constant 0 : index
    %c200 = arith.constant 200 : index
    %126 = vector.load %arg10[%c0_109, %c200] : memref<8x768xbf16, #tpu.memory_space<vmem>>, vector<8x512xbf16>
    %c7_110 = arith.constant 7 : index
    %c0_111 = arith.constant 0 : index
    %127 = vector.load %arg4[%c7_110, %c0_111] : memref<9x512xbf16, #tpu.memory_space<vmem>>, vector<1x512xbf16>
    %128 = vector.broadcast %127 : vector<1x512xbf16> to vector<8x512xbf16>
    %129 = arith.mulf %126, %128 : vector<8x512xbf16>
    %c200_112 = arith.constant 200 : index
    %c0_113 = arith.constant 0 : index
    %130 = vector.load %arg11[%c200_112, %c0_113] : memref<216x512xbf16, #tpu.memory_space<vmem>>, vector<8x512xbf16>
    tpu.vector_store %arg11[%c200_112, %c0_113], %129 {strides = array<i32>} : memref<216x512xbf16, #tpu.memory_space<vmem>>, vector<8x512xbf16>,
    %c0_114 = arith.constant 0 : index
    %c201 = arith.constant 201 : index
    %131 = vector.load %arg10[%c0_114, %c201] : memref<8x768xbf16, #tpu.memory_space<vmem>>, vector<8x512xbf16>
    %c8_115 = arith.constant 8 : index
    %c0_116 = arith.constant 0 : index
    %132 = vector.load %arg4[%c8_115, %c0_116] : memref<9x512xbf16, #tpu.memory_space<vmem>>, vector<1x512xbf16>
    %133 = vector.broadcast %132 : vector<1x512xbf16> to vector<8x512xbf16>
    %134 = arith.mulf %131, %133 : vector<8x512xbf16>
    %c208 = arith.constant 208 : index
    %c0_117 = arith.constant 0 : index
    %135 = vector.load %arg11[%c208, %c0_117] : memref<216x512xbf16, #tpu.memory_space<vmem>>, vector<8x512xbf16>
    tpu.vector_store %arg11[%c208, %c0_117], %134 {strides = array<i32>} : memref<216x512xbf16, #tpu.memory_space<vmem>>, vector<8x512xbf16>,
    %c0_118 = arith.constant 0 : index
    %c0_119 = arith.constant 0 : index
    %136 = vector.load %arg5[%c0_118, %c0_119] : memref<8x216xbf16, #tpu.memory_space<vmem>>, vector<8x216xbf16>
    %c0_120 = arith.constant 0 : index
    %c0_121 = arith.constant 0 : index
    %137 = vector.load %arg11[%c0_120, %c0_121] : memref<216x512xbf16, #tpu.memory_space<vmem>>, vector<216x512xbf16>
    %cst_122 = arith.constant dense<0.000000e+00> : vector<8x512xf32>
    %138 = tpu.matmul %136, %137, %cst_122 {dimension_numbers = #tpu.dot_dimension_numbers<[1], [0], [0], [1], [0, 0, 1, 1], [], []>} : vector<8x216xbf16>, vector<216x512xbf16>, vector<8x512xf32> -> vector<8x512xf32>
    %c0_123 = arith.constant 0 : index
    %c0_124 = arith.constant 0 : index
    %139 = vector.load %arg6[%c0_123, %c0_124] : memref<8x1xf32, #tpu.memory_space<vmem>>, vector<8x1xf32>
    %c0_125 = arith.constant 0 : index
    %c0_126 = arith.constant 0 : index
    %140 = vector.load %arg7[%c0_125, %c0_126] : memref<8x1xf32, #tpu.memory_space<vmem>>, vector<8x1xf32>
    %c0_127 = arith.constant 0 : index
    %c0_128 = arith.constant 0 : index
    %141 = vector.load %arg8[%c0_127, %c0_128] : memref<8x1xf32, #tpu.memory_space<vmem>>, vector<8x1xf32>
    %142 = tpu.iota {dimensions = array<i32: 0>} : vector<8x4xi32>
    %143 = tpu.iota {dimensions = array<i32: 1>} : vector<8x4xi32>
    %c2_i32 = arith.constant 2 : i32
    %144 = vector.broadcast %c2_i32 : i32 to vector<8x4xi32>
    %145 = arith.muli %143, %144 : vector<8x4xi32>
    %146 = arith.cmpi sge, %142, %145 : vector<8x4xi32>
    %c1_i32 = arith.constant 1 : i32
    %147 = vector.broadcast %c1_i32 : i32 to vector<8x4xi32>
    %148 = arith.addi %143, %147 : vector<8x4xi32>
    %c2_i32_129 = arith.constant 2 : i32
    %149 = vector.broadcast %c2_i32_129 : i32 to vector<8x4xi32>
    %150 = arith.muli %148, %149 : vector<8x4xi32>
    %151 = arith.cmpi slt, %142, %150 : vector<8x4xi32>
    %152 = arith.andi %146, %151 : vector<8x4xi1>
    %153 = arith.extui %152 : vector<8x4xi1> to vector<8x4xi32>
    %154 = arith.sitofp %153 : vector<8x4xi32> to vector<8x4xf32>
    %cst_130 = arith.constant dense<0.000000e+00> : vector<8xf32>
    %155 = vector.multi_reduction <add>, %138, %cst_130 [1] : vector<8x512xf32> to vector<8xf32>
    %156 = vector.shape_cast %155 : vector<8xf32> to vector<8x1xf32>
    %157 = vector.broadcast %156 : vector<8x1xf32> to vector<8x4xf32>
    %158 = arith.mulf %154, %157 : vector<8x4xf32>
    %cst_131 = arith.constant dense<0.000000e+00> : vector<4xf32>
    %159 = vector.multi_reduction <add>, %158, %cst_131 [0] : vector<8x4xf32> to vector<4xf32>
    %160 = vector.shape_cast %159 : vector<4xf32> to vector<1x4xf32>
    %161 = vector.broadcast %160 : vector<1x4xf32> to vector<8x4xf32>
    %162 = arith.mulf %154, %161 : vector<8x4xf32>
    %cst_132 = arith.constant dense<0.000000e+00> : vector<8xf32>
    %163 = vector.multi_reduction <add>, %162, %cst_132 [1] : vector<8x4xf32> to vector<8xf32>
    %164 = vector.shape_cast %163 : vector<8xf32> to vector<8x1xf32>
    %165 = vector.broadcast %139 : vector<8x1xf32> to vector<8x4xf32>
    %166 = arith.mulf %154, %165 : vector<8x4xf32>
    %cst_133 = arith.constant dense<0.000000e+00> : vector<4xf32>
    %167 = vector.multi_reduction <add>, %166, %cst_133 [0] : vector<8x4xf32> to vector<4xf32>
    %168 = vector.shape_cast %167 : vector<4xf32> to vector<1x4xf32>
    %169 = vector.broadcast %168 : vector<1x4xf32> to vector<8x4xf32>
    %170 = arith.mulf %154, %169 : vector<8x4xf32>
    %cst_134 = arith.constant dense<0.000000e+00> : vector<8xf32>
    %171 = vector.multi_reduction <add>, %170, %cst_134 [1] : vector<8x4xf32> to vector<8xf32>
    %172 = vector.shape_cast %171 : vector<8xf32> to vector<8x1xf32>
    %cst_135 = arith.constant 5.120000e+02 : f32
    %173 = vector.broadcast %cst_135 : f32 to vector<8x1xf32>
    %174 = arith.mulf %173, %172 : vector<8x1xf32>
    %175 = arith.addf %164, %174 : vector<8x1xf32>
    %cst_136 = arith.constant 1.024000e+03 : f32
    %176 = vector.broadcast %cst_136 : f32 to vector<8x1xf32>
    %177 = arith.divf %175, %176 : vector<8x1xf32>
    %178 = arith.subf %177, %139 : vector<8x1xf32>
    %179 = vector.broadcast %178 : vector<8x1xf32> to vector<8x512xf32>
    %180 = arith.subf %138, %179 : vector<8x512xf32>
    %181 = arith.mulf %180, %180 : vector<8x512xf32>
    %cst_137 = arith.constant dense<0.000000e+00> : vector<8xf32>
    %182 = vector.multi_reduction <add>, %181, %cst_137 [1] : vector<8x512xf32> to vector<8xf32>
    %183 = vector.shape_cast %182 : vector<8xf32> to vector<8x1xf32>
    %184 = vector.broadcast %183 : vector<8x1xf32> to vector<8x4xf32>
    %185 = arith.mulf %154, %184 : vector<8x4xf32>
    %cst_138 = arith.constant dense<0.000000e+00> : vector<4xf32>
    %186 = vector.multi_reduction <add>, %185, %cst_138 [0] : vector<8x4xf32> to vector<4xf32>
    %187 = vector.shape_cast %186 : vector<4xf32> to vector<1x4xf32>
    %188 = vector.broadcast %187 : vector<1x4xf32> to vector<8x4xf32>
    %189 = arith.mulf %154, %188 : vector<8x4xf32>
    %cst_139 = arith.constant dense<0.000000e+00> : vector<8xf32>
    %190 = vector.multi_reduction <add>, %189, %cst_139 [1] : vector<8x4xf32> to vector<8xf32>
    %191 = vector.shape_cast %190 : vector<8xf32> to vector<8x1xf32>
    %cst_140 = arith.constant 1.024000e+03 : f32
    %192 = vector.broadcast %cst_140 : f32 to vector<8x1xf32>
    %193 = arith.divf %191, %192 : vector<8x1xf32>
    %cst_141 = arith.constant 9.99999974E-6 : f32
    %194 = vector.broadcast %cst_141 : f32 to vector<8x1xf32>
    %195 = arith.addf %193, %194 : vector<8x1xf32>
    %196 = math.rsqrt %195 : vector<8x1xf32>
    %197 = arith.mulf %196, %140 : vector<8x1xf32>
    %198 = vector.broadcast %197 : vector<8x1xf32> to vector<8x512xf32>
    %199 = arith.mulf %180, %198 : vector<8x512xf32>
    %200 = vector.broadcast %141 : vector<8x1xf32> to vector<8x512xf32>
    %201 = arith.addf %199, %200 : vector<8x512xf32>
    %cst_142 = arith.constant 0.000000e+00 : f32
    %202 = vector.broadcast %cst_142 : f32 to vector<8x512xf32>
    %203 = arith.maximumf %201, %202 : vector<8x512xf32>
    %204 = arith.truncf %203 : vector<8x512xf32> to vector<8x512xbf16>
    %c0_143 = arith.constant 0 : index
    %c0_144 = arith.constant 0 : index
    %c0_145 = arith.constant 0 : index
    %205 = vector.load %arg9[%c0_143, %c0_144, %c0_145] : memref<1x8x512xbf16, #tpu.memory_space<vmem>>, vector<1x8x512xbf16>
    %206 = vector.shape_cast %205 : vector<1x8x512xbf16> to vector<8x512xbf16>
    %207 = vector.shape_cast %204 : vector<8x512xbf16> to vector<1x8x512xbf16>
    tpu.vector_store %arg9[%c0_143, %c0_144, %c0_145], %207 {strides = array<i32>} : memref<1x8x512xbf16, #tpu.memory_space<vmem>>, vector<1x8x512xbf16>,
    return
  }
  func.func @transform_0(%arg0: i32, %arg1: i32) -> (i32, i32, i32) {
    %c0_i32 = arith.constant 0 : i32
    %c0_i32_0 = arith.constant 0 : i32
    %c0_i32_1 = arith.constant 0 : i32
    return %arg0, %c0_i32, %c0_i32_0 : i32, i32, i32
  }
  func.func @transform_1(%arg0: i32, %arg1: i32) -> (i32, i32, i32) {
    %c0_i32 = arith.constant 0 : i32
    %c0_i32_0 = arith.constant 0 : i32
    %c0_i32_1 = arith.constant 0 : i32
    return %arg0, %c0_i32, %c0_i32_0 : i32, i32, i32
  }
  func.func @transform_2(%arg0: i32, %arg1: i32) -> (i32, i32) {
    %c0_i32 = arith.constant 0 : i32
    %c0_i32_0 = arith.constant 0 : i32
    %c0_i32_1 = arith.constant 0 : i32
    return %c0_i32, %c0_i32_0 : i32, i32
  }
  func.func @transform_3(%arg0: i32, %arg1: i32) -> (i32, i32) {
    %c0_i32 = arith.constant 0 : i32
    %c0_i32_0 = arith.constant 0 : i32
    return %arg1, %c0_i32 : i32, i32
  }
  func.func @transform_4(%arg0: i32, %arg1: i32) -> (i32, i32) {
    %c0_i32 = arith.constant 0 : i32
    %c0_i32_0 = arith.constant 0 : i32
    return %arg1, %c0_i32 : i32, i32
  }
  func.func @transform_5(%arg0: i32, %arg1: i32) -> (i32, i32) {
    %c0_i32 = arith.constant 0 : i32
    %c0_i32_0 = arith.constant 0 : i32
    return %arg1, %c0_i32 : i32, i32
  }
  func.func @transform_6(%arg0: i32, %arg1: i32) -> (i32, i32) {
    %c0_i32 = arith.constant 0 : i32
    %c0_i32_0 = arith.constant 0 : i32
    return %arg1, %c0_i32 : i32, i32
  }
  func.func @transform_7(%arg0: i32, %arg1: i32) -> (i32, i32, i32) {
    %c0_i32 = arith.constant 0 : i32
    %c0_i32_0 = arith.constant 0 : i32
    return %arg0, %arg1, %c0_i32 : i32, i32, i32
  }
}

</mosaic_0001>

<bundles_post_ra>
// kernel: tpu_custom_call.1
= control target key start
LH: loop header
LB: loop body
LE: loop exit
PB: predicated region body
PF: predicated region fallthrough
CT: control target
= control target key end

     0   :  { %s5397_s0 = inlined_call_operand.vmem [shape: bf16[2,4,512], index: 0, kind: input, shape index: {}]   ;;  %s5398_s1 = inlined_call_operand.hbm [shape: bf16[2,4,512], index: 1, kind: input, shape index: {}]   ;;  %s5399_s2 = inlined_call_operand.vmem [shape: bf16[9,512], index: 2, kind: input, shape index: {}]   ;;  %s5400_s3 = inlined_call_operand.hbm [shape: bf16[16,216], index: 3, kind: input, shape index: {}]   ;;  %s5401_s4 = inlined_call_operand.vmem [shape: f32[16,1], index: 4, kind: input, shape index: {}]   ;;  %s5402_s5 = inlined_call_operand.vmem [shape: f32[16,1], index: 5, kind: input, shape index: {}]   ;;  %s5403_s6 = inlined_call_operand.vmem [shape: f32[16,1], index: 6, kind: input, shape index: {}]   ;;  %s5404_s7 = inlined_call_operand.hbm [shape: bf16[2,16,512], index: 7, kind: output, shape index: {}]  }
   0x1   :  { %5434 = sst [smem:[#allocation18_spill]] %s5398_s1 }
   0x2   :  { %5435 = sst [smem:[#allocation19_spill]] %s5401_s4 }
   0x3   :  { %5436 = sst [smem:[#allocation20_spill]] %s5402_s5 }
   0x4   :  { %5437 = sst [smem:[#allocation21_spill]] %s5403_s6 }
   0x5   :  { %5438 = sst [smem:[#allocation22_spill]] %s5404_s7 }
   0x6   :  { %12 = vsyncpa [#allocation5], 0 }
   0x7   :  { %14 = vsyncpa [#allocation5 + $0x1], 0 }
   0x8   :  { %15 = vsyncpa [#allocation8], 0 }
   0x9   :  { %17 = vsyncpa [#allocation8 + $0x1], 0 }
   0xa   :  { %18 = vsyncpa [#allocation6], 0 }
   0xb   :  { %20 = vsyncpa [#allocation6 + $0x1], 0  ;;  %s4192_s24 = smov 0   ;;  %s4194_s25 = smov 0  }
   0xc   :  { %s4196_s26 = smov 0   ;;  %s4198_s27 = smov 0  }
   0xd   :  { %s4200_s28 = smov 0   ;;  %s4202_s29 = smov 0  }
   0xe   :  { %s4204_s30 = smov 0   ;;  %s4206_s8 = smov 0  }
   0xf   :  { %s4208_s9 = smov 0   ;;  %s4210_s10 = smov 0  }
  0x10   :  { %s4212_s11 = smov 0   ;;  %s4214_s12 = smov 0  }
  0x11   :  { %s4216_s13 = smov 0   ;;  %s4218_s14 = smov 0  }
  0x12 LB: > { %5439 = sst [smem:[#allocation13_spill]] %s4112_s10  ;;  %s5405_s15 = sadd.s32 4294967295, %s4128_s14   ;;  %s4128_s14 = sphi %s4218_s14, %s26_s14   ;;  %s4124_s13 = sphi %s4216_s13, %s5489_s13   ;;  %s4120_s12 = sphi %s4214_s12, %s5488_s12   ;;  %s4116_s11 = sphi %s4212_s11, %s5487_s11   ;;  %s4112_s10 = sphi %s4210_s10, %s5486_s10   ;;  %s4108_s9 = sphi %s4208_s9, %s5498_s9   ;;  %s4104_s8 = sphi %s4206_s8, %s5497_s8   ;;  %s4100_s30 = sphi %s4204_s30, %s5496_s30   ;;  %s4096_s29 = sphi %s4202_s29, %s5495_s29   ;;  %s4092_s28 = sphi %s4200_s28, %s5494_s28   ;;  %s4088_s27 = sphi %s4198_s27, %s5493_s27   ;;  %s4084_s26 = sphi %s4196_s26, %s5492_s26   ;;  %s4080_s25 = sphi %s4194_s25, %s5491_s25   ;;  %s4076_s24 = sphi %s4192_s24, %s5490_s24  }
  0x13   : > { %5440 = sst [smem:[#allocation14_spill]] %s4120_s12  ;;  %p78_p0 = scmp.ne.s32.totalorder %s4108_s9, %s4104_s8 }
  0x14   : > { %5441 = sst [smem:[#allocation15_spill]] %s4124_s13  ;;  %p5408_p1 = scmp.eq.s32.totalorder %s4128_s14, 0 }
  0x15   : > { %p84_p2 = scmp.ne.s32.totalorder %s4104_s8, %s4100_s30  ;;  %p4269_p3 = scmp.eq.s32.totalorder %s5405_s15, 0 }
  0x16   : > { %p80_p4 = por %p5408_p1, %p78_p0  ;;  %p5407_p6 = scmp.lt.s32.totalorder %s4128_s14, 4 }
  0x17   : > { %p4277_p5 = por %p4269_p3, %p84_p2  ;;  %s272_s20 = sand.u32 1, %s4108_s9  }
  0x18   : > { %s3660_s21 = sshll.u32 %s4124_s13, 7  ;;  %s3426_s22 = sshll.u32 %s272_s20, 3 }
  0x19   : > { %s5443_s19 = scalar_select %p4277_p5, 1, 0 }
  0x1a   : > { %s5444_s1 = sld [smem:[#allocation18_spill]]  ;;  %s276_s16 = scalar_lea.vmem [#allocation4], %s3426_s22 }
  0x1b   : > { %s284_s15 = sshll.u32 %s276_s16, 4  ;;  %p4291_p7 = pnand %p5407_p6, %p80_p4  ;;  %s4295_s15 = int_to_ptr.vmem [resolvable:$true] %s284_s15 }
  0x1c   : > { %s273_s23 = scalar_lea.sflag [#allocation5], %s272_s20 }
  0x1d   : > { %p3920_p11 = pneg %p4291_p7 }
  0x20   : > { %s4287_s17 = scalar_lea.hbm %s5444_s1, %s3660_s21  ;;  %s3923_s30 = scalar_lea.hbm %s5444_s1, 256 }
  0x21   : > { %s3918_s21 = scalar_lea.hbm %s4287_s17, 128  ;;  %p3924_p0 = scmp.lt.u32.totalorder %s4287_s17, %s5444_s1 }
  0x22   : > { %p3919_p10 = scmp.ne.s32.totalorder %s4287_s17, %s3918_s21  ;;  %p3925_p2 = scmp.lt.u32.totalorder %s3923_s30, %s3918_s21 }
  0x23   : > { %p3927_p6 = scmp.lt.u32.totalorder %s3918_s21, %s4287_s17 }
  0x24   : > { %p3921_p12 = pnand %p3920_p11, %p3919_p10  ;;  %p3926_p4 = por %p3925_p2, %p3924_p0 }
  0x26   : > { %p3922_p13 = pneg %p3921_p12  ;;  %p3928_p1 = por %p3927_p6, %p3926_p4 }
  0x28   : > { %p3929_p8 = pnand %p3928_p1, %p3922_p13 }
  0x2a   : > { %3932 = shalt.err (!%p3929_p8)
}
  0x2b   : > { %s3933_s20 = scalar_lea.vmem %s4295_s15, 128  ;;  %s4130_s16 = smov [#allocation4]  }
  0x2c   : > { %p3934_p10 = scmp.ne.s32.totalorder %s4295_s15, %s3933_s20  ;;  %s3938_s22 = sshll.u32 %s4130_s16, 4  ;;  %s3939_s22 = int_to_ptr.vmem [resolvable:$false] %s3938_s22 }
  0x2d   : > { %s3940_s5 = scalar_lea.vmem %s3939_s22, 256  ;;  %p3941_p5 = scmp.lt.s32.totalorder %s4295_s15, %s3939_s22 }
  0x2e   : > { %p3936_p12 = pnand %p3934_p10, %p3920_p11  ;;  %p3942_p0 = scmp.lt.s32.totalorder %s3940_s5, %s3933_s20 }
  0x30   : > { %p3937_p9 = pneg %p3936_p12  ;;  %p3943_p2 = por %p3942_p0, %p3941_p5 }
  0x32   : > { %p3944_p6 = pnand %p3943_p2, %p3937_p9 }
  0x34   : > { %3947 = shalt.err (!%p3944_p6)
}
  0x35   : > { %3674 = dma.hbm_to_vmem [thread:$0]  (!%p4291_p7), %s4287_s17, 128, %s4295_s15, %s273_s23  }
  0x36   : > { %s5446_s6 = sadd.s32 4294967295, %s4128_s14   ;;  %p5448_p5 = scmp.lt.s32.totalorder %s4128_s14, 5 }
  0x37   : > { %p4326_p1 = scmp.eq.s32.totalorder %s5446_s6, 3  ;;  %p5449_p8 = scmp.ge.s32.totalorder %s4128_s14, 1 }
  0x38   : > { %s3423_s30 = sadd.s32 4294967294, %s4128_s14   ;;  %s35_s20 = sadd.s32 1, %s4120_s12 }
  0x39   : > { %p4334_p9 = pnand %p5449_p8, %p5448_p5  ;;  %p36_p11 = scmp.ge.s32.totalorder %s35_s20, 2 }
  0x3a   : > { %s118_s15 = sadd.s32 1, %s4096_s29  ;;  %p125_p7 = scmp.ne.s32.totalorder %s4096_s29, %s4092_s28 }
  0x3b   : > { %p131_p13 = scmp.ne.s32.totalorder %s4092_s28, %s4088_s27  ;;  %s5500_s20 = smov (%p36_p11, %s35_s20), 0 }
  0x3c   : > { %5451 = sst [smem:[#allocation16_spill]] %s5500_s20  ;;  %s5452_s17 = sadd.s32 1, %s4124_s13 }
  0x3d   : > { %s5502_s17 = smov (!%p36_p11, %s5452_s17), %s4124_s13  ;;  %s115_s23 = ssub.s32 %s4120_s12, %s5500_s20 }
  0x3e   : > { %s224_s16 = sadd.s32 1, %s4084_s26  ;;  %p40_p4 = scmp.ge.s32.totalorder %s5502_s17, 2 }
  0x3f   : > { %p116_p10 = scmp.eq.s32.totalorder %s115_s23, 0  ;;  %p4355_p12 = por %p131_p13, %p4269_p3 }
  0x40   : > { %p234_p0 = scmp.ne.s32.totalorder %s4084_s26, %s4080_s25  ;;  %s5504_s17 = smov (%p40_p4, %s5502_s17), 0 }
  0x41   : > { %s5453_s27 = scalar_select %p4355_p12, 1, 0 }
  0x42   : > { %5454 = sst [smem:[#allocation17_spill]] %s5504_s17  ;;  %s68_s5 = ssub.s32 %s4124_s13, %s5504_s17 }
  0x43   : > { %s4364_s22 = scalar_select %p116_p10, %s4096_s29, %s118_s15  }
  0x44   : > { %p4370_p2 = por %p4326_p1, %p234_p0  ;;  %p69_p6 = scmp.eq.s32.totalorder %s68_s5, 0 }
  0x45   : > { %s221_s18 = sor.u32 %s115_s23, %s68_s5  ;;  %p240_p5 = scmp.ne.s32.totalorder %s4080_s25, %s4076_s24 }
  0x46   : > { %s5455_s6 = scalar_select %p4370_p2, 1, 0 }
  0x47   : > { %p222_p3 = scmp.eq.s32.totalorder %s221_s18, 0  ;;  %s5456_s1 = sadd.s32 1, %s4108_s9 }
  0x48   : > { %s4379_s20 = scalar_select %p69_p6, %s4108_s9, %s5456_s1  }
  0x49   : > { %s4382_s4 = scalar_select %p222_p3, %s4084_s26, %s224_s16  }
  0x4a   : > { %p241_p8 = scmp.eq.s32.totalorder %s3423_s30, 3  ;;  %s291_s10 = sand.u32 1, %s4096_s29  }
  0x4b   : > { %p5457_p11 = scmp.eq.s32.totalorder %s4128_s14, 0  ;;  %s3429_s7 = sshll.u32 %s291_s10, 3 }
  0x4c   : > { %p4390_p1 = por %p241_p8, %p240_p5  ;;  %s3661_s17 = sshll.u32 %s4120_s12, 7 }
  0x4d   : > { %p127_p13 = por %p125_p7, %p5457_p11  ;;  %s295_s13 = scalar_lea.vmem [#allocation7], %s3429_s7 }
  0x4e   : > { %s5458_s15 = scalar_select %p4390_p1, 1, 0 }
  0x4f   : > { %s303_s23 = sshll.u32 %s295_s13, 4  ;;  %s4398_s1 = scalar_lea.hbm %s5400_s3, %s3661_s17  ;;  %s4400_s23 = int_to_ptr.vmem [resolvable:$true] %s303_s23 }
  0x50   : > { %p5459_p7 = scmp.lt.s32.totalorder %s4128_s14, 4  ;;  %s292_s16 = scalar_lea.sflag [#allocation8], %s291_s10 }
  0x51   : > { %s3948_s13 = scalar_lea.hbm %s4398_s1, 128  ;;  %s3953_s5 = scalar_lea.hbm %s5400_s3, 256 }
  0x52   : > { %p4404_p4 = pnand %p5459_p7, %p127_p13  ;;  %p3949_p10 = scmp.ne.s32.totalorder %s4398_s1, %s3948_s13 }
  0x53   : > { %p3954_p5 = scmp.lt.u32.totalorder %s4398_s1, %s5400_s3  ;;  %p3955_p8 = scmp.lt.u32.totalorder %s3953_s5, %s3948_s13 }
  0x54   : > { %p3950_p0 = pneg %p4404_p4  ;;  %p3957_p13 = scmp.lt.u32.totalorder %s3948_s13, %s4398_s1 }
  0x55   : > { %p3956_p11 = por %p3955_p8, %p3954_p5 }
  0x56   : > { %p3951_p6 = pnand %p3950_p0, %p3949_p10 }
  0x57   : > { %p3958_p7 = por %p3957_p13, %p3956_p11 }
  0x58   : > { %p3952_p3 = pneg %p3951_p6 }
  0x5a   : > { %p3959_p1 = pnand %p3958_p7, %p3952_p3 }
  0x5c   : > { %3962 = shalt.err (!%p3959_p1)
}
  0x5d   : > { %s3963_s10 = scalar_lea.vmem %s4400_s23, 128  ;;  %s4131_s17 = smov [#allocation7]  }
  0x5e   : > { %p3964_p10 = scmp.ne.s32.totalorder %s4400_s23, %s3963_s10  ;;  %s3968_s7 = sshll.u32 %s4131_s17, 4  ;;  %s3969_s7 = int_to_ptr.vmem [resolvable:$false] %s3968_s7 }
  0x5f   : > { %s3970_s12 = scalar_lea.vmem %s3969_s7, 256  ;;  %p3971_p12 = scmp.lt.s32.totalorder %s4400_s23, %s3969_s7 }
  0x60   : > { %p3966_p6 = pnand %p3964_p10, %p3950_p0  ;;  %p3972_p5 = scmp.lt.s32.totalorder %s3970_s12, %s3963_s10 }
  0x62   : > { %p3967_p2 = pneg %p3966_p6  ;;  %p3973_p8 = por %p3972_p5, %p3971_p12 }
  0x64   : > { %p3974_p11 = pnand %p3973_p8, %p3967_p2 }
  0x66   : > { %3977 = shalt.err (!%p3974_p11)
}
  0x67   : > { %3677 = dma.hbm_to_vmem [thread:$0]  (!%p4404_p4), %s4398_s1, 128, %s4400_s23, %s292_s16  }
  0x68   : > { %333 = sbr.rel (%p4334_p9) target bundleno = 1657 (0x679), region = 48  ;;  %s335_s13 = sand.u32 (!%p4334_p9), 1, %s4104_s8  }
  0x69   : > { %s4436_s5 = sshll.u32 (!%p4334_p9), %s335_s13, 3  ;;  %s336_s18 = scalar_lea.sflag (!%p4334_p9), [#allocation5], %s335_s13 }
  0x6a   : > { %s339_s17 = scalar_lea.vmem (!%p4334_p9), [#allocation4], %s4436_s5  ;;  %p5461_p1 = scmp.ne.s32.totalorder (!%p4334_p9), %s5443_s19, 0 }
  0x6f   : > { %4063 = dma.done.wait (%p5461_p1), %s336_s18, 128  }
  0x70   : > { %4065 = vsyncadd (%p5461_p1), %s336_s18, 4294967168  ;;  %s344_s30 = sand.u32 1, %s4092_s28   ;;  %p5462_p9 = scmp.ne.s32.totalorder %s5453_s27, 0 }
  0x71   : > { %s4444_s23 = sshll.u32 %s344_s30, 3  ;;  %s345_s21 = scalar_lea.sflag [#allocation8], %s344_s30 }
  0x72   : > { %4067 = dma.done.wait (%p5462_p9), %s345_s21, 128  }
  0x73   : > { %4069 = vsyncadd (%p5462_p9), %s345_s21, 4294967168  ;;  %v481_v0 = vlaneseq  ;;  %v4132_v1 = vmov 0   ;;  %v652_v6 = vld [vmem:[%s5399_s2 + $0x8] sm:$0x22]  ;;  %v466_v7 = vld [vmem:[%s5399_s2] sm:$0x11] }
  0x74   : > { %419 = vst [vmem:[#allocation2] sm:$0xf] %v4132_v1  ;;  %420 = vst [vmem:[#allocation2 + $0x14] sm:$0xf] %v4132_v1  ;;  %3815 = vset.pattern.permute.xlu1 %v4132_v1  ;;  %3816 = vset.pattern.permute.xlu0 %v4132_v1  ;;  %v557_v8 = vld [vmem:[%s5399_s2] sm:$0x11]  ;;  %v3459_v9 = vcombine.low %v652_v6, %v652_v6  ;;  %v3460_v10 = vcombine.high %v652_v6, %v652_v6 }
  0x75   : > { %v4452_v2 = vshrl.u32 %v481_v0, 7  ;;  %v3445_v11 = vcombine.low %v466_v7, %v466_v7  ;;  %v3446_v12 = vcombine.high %v466_v7, %v466_v7  ;;  %v467_v13 = vld [vmem:[%s5399_s2 + $0x8] sm:$0x11]  ;;  %v3451_v14 = vcombine.low %v557_v8, %v557_v8  ;;  %v651_v31 = vld [vmem:[%s5399_s2] sm:$0x22]  ;;  %s4133_s13 = smov 57  }
  0x76   : > { %v3452_v15 = vcombine.high %v557_v8, %v557_v8  ;;  %v3447_v16 = vcombine.low %v467_v13, %v467_v13  ;;  %v3448_v17 = vcombine.high %v467_v13, %v467_v13  ;;  %v678_v18 = vpack.i.b16 %v3459_v9, %v3459_v9  ;;  %v558_v26 = vld [vmem:[%s5399_s2 + $0x8] sm:$0x11]  ;;  %v741_v36 = vld [vmem:[%s5399_s2] sm:$0x22]  ;;  %v742_v41 = vld [vmem:[%s5399_s2 + $0x8] sm:$0x22] }
  0x77   : > { %v4455_v3 = vsub.s32 0, %v4452_v2  ;;  %v4458_v4 = vsub.s32 1, %v4452_v2  ;;  %v4461_v5 = vsub.s32 2, %v4452_v2  ;;  %v685_v19 = vpack.i.b16 %v3460_v10, %v3460_v10  ;;  %s4134_s18 = smov 55   ;;  %p401_p12 = scmp.lt.s32.totalorder %s4116_s11, 1  ;;  %v4520_v13 = vld [vmem:[%s339_s17] sm:$0xff] }
  0x78   : > { %v479_v20 = vpack.i.b16 %v3445_v11, %v3445_v11  ;;  %v486_v21 = vpack.i.b16 %v3446_v12, %v3446_v12  ;;  %v570_v22 = vshrl.u32 %v3451_v14, 16  ;;  %v578_v23 = vshrl.u32 %v3452_v15, 16  ;;  %v859_v62 = vld [vmem:[%s5399_s2] sm:$0x44]  ;;  %s4135_s19 = smov 56   ;;  %s4136_s5 = smov 63  }
  0x79   : > { %v493_v24 = vpack.i.b16 %v3447_v16, %v3447_v16  ;;  %v500_v25 = vpack.i.b16 %v3448_v17, %v3448_v17  ;;  %v683_v27 = vrot.slane %v678_v18, %v4458_v4  ;;  %v690_v28 = vrot.slane %v685_v19, %v4458_v4  ;;  %v860_v12 = vld [vmem:[%s5399_s2 + $0x8] sm:$0x44]  ;;  %s4516_s10 = scalar_select %p401_p12, %s4116_s11, 1  ;;  %v951_v18 = vld [vmem:[%s5399_s2] sm:$0x88] }
  0x7a   : > { %v484_v29 = vrot.slane %v479_v20, %v4455_v3  ;;  %v491_v30 = vrot.slane %v486_v21, %v4455_v3  ;;  %v571_v32 = vpack.i.b16 %v570_v22, %v570_v22  ;;  %v579_v33 = vpack.i.b16 %v578_v23, %v578_v23  ;;  %3444 = vst.sshfl [vmem:[#allocation2 + $0xc] sm:$0xf0 pattern:$0x76325410] %v4520_v13  ;;  %s4137_s7 = smov 65   ;;  %s4138_s17 = smov 71  }
  0x7b   : > { %v498_v34 = vrot.slane %v493_v24, %v4455_v3  ;;  %v505_v35 = vrot.slane %v500_v25, %v4455_v3  ;;  %v3462_v37 = vcombine.low %v683_v27, %v690_v28  ;;  %v3453_v39 = vcombine.low %v558_v26, %v558_v26  ;;  %v952_v27 = vld [vmem:[%s5399_s2 + $0x8] sm:$0x88]  ;;  %s3662_s30 = sshll.u32 %s4516_s10, 3  ;;  %s4140_s10 = smov 73  }
  0x7c   : > { %v3449_v38 = vcombine.low %v484_v29, %v491_v30  ;;  %v3454_v40 = vcombine.high %v558_v26, %v558_v26  ;;  %v576_v42 = vrot.slane %v571_v32, %v4455_v3  ;;  %v584_v43 = vrot.slane %v579_v33, %v4455_v3  ;;  %s405_s16 = scalar_lea.vmem %s5397_s0, %s3662_s30  ;;  %s4139_s30 = smov 72  }
  0x7d   : > { %v3450_v44 = vcombine.low %v498_v34, %v505_v35  ;;  %v3457_v45 = vcombine.low %v651_v31, %v651_v31  ;;  %703 = vrot.lane.b32.xlu1 %v3462_v37, %s4133_s13  ;;  %v586_v46 = vshrl.u32 %v3453_v39, 16  ;;  %v3458_v48 = vcombine.high %v651_v31, %v651_v31  ;;  %s5417_s1 = smov 119   ;;  %s5427_s12 = smov 7  }
  0x7e   : > { %516 = vrot.lane.b32.xlu0 %v3449_v38, %s4134_s18  ;;  %v594_v47 = vshrl.u32 %v3454_v40, 16  ;;  %v3463_v49 = vcombine.low %v741_v36, %v741_v36  ;;  %v3455_v50 = vcombine.low %v576_v42, %v584_v43  ;;  %v3464_v52 = vcombine.high %v741_v36, %v741_v36  ;;  %v1039_v40 = vld [vmem:[%s5399_s2] sm:$0x88]  ;;  %s5463_s27 = smov 8   ;;  %s5464_s21 = smov 7  }
  0x7f   : > { %v664_v51 = vpack.i.b16 %v3457_v45, %v3457_v45  ;;  %v3465_v53 = vcombine.low %v742_v41, %v742_v41  ;;  %v587_v54 = vpack.i.b16 %v586_v46, %v586_v46  ;;  %v671_v56 = vpack.i.b16 %v3458_v48, %v3458_v48  ;;  %p5483_p0 = scmp.ne.s32.totalorder %s5455_s6, 0 }
  0x80   : > { %v595_v55 = vpack.i.b16 %v594_v47, %v594_v47  ;;  %v754_v57 = vshrl.u32 %v3463_v49, 16  ;;  %v762_v59 = vshrl.u32 %v3464_v52, 16  ;;  %v3466_v60 = vcombine.high %v742_v41, %v742_v41  ;;  %v4542_v41 = vld [vmem:[%s405_s16] sm:$0xff]  ;;  %s5421_s16 = smov 121  }
  0x81   : > { %v669_v58 = vrot.slane %v664_v51, %v4458_v4  ;;  %v770_v61 = vshrl.u32 %v3465_v53, 16  ;;  %611 = vrot.lane.b32.xlu1 %v3455_v50, %s4135_s19  ;;  %v592_v63 = vrot.slane %v587_v54, %v4455_v3  ;;  %v676_v6 = vrot.slane %v671_v56, %v4458_v4  ;;  %3441 = vst.sshfl [vmem:[#allocation2 + $0x4] sm:$0xf pattern:$0x76325410] %v4542_v41 }
  0x82   : > { %518 = vrot.lane.b32.xlu0 %v3450_v44, %s4134_s18  ;;  %v600_v1 = vrot.slane %v595_v55, %v4455_v3  ;;  %v4508_v7 = vsub.s32 3, %v4452_v2  ;;  %v755_v8 = vpack.i.b16 %v754_v57, %v754_v57  ;;  %v763_v9 = vpack.i.b16 %v762_v59, %v762_v59  ;;  %v1040_v50 = vld [vmem:[%s5399_s2 + $0x8] sm:$0x88]  ;;  %v1131_v55 = vld [vmem:[%s5399_s2 + $0x10] sm:$0x11] }
  0x83   : > { %v771_v10 = vpack.i.b16 %v770_v61, %v770_v61  ;;  %v778_v11 = vshrl.u32 %v3466_v60, 16  ;;  %v3461_v15 = vcombine.low %v669_v58, %v676_v6  ;;  %v3469_v16 = vcombine.low %v859_v62, %v859_v62  ;;  %v1132_v60 = vld [vmem:[%s5399_s2 + $0x18] sm:$0x11] }
  0x84   : > { %v3456_v14 = vcombine.low %v592_v63, %v600_v1  ;;  %v3470_v17 = vcombine.high %v859_v62, %v859_v62  ;;  %v760_v19 = vrot.slane %v755_v8, %v4458_v4  ;;  %v768_v20 = vrot.slane %v763_v9, %v4458_v4 }
  0x85   : > { %v776_v21 = vrot.slane %v771_v10, %v4458_v4  ;;  %v779_v22 = vpack.i.b16 %v778_v11, %v778_v11  ;;  %v872_v23 = vshrl.u32 %v3469_v16, 16  ;;  %v3471_v25 = vcombine.low %v860_v12, %v860_v12 }
  0x86   : > { %613 = vrot.lane.b32.xlu1 %v3456_v14, %s4135_s19  ;;  %701 = vrot.lane.b32.xlu0 %v3461_v15, %s4133_s13  ;;  %v880_v24 = vshrl.u32 %v3470_v17, 16  ;;  %v3472_v26 = vcombine.high %v860_v12, %v860_v12  ;;  %v3467_v28 = vcombine.low %v760_v19, %v768_v20  ;;  %v3475_v30 = vcombine.low %v951_v18, %v951_v18  ;;  %v1219_v20 = vld [vmem:[%s5399_s2] sm:$0x11] }
  0x87   : > { %v784_v29 = vrot.slane %v779_v22, %v4458_v4  ;;  %v3476_v31 = vcombine.high %v951_v18, %v951_v18  ;;  %v873_v32 = vpack.i.b16 %v872_v23, %v872_v23  ;;  %v888_v34 = vshrl.u32 %v3471_v25, 16 }
  0x88   : > { %v881_v33 = vpack.i.b16 %v880_v24, %v880_v24  ;;  %v896_v35 = vshrl.u32 %v3472_v26, 16  ;;  %v964_v37 = vpack.i.b16 %v3475_v30, %v3475_v30  ;;  %v3477_v39 = vcombine.low %v952_v27, %v952_v27 }
  0x89   : > { %v3468_v36 = vcombine.low %v776_v21, %v784_v29  ;;  %v971_v38 = vpack.i.b16 %v3476_v31, %v3476_v31  ;;  %v878_v42 = vrot.slane %v873_v32, %v4461_v5  ;;  %v889_v44 = vpack.i.b16 %v888_v34, %v888_v34  ;;  %v1220_v29 = vld [vmem:[%s5399_s2 + $0x8] sm:$0x11]  ;;  %v1309_v34 = vld [vmem:[%s5399_s2] sm:$0x11] }
  0x8a   : > { %795 = vrot.lane.b32.xlu0 %v3467_v28, %s4136_s5  ;;  %v886_v43 = vrot.slane %v881_v33, %v4461_v5  ;;  %v897_v45 = vpack.i.b16 %v896_v35, %v896_v35  ;;  %v969_v46 = vrot.slane %v964_v37, %v4508_v7  ;;  %v3478_v48 = vcombine.high %v952_v27, %v952_v27 }
  0x8b   : > { %797 = vrot.lane.b32.xlu1 %v3468_v36, %s4136_s5  ;;  %v976_v47 = vrot.slane %v971_v38, %v4508_v7  ;;  %v978_v49 = vpack.i.b16 %v3477_v39, %v3477_v39  ;;  %v894_v52 = vrot.slane %v889_v44, %v4461_v5  ;;  %v3481_v54 = vcombine.low %v1039_v40, %v1039_v40  ;;  %v1310_v39 = vld [vmem:[%s5399_s2 + $0x8] sm:$0x11] }
  0x8c   : > { %v3473_v51 = vcombine.low %v878_v42, %v886_v43  ;;  %v902_v53 = vrot.slane %v897_v45, %v4461_v5  ;;  %v985_v58 = vpack.i.b16 %v3478_v48, %v3478_v48  ;;  %v3482_v59 = vcombine.high %v1039_v40, %v1039_v40 }
  0x8d   : > { %v3479_v56 = vcombine.low %v969_v46, %v976_v47  ;;  %v983_v57 = vrot.slane %v978_v49, %v4508_v7  ;;  %v1052_v62 = vshrl.u32 %v3481_v54, 16  ;;  %v3483_v63 = vcombine.low %v1040_v50, %v1040_v50  ;;  %v1403_v49 = vld [vmem:[%s5399_s2] sm:$0x22] }
  0x8e   : > { %913 = vrot.lane.b32.xlu0 %v3473_v51, %s4137_s7  ;;  %v3474_v61 = vcombine.low %v894_v52, %v902_v53  ;;  %v3484_v1 = vcombine.high %v1040_v50, %v1040_v50  ;;  %v990_v6 = vrot.slane %v985_v58, %v4508_v7  ;;  %v1060_v8 = vshrl.u32 %v3482_v59, 16 }
  0x8f   : > { %v3487_v9 = vcombine.low %v1131_v55, %v1131_v55  ;;  %v3488_v10 = vcombine.high %v1131_v55, %v1131_v55  ;;  %v1053_v11 = vpack.i.b16 %v1052_v62, %v1052_v62  ;;  %v1068_v12 = vshrl.u32 %v3483_v63, 16  ;;  %v1404_v62 = vld [vmem:[%s5399_s2 + $0x8] sm:$0x22] }
  0x90   : > { %915 = vrot.lane.b32.xlu1 %v3474_v61, %s4137_s7  ;;  %v1076_v14 = vshrl.u32 %v3484_v1, 16  ;;  %v3489_v15 = vcombine.low %v1132_v60, %v1132_v60  ;;  %v3480_v16 = vcombine.low %v983_v57, %v990_v6  ;;  %v1061_v17 = vpack.i.b16 %v1060_v8, %v1060_v8 }
  0x91   : > { %v1144_v18 = vpack.i.b16 %v3487_v9, %v3487_v9  ;;  %v1151_v19 = vpack.i.b16 %v3488_v10, %v3488_v10  ;;  %v1058_v21 = vrot.slane %v1053_v11, %v4508_v7  ;;  %v1069_v22 = vpack.i.b16 %v1068_v12, %v1068_v12 }
  0x92   : > { %1001 = vrot.lane.b32.xlu0 %v3479_v56, %s4138_s17  ;;  %v1077_v23 = vpack.i.b16 %v1076_v14, %v1076_v14  ;;  %v3490_v24 = vcombine.high %v1132_v60, %v1132_v60  ;;  %v1066_v25 = vrot.slane %v1061_v17, %v4508_v7  ;;  %v1158_v28 = vpack.i.b16 %v3489_v15, %v3489_v15  ;;  %v1493_v14 = vld [vmem:[%s5399_s2] sm:$0x22] }
  0x93   : > { %v1149_v26 = vrot.slane %v1144_v18, %v4455_v3  ;;  %v1156_v27 = vrot.slane %v1151_v19, %v4455_v3  ;;  %v1074_v30 = vrot.slane %v1069_v22, %v4508_v7  ;;  %v3493_v33 = vcombine.low %v1219_v20, %v1219_v20  ;;  %v1494_v19 = vld [vmem:[%s5399_s2 + $0x8] sm:$0x22] }
  0x94   : > { %1003 = vrot.lane.b32.xlu1 %v3480_v16, %s4138_s17  ;;  %v1082_v31 = vrot.slane %v1077_v23, %v4508_v7  ;;  %v1165_v32 = vpack.i.b16 %v3490_v24, %v3490_v24  ;;  %v3485_v35 = vcombine.low %v1058_v21, %v1066_v25  ;;  %v1163_v37 = vrot.slane %v1158_v28, %v4455_v3 }
  0x95   : > { %v3491_v36 = vcombine.low %v1149_v26, %v1156_v27  ;;  %v3494_v38 = vcombine.high %v1219_v20, %v1219_v20  ;;  %v1232_v43 = vpack.i.b16 %v3493_v33, %v3493_v33  ;;  %v3495_v44 = vcombine.low %v1220_v29, %v1220_v29 }
  0x96   : > { %v3486_v40 = vcombine.low %v1074_v30, %v1082_v31  ;;  %v1170_v42 = vrot.slane %v1165_v32, %v4455_v3  ;;  %1093 = vrot.lane.b32.xlu0 %v3485_v35, %s4139_s30  ;;  %v3496_v46 = vcombine.high %v1220_v29, %v1220_v29  ;;  %v3499_v47 = vcombine.low %v1309_v34, %v1309_v34  ;;  %v1591_v32 = vld [vmem:[%s5399_s2] sm:$0x44] }
  0x97   : > { %v1239_v45 = vpack.i.b16 %v3494_v38, %v3494_v38  ;;  %v3500_v48 = vcombine.high %v1309_v34, %v1309_v34  ;;  %v1237_v51 = vrot.slane %v1232_v43, %v4455_v3  ;;  %v1246_v52 = vpack.i.b16 %v3495_v44, %v3495_v44 }
  0x98   : > { %1095 = vrot.lane.b32.xlu1 %v3486_v40, %s4139_s30  ;;  %v3492_v50 = vcombine.low %v1163_v37, %v1170_v42  ;;  %v3501_v53 = vcombine.low %v1310_v39, %v1310_v39  ;;  %v1253_v55 = vpack.i.b16 %v3496_v46, %v3496_v46  ;;  %v1322_v56 = vshrl.u32 %v3499_v47, 16  ;;  %v1592_v37 = vld [vmem:[%s5399_s2 + $0x8] sm:$0x44] }
  0x99   : > { %v1244_v54 = vrot.slane %v1239_v45, %v4455_v3  ;;  %v1330_v57 = vshrl.u32 %v3500_v48, 16  ;;  %v1251_v58 = vrot.slane %v1246_v52, %v4455_v3  ;;  %v3502_v59 = vcombine.high %v1310_v39, %v1310_v39 }
  0x9a   : > { %v1338_v60 = vshrl.u32 %v3501_v53, 16  ;;  %v3505_v61 = vcombine.low %v1403_v49, %v1403_v49  ;;  %1181 = vrot.lane.b32.xlu0 %v3491_v36, %s4140_s10  ;;  %v1258_v1 = vrot.slane %v1253_v55, %v4455_v3  ;;  %v1323_v6 = vpack.i.b16 %v1322_v56, %v1322_v56 }
  0x9b   : > { %v3497_v63 = vcombine.low %v1237_v51, %v1244_v54  ;;  %v1331_v8 = vpack.i.b16 %v1330_v57, %v1330_v57  ;;  %v1346_v10 = vshrl.u32 %v3502_v59, 16  ;;  %v3506_v11 = vcombine.high %v1403_v49, %v1403_v49  ;;  %v1683_v51 = vld [vmem:[%s5399_s2] sm:$0x88] }
  0x9c   : > { %1183 = vrot.lane.b32.xlu1 %v3492_v50, %s4140_s10  ;;  %v1339_v9 = vpack.i.b16 %v1338_v60, %v1338_v60  ;;  %v1416_v12 = vpack.i.b16 %v3505_v61, %v3505_v61  ;;  %v3498_v15 = vcombine.low %v1251_v58, %v1258_v1  ;;  %v1328_v16 = vrot.slane %v1323_v6, %v4455_v3  ;;  %v1684_v1 = vld [vmem:[%s5399_s2 + $0x8] sm:$0x88] }
  0x9d   : > { %v1336_v17 = vrot.slane %v1331_v8, %v4455_v3  ;;  %v3507_v18 = vcombine.low %v1404_v62, %v1404_v62  ;;  %v1347_v21 = vpack.i.b16 %v1346_v10, %v1346_v10  ;;  %v1423_v23 = vpack.i.b16 %v3506_v11, %v3506_v11  ;;  %v1771_v11 = vld [vmem:[%s5399_s2] sm:$0x88] }
  0x9e   : > { %v1344_v20 = vrot.slane %v1339_v9, %v4455_v3  ;;  %v1421_v22 = vrot.slane %v1416_v12, %v4458_v4  ;;  %1269 = vrot.lane.b32.xlu0 %v3497_v63, %s5417_s1  ;;  %v3508_v25 = vcombine.high %v1404_v62, %v1404_v62  ;;  %v3511_v27 = vcombine.low %v1493_v14, %v1493_v14 }
  0x9f   : > { %v3503_v24 = vcombine.low %v1328_v16, %v1336_v17  ;;  %v1430_v26 = vpack.i.b16 %v3507_v18, %v3507_v18  ;;  %v1352_v28 = vrot.slane %v1347_v21, %v4455_v3  ;;  %v1428_v29 = vrot.slane %v1423_v23, %v4458_v4  ;;  %v1772_v21 = vld [vmem:[%s5399_s2 + $0x8] sm:$0x88] }
  0xa0   : > { %1271 = vrot.lane.b32.xlu1 %v3498_v15, %s5417_s1  ;;  %v3512_v30 = vcombine.high %v1493_v14, %v1493_v14  ;;  %v3513_v31 = vcombine.low %v1494_v19, %v1494_v19  ;;  %v1437_v34 = vpack.i.b16 %v3508_v25, %v3508_v25  ;;  %v1506_v35 = vshrl.u32 %v3511_v27, 16  ;;  %s5419_s1 = smov 120  }
  0xa1   : > { %v1435_v33 = vrot.slane %v1430_v26, %v4458_v4  ;;  %v3514_v36 = vcombine.high %v1494_v19, %v1494_v19  ;;  %v3504_v38 = vcombine.low %v1344_v20, %v1352_v28  ;;  %v3509_v39 = vcombine.low %v1421_v22, %v1428_v29 }
  0xa2   : > { %v1514_v40 = vshrl.u32 %v3512_v30, 16  ;;  %v1522_v42 = vshrl.u32 %v3513_v31, 16  ;;  %1363 = vrot.lane.b32.xlu0 %v3503_v24, %s5419_s1  ;;  %v1442_v43 = vrot.slane %v1437_v34, %v4458_v4  ;;  %v1507_v44 = vpack.i.b16 %v1506_v35, %v1506_v35  ;;  %v1863_v34 = vld [vmem:[%s5399_s2 + $0x10] sm:$0x11]  ;;  %v1864_v35 = vld [vmem:[%s5399_s2 + $0x18] sm:$0x11] }
  0xa3   : > { %v1530_v45 = vshrl.u32 %v3514_v36, 16  ;;  %v3517_v46 = vcombine.low %v1591_v32, %v1591_v32  ;;  %v3518_v49 = vcombine.high %v1591_v32, %v1591_v32  ;;  %v3519_v50 = vcombine.low %v1592_v37, %v1592_v37 }
  0xa4   : > { %1365 = vrot.lane.b32.xlu1 %v3504_v38, %s5419_s1  ;;  %v1515_v47 = vpack.i.b16 %v1514_v40, %v1514_v40  ;;  %v1523_v48 = vpack.i.b16 %v1522_v42, %v1522_v42  ;;  %v3510_v52 = vcombine.low %v1435_v33, %v1442_v43  ;;  %v1512_v53 = vrot.slane %v1507_v44, %v4458_v4  ;;  %s5466_s1 = smov 127  }
  0xa5   : > { %v1531_v54 = vpack.i.b16 %v1530_v45, %v1530_v45  ;;  %v1604_v55 = vshrl.u32 %v3517_v46, 16  ;;  %v1612_v58 = vshrl.u32 %v3518_v49, 16  ;;  %v3520_v59 = vcombine.high %v1592_v37, %v1592_v37  ;;  %v1951_v49 = vld [vmem:[%s5399_s2] sm:$0x11] }
  0xa6   : > { %v1520_v56 = vrot.slane %v1515_v47, %v4458_v4  ;;  %v1528_v57 = vrot.slane %v1523_v48, %v4458_v4  ;;  %1453 = vrot.lane.b32.xlu0 %v3509_v39, %s5421_s16  ;;  %v1620_v62 = vshrl.u32 %v3519_v50, 16  ;;  %v3523_v63 = vcombine.low %v1683_v51, %v1683_v51 }
  0xa7   : > { %v1536_v60 = vrot.slane %v1531_v54, %v4458_v4  ;;  %v1605_v61 = vpack.i.b16 %v1604_v55, %v1604_v55  ;;  %v1613_v8 = vpack.i.b16 %v1612_v58, %v1612_v58  ;;  %v1628_v9 = vshrl.u32 %v3520_v59, 16 }
  0xa8   : > { %1455 = vrot.lane.b32.xlu1 %v3510_v52, %s5421_s16  ;;  %v3515_v6 = vcombine.low %v1512_v53, %v1520_v56  ;;  %v3524_v10 = vcombine.high %v1683_v51, %v1683_v51  ;;  %v1621_v15 = vpack.i.b16 %v1620_v62, %v1620_v62  ;;  %v1696_v16 = vpack.i.b16 %v3523_v63, %v3523_v63  ;;  %s5423_s16 = smov 127   ;;  %v1952_v62 = vld [vmem:[%s5399_s2 + $0x8] sm:$0x11] }
  0xa9   : > { %v3516_v12 = vcombine.low %v1528_v57, %v1536_v60  ;;  %v1610_v14 = vrot.slane %v1605_v61, %v4461_v5  ;;  %v1618_v17 = vrot.slane %v1613_v8, %v4461_v5  ;;  %v1629_v18 = vpack.i.b16 %v1628_v9, %v1628_v9  ;;  %v2039_v9 = vld [vmem:[%s5399_s2] sm:$0x11] }
  0xaa   : > { %v1703_v19 = vpack.i.b16 %v3524_v10, %v3524_v10  ;;  %v3525_v20 = vcombine.low %v1684_v1, %v1684_v1  ;;  %1547 = vrot.lane.b32.xlu0 %v3515_v6, %s5423_s16  ;;  %v1626_v22 = vrot.slane %v1621_v15, %v4461_v5  ;;  %v1701_v23 = vrot.slane %v1696_v16, %v4508_v7  ;;  %v2040_v15 = vld [vmem:[%s5399_s2 + $0x8] sm:$0x11] }
  0xab   : > { %v3526_v24 = vcombine.high %v1684_v1, %v1684_v1  ;;  %v3529_v25 = vcombine.low %v1771_v11, %v1771_v11  ;;  %v3521_v26 = vcombine.low %v1610_v14, %v1618_v17  ;;  %v1634_v27 = vrot.slane %v1629_v18, %v4461_v5 }
  0xac   : > { %1549 = vrot.lane.b32.xlu1 %v3516_v12, %s5423_s16  ;;  %v1708_v28 = vrot.slane %v1703_v19, %v4508_v7  ;;  %v1710_v29 = vpack.i.b16 %v3525_v20, %v3525_v20  ;;  %v3530_v31 = vcombine.high %v1771_v11, %v1771_v11  ;;  %v3531_v33 = vcombine.low %v1772_v21, %v1772_v21  ;;  %s5425_s16 = smov 1  }
  0xad   : > { %v1717_v30 = vpack.i.b16 %v3526_v24, %v3526_v24  ;;  %v1784_v32 = vshrl.u32 %v3529_v25, 16  ;;  %v3522_v36 = vcombine.low %v1626_v22, %v1634_v27  ;;  %v3532_v39 = vcombine.high %v1772_v21, %v1772_v21  ;;  %v2131_v24 = vld [vmem:[%s5399_s2] sm:$0x22] }
  0xae   : > { %v3527_v37 = vcombine.low %v1701_v23, %v1708_v28  ;;  %v1715_v38 = vrot.slane %v1710_v29, %v4508_v7  ;;  %1645 = vrot.lane.b32.xlu0 %v3521_v26, %s5425_s16  ;;  %v1792_v43 = vshrl.u32 %v3530_v31, 16  ;;  %v1800_v44 = vshrl.u32 %v3531_v33, 16 }
  0xaf   : > { %v1722_v40 = vrot.slane %v1717_v30, %v4508_v7  ;;  %v1785_v42 = vpack.i.b16 %v1784_v32, %v1784_v32  ;;  %v1808_v45 = vshrl.u32 %v3532_v39, 16  ;;  %v3535_v46 = vcombine.low %v1863_v34, %v1863_v34 }
  0xb0   : > { %1647 = vrot.lane.b32.xlu1 %v3522_v36, %s5425_s16  ;;  %v3536_v47 = vcombine.high %v1863_v34, %v1863_v34  ;;  %v3537_v48 = vcombine.low %v1864_v35, %v1864_v35  ;;  %v1793_v52 = vpack.i.b16 %v1792_v43, %v1792_v43  ;;  %v1801_v53 = vpack.i.b16 %v1800_v44, %v1800_v44  ;;  %s4148_s16 = smov 9  }
  0xb1   : > { %v3528_v50 = vcombine.low %v1715_v38, %v1722_v40  ;;  %v1790_v51 = vrot.slane %v1785_v42, %v4508_v7  ;;  %v1809_v54 = vpack.i.b16 %v1808_v45, %v1808_v45  ;;  %v1876_v55 = vpack.i.b16 %v3535_v46, %v3535_v46 }
  0xb2   : > { %v1883_v56 = vpack.i.b16 %v3536_v47, %v3536_v47  ;;  %v3538_v57 = vcombine.high %v1864_v35, %v1864_v35  ;;  %1733 = vrot.lane.b32.xlu0 %v3527_v37, %s5427_s12  ;;  %v1798_v58 = vrot.slane %v1793_v52, %v4508_v7  ;;  %v1806_v59 = vrot.slane %v1801_v53, %v4508_v7  ;;  %v2132_v37 = vld [vmem:[%s5399_s2 + $0x8] sm:$0x22]  ;;  %v2219_v47 = vld [vmem:[%s5399_s2] sm:$0x22] }
  0xb3   : > { %v1890_v60 = vpack.i.b16 %v3537_v48, %v3537_v48  ;;  %v3541_v61 = vcombine.low %v1951_v49, %v1951_v49  ;;  %v1814_v63 = vrot.slane %v1809_v54, %v4508_v7  ;;  %v1881_v1 = vrot.slane %v1876_v55, %v4455_v3  ;;  %v2220_v52 = vld [vmem:[%s5399_s2 + $0x8] sm:$0x22] }
  0xb4   : > { %1735 = vrot.lane.b32.xlu1 %v3528_v50, %s5427_s12  ;;  %v1888_v6 = vrot.slane %v1883_v56, %v4455_v3  ;;  %v1897_v8 = vpack.i.b16 %v3538_v57, %v3538_v57  ;;  %v3533_v10 = vcombine.low %v1790_v51, %v1798_v58  ;;  %v3542_v12 = vcombine.high %v1951_v49, %v1951_v49  ;;  %s5429_s12 = smov 8  }
  0xb5   : > { %v1895_v11 = vrot.slane %v1890_v60, %v4455_v3  ;;  %v1964_v14 = vpack.i.b16 %v3541_v61, %v3541_v61  ;;  %v3534_v16 = vcombine.low %v1806_v59, %v1814_v63  ;;  %v3543_v19 = vcombine.low %v1952_v62, %v1952_v62 }
  0xb6   : > { %v3539_v17 = vcombine.low %v1881_v1, %v1888_v6  ;;  %v1902_v18 = vrot.slane %v1897_v8, %v4455_v3  ;;  %1825 = vrot.lane.b32.xlu0 %v3533_v10, %s5429_s12  ;;  %v1971_v21 = vpack.i.b16 %v3542_v12, %v3542_v12  ;;  %v3544_v22 = vcombine.high %v1952_v62, %v1952_v62  ;;  %v2334_v6 = vld [vmem:[%s5399_s2] sm:$0x44]  ;;  %v2335_v12 = vld [vmem:[%s5399_s2 + $0x8] sm:$0x44] }
  0xb7   : > { %v1969_v20 = vrot.slane %v1964_v14, %v4455_v3  ;;  %v3547_v23 = vcombine.low %v2039_v9, %v2039_v9  ;;  %v1978_v26 = vpack.i.b16 %v3543_v19, %v3543_v19  ;;  %v3548_v27 = vcombine.high %v2039_v9, %v2039_v9 }
  0xb8   : > { %1827 = vrot.lane.b32.xlu1 %v3534_v16, %s5429_s12  ;;  %v3540_v25 = vcombine.low %v1895_v11, %v1902_v18  ;;  %v3549_v28 = vcombine.low %v2040_v15, %v2040_v15  ;;  %v1976_v29 = vrot.slane %v1971_v21, %v4455_v3  ;;  %v1985_v30 = vpack.i.b16 %v3544_v22, %v3544_v22  ;;  %s4149_s12 = smov 64  }
  0xb9   : > { %v2052_v31 = vshrl.u32 %v3547_v23, 16  ;;  %v3550_v32 = vcombine.high %v2040_v15, %v2040_v15  ;;  %v1983_v33 = vrot.slane %v1978_v26, %v4455_v3  ;;  %v2060_v34 = vshrl.u32 %v3548_v27, 16  ;;  %v2426_v26 = vld [vmem:[%s5399_s2] sm:$0x88] }
  0xba   : > { %v2068_v35 = vshrl.u32 %v3549_v28, 16  ;;  %v3553_v36 = vcombine.low %v2131_v24, %v2131_v24  ;;  %1913 = vrot.lane.b32.xlu0 %v3539_v17, %s4148_s16  ;;  %v3545_v38 = vcombine.low %v1969_v20, %v1976_v29  ;;  %v1990_v39 = vrot.slane %v1985_v30, %v4455_v3 }
  0xbb   : > { %v2053_v40 = vpack.i.b16 %v2052_v31, %v2052_v31  ;;  %v2076_v42 = vshrl.u32 %v3550_v32, 16  ;;  %v2061_v43 = vpack.i.b16 %v2060_v34, %v2060_v34  ;;  %v3554_v45 = vcombine.high %v2131_v24, %v2131_v24 }
  0xbc   : > { %1915 = vrot.lane.b32.xlu1 %v3540_v25, %s4148_s16  ;;  %v2069_v44 = vpack.i.b16 %v2068_v35, %v2068_v35  ;;  %v2144_v46 = vpack.i.b16 %v3553_v36, %v3553_v36  ;;  %v3546_v48 = vcombine.low %v1983_v33, %v1990_v39  ;;  %v3555_v51 = vcombine.low %v2132_v37, %v2132_v37  ;;  %v2427_v39 = vld [vmem:[%s5399_s2 + $0x8] sm:$0x88] }
  0xbd   : > { %v2058_v49 = vrot.slane %v2053_v40, %v4455_v3  ;;  %v2077_v50 = vpack.i.b16 %v2076_v42, %v2076_v42  ;;  %v2066_v53 = vrot.slane %v2061_v43, %v4455_v3  ;;  %v2151_v56 = vpack.i.b16 %v3554_v45, %v3554_v45 }
  0xbe   : > { %v2074_v54 = vrot.slane %v2069_v44, %v4455_v3  ;;  %v2149_v55 = vrot.slane %v2144_v46, %v4458_v4  ;;  %2001 = vrot.lane.b32.xlu0 %v3545_v38, %s4134_s18  ;;  %v3556_v58 = vcombine.high %v2132_v37, %v2132_v37  ;;  %v2158_v59 = vpack.i.b16 %v3555_v51, %v3555_v51 }
  0xbf   : > { %v2082_v57 = vrot.slane %v2077_v50, %v4455_v3  ;;  %v3559_v60 = vcombine.low %v2219_v47, %v2219_v47  ;;  %v3551_v61 = vcombine.low %v2058_v49, %v2066_v53  ;;  %v2156_v62 = vrot.slane %v2151_v56, %v4458_v4  ;;  %v2514_v49 = vld [vmem:[%s5399_s2] sm:$0x88] }
  0xc0   : > { %2003 = vrot.lane.b32.xlu1 %v3546_v48, %s4134_s18  ;;  %v3560_v63 = vcombine.high %v2219_v47, %v2219_v47  ;;  %v3561_v1 = vcombine.low %v2220_v52, %v2220_v52  ;;  %v2163_v9 = vrot.slane %v2158_v59, %v4458_v4  ;;  %v2165_v10 = vpack.i.b16 %v3556_v58, %v3556_v58 }
  0xc1   : > { %v3552_v8 = vcombine.low %v2074_v54, %v2082_v57  ;;  %v2232_v11 = vshrl.u32 %v3559_v60, 16  ;;  %v3557_v14 = vcombine.low %v2149_v55, %v2156_v62  ;;  %v3562_v16 = vcombine.high %v2220_v52, %v2220_v52 }
  0xc2   : > { %v2240_v15 = vshrl.u32 %v3560_v63, 16  ;;  %v2248_v17 = vshrl.u32 %v3561_v1, 16  ;;  %2093 = vrot.lane.b32.xlu0 %v3551_v61, %s4135_s19  ;;  %v2170_v18 = vrot.slane %v2165_v10, %v4458_v4  ;;  %v3565_v20 = vcombine.low %v2334_v6, %v2334_v6 }
  0xc3   : > { %v2233_v19 = vpack.i.b16 %v2232_v11, %v2232_v11  ;;  %v3566_v21 = vcombine.high %v2334_v6, %v2334_v6  ;;  %v2256_v24 = vshrl.u32 %v3562_v16, 16  ;;  %v3567_v25 = vcombine.low %v2335_v12, %v2335_v12 }
  0xc4   : > { %2095 = vrot.lane.b32.xlu1 %v3552_v8, %s4135_s19  ;;  %v2241_v22 = vpack.i.b16 %v2240_v15, %v2240_v15  ;;  %v2249_v23 = vpack.i.b16 %v2248_v17, %v2248_v17  ;;  %v3558_v27 = vcombine.low %v2163_v9, %v2170_v18  ;;  %v2347_v29 = vshrl.u32 %v3565_v20, 16  ;;  %v2606_v8 = vld [vmem:[%s5399_s2 + $0x10] sm:$0x11]  ;;  %v2607_v9 = vld [vmem:[%s5399_s2 + $0x18] sm:$0x11] }
  0xc5   : > { %v2238_v28 = vrot.slane %v2233_v19, %v4458_v4  ;;  %v2355_v30 = vshrl.u32 %v3566_v21, 16  ;;  %v2257_v33 = vpack.i.b16 %v2256_v24, %v2256_v24  ;;  %v3568_v34 = vcombine.high %v2335_v12, %v2335_v12 }
  0xc6   : > { %v2246_v31 = vrot.slane %v2241_v22, %v4458_v4  ;;  %v2254_v32 = vrot.slane %v2249_v23, %v4458_v4  ;;  %2181 = vrot.lane.b32.xlu0 %v3557_v14, %s4133_s13  ;;  %v2348_v35 = vpack.i.b16 %v2347_v29, %v2347_v29  ;;  %v2363_v37 = vshrl.u32 %v3567_v25, 16 }
  0xc7   : > { %v2356_v36 = vpack.i.b16 %v2355_v30, %v2355_v30  ;;  %v3571_v38 = vcombine.low %v2426_v26, %v2426_v26  ;;  %v2262_v42 = vrot.slane %v2257_v33, %v4458_v4  ;;  %v2371_v43 = vshrl.u32 %v3568_v34, 16  ;;  %v2515_v4 = vld [vmem:[%s5399_s2 + $0x8] sm:$0x88] }
  0xc8   : > { %2183 = vrot.lane.b32.xlu1 %v3558_v27, %s4133_s13  ;;  %v3563_v40 = vcombine.low %v2238_v28, %v2246_v31  ;;  %v3572_v44 = vcombine.high %v2426_v26, %v2426_v26  ;;  %v2353_v45 = vrot.slane %v2348_v35, %v4461_v5  ;;  %v2364_v47 = vpack.i.b16 %v2363_v37, %v2363_v37 }
  0xc9   : > { %v2361_v46 = vrot.slane %v2356_v36, %v4461_v5  ;;  %v2439_v48 = vpack.i.b16 %v3571_v38, %v3571_v38  ;;  %v3564_v50 = vcombine.low %v2254_v32, %v2262_v42  ;;  %v2372_v51 = vpack.i.b16 %v2371_v43, %v2371_v43 }
  0xca   : > { %v2446_v52 = vpack.i.b16 %v3572_v44, %v3572_v44  ;;  %v3573_v53 = vcombine.low %v2427_v39, %v2427_v39  ;;  %2273 = vrot.lane.b32.xlu0 %v3563_v40, %s4136_s5  ;;  %v2369_v55 = vrot.slane %v2364_v47, %v4461_v5  ;;  %v3574_v57 = vcombine.high %v2427_v39, %v2427_v39 }
  0xcb   : > { %v3569_v54 = vcombine.low %v2353_v45, %v2361_v46  ;;  %v2444_v56 = vrot.slane %v2439_v48, %v4508_v7  ;;  %v2377_v58 = vrot.slane %v2372_v51, %v4461_v5  ;;  %v3577_v61 = vcombine.low %v2514_v49, %v2514_v49 }
  0xcc   : > { %2275 = vrot.lane.b32.xlu1 %v3564_v50, %s4136_s5  ;;  %v2451_v59 = vrot.slane %v2446_v52, %v4508_v7  ;;  %v2453_v60 = vpack.i.b16 %v3573_v53, %v3573_v53  ;;  %v2460_v62 = vpack.i.b16 %v3574_v57, %v3574_v57  ;;  %v3578_v63 = vcombine.high %v2514_v49, %v2514_v49 }
  0xcd   : > { %v3579_v1 = vcombine.low %v2515_v4, %v2515_v4  ;;  %v3580_v6 = vcombine.high %v2515_v4, %v2515_v4  ;;  %v3570_v10 = vcombine.low %v2369_v55, %v2377_v58  ;;  %v2527_v12 = vshrl.u32 %v3577_v61, 16 }
  0xce   : > { %v3575_v11 = vcombine.low %v2444_v56, %v2451_v59  ;;  %v2458_v5 = vrot.slane %v2453_v60, %v4508_v7  ;;  %2388 = vrot.lane.b32.xlu0 %v3569_v54, %s4137_s7  ;;  %v2465_v14 = vrot.slane %v2460_v62, %v4508_v7  ;;  %v2535_v15 = vshrl.u32 %v3578_v63, 16 }
  0xcf   : > { %v2543_v16 = vshrl.u32 %v3579_v1, 16  ;;  %v2551_v17 = vshrl.u32 %v3580_v6, 16  ;;  %v2528_v18 = vpack.i.b16 %v2527_v12, %v2527_v12  ;;  %v3583_v19 = vcombine.low %v2606_v8, %v2606_v8 }
  0xd0   : > { %2390 = vrot.lane.b32.xlu1 %v3570_v10, %s4137_s7  ;;  %v3584_v20 = vcombine.high %v2606_v8, %v2606_v8  ;;  %v3585_v21 = vcombine.low %v2607_v9, %v2607_v9  ;;  %v3576_v22 = vcombine.low %v2458_v5, %v2465_v14  ;;  %v2536_v23 = vpack.i.b16 %v2535_v15, %v2535_v15 }
  0xd1   : > { %v2544_v24 = vpack.i.b16 %v2543_v16, %v2543_v16  ;;  %v2552_v25 = vpack.i.b16 %v2551_v17, %v2551_v17  ;;  %v2533_v26 = vrot.slane %v2528_v18, %v4508_v7  ;;  %v2619_v27 = vpack.i.b16 %v3583_v19, %v3583_v19 }
  0xd2   : > { %v2626_v28 = vpack.i.b16 %v3584_v20, %v3584_v20  ;;  %v3586_v29 = vcombine.high %v2607_v9, %v2607_v9  ;;  %2476 = vrot.lane.b32.xlu0 %v3575_v11, %s4138_s17  ;;  %v2541_v30 = vrot.slane %v2536_v23, %v4508_v7  ;;  %v2633_v33 = vpack.i.b16 %v3585_v21, %v3585_v21 }
  0xd3   : > { %v2549_v31 = vrot.slane %v2544_v24, %v4508_v7  ;;  %v2557_v32 = vrot.slane %v2552_v25, %v4508_v7  ;;  %v2624_v34 = vrot.slane %v2619_v27, %v4455_v3  ;;  %v444_v37 = vcombine.low %v4520_v13, %v4520_v13 }
  0xd4   : > { %2478 = vrot.lane.b32.xlu1 %v3576_v22, %s4138_s17  ;;  %v2631_v35 = vrot.slane %v2626_v28, %v4455_v3  ;;  %v2640_v36 = vpack.i.b16 %v3586_v29, %v3586_v29  ;;  %v3581_v38 = vcombine.low %v2533_v26, %v2541_v30  ;;  %v2638_v40 = vrot.slane %v2633_v33, %v4455_v3 }
  0xd5   : > { %v3582_v39 = vcombine.low %v2549_v31, %v2557_v32  ;;  %v423_v42 = vcombine.high %v4542_v41, %v4542_v41  ;;  %3443 = vst.sshfl [vmem:[#allocation2 + $0x4] sm:$0xf0 pattern:$0x76325410] %v444_v37  ;;  %vm524_vm0 = vcmask 1043456   ;;  %vm522_vm1 = vcmask 449536  }
  0xd6   : > { %v2645_v7 = vrot.slane %v2640_v36, %v4455_v3  ;;  %2568 = vrot.lane.b32.xlu0 %v3581_v38, %s4139_s30  ;;  %v3587_v43 = vcombine.low %v2624_v34, %v2631_v35  ;;  %vm707_vm2 = vcmask 465920   ;;  %vm730_vm3 = vcmask 580608  }
  0xd7   : > { %3442 = vst.sshfl [vmem:[#allocation2 + $0xc] sm:$0xf pattern:$0x76325410] %v423_v42  ;;  %vm617_vm4 = vcmask 457728   ;;  %vm801_vm5 = vcmask 515072  }
  0xd8   : > { %2570 = vrot.lane.b32.xlu1 %v3582_v39, %s4139_s30  ;;  %v3588_v44 = vcombine.low %v2638_v40, %v2645_v7  ;;  %vm824_vm6 = vcmask 531456   ;;  %vm640_vm7 = vcmask 588800   ;;  %vm546_vm8 = vcmask 596992  }
  0xd9   : > { %vm5431_vm9 = vcmask 973824   ;;  %vm5432_vm10 = vcmask 982016   ;;  %vm5433_vm11 = vcmask 990208   ;;  %vm1553_vm12 = vcmask 1039360  }
  0xda   : > { %2656 = vrot.lane.b32.xlu0 %v3587_v43, %s4140_s10  ;;  %vm1576_vm13 = vcmask 7168   ;;  %vm1482_vm14 = vcmask 56320   ;;  %vm1392_vm15 = vcmask 64512  }
  0xdc   : > { %2658 = vrot.lane.b32.xlu1 %v3588_v44, %s4140_s10  ;;  %v4776_v13 = vld [vmem:[#allocation2] sm:$0xff] }
  0xde   : > { %v4778_v45 = vld [vmem:[#allocation2 + $0x8] sm:$0xff]  ;;  %838 = vrot.lane.b32.xlu0 %v4776_v13, %s4149_s12  ;;  %v834_v3 = vld [vmem:[#allocation2 + $0x10] sm:$0xf] }
  0xdf   : > { %v465_v49 = vld [vmem:[#allocation2 + $0x10] sm:$0xf] }
  0xe0   : > { %840 = vrot.lane.b32.xlu1 %v4778_v45, %s4149_s12  ;;  %v650_v57 = vld [vmem:[#allocation2 + $0x10] sm:$0xf] }
  0xe1   : > { %v556_v58 = vld [vmem:[#allocation2 + $0x10] sm:$0xf] }
  0xe2   : > { %842 = vrot.lane.b32.xlu0 %v834_v3, %s4149_s12  ;;  %v740_v16 = vld [vmem:[#allocation2 + $0x10] sm:$0xf] }
  0xe3   : > { %v858_v24 = vld [vmem:[#allocation2 + $0x10] sm:$0xf] }
  0xef   : > { %v704_v41 = vpop.permute.xlu1 %703 }
  0xf0   : > { %v517_v46 = vpop.permute.xlu0 %516  ;;  %v706_v52 = vrot.slane %v704_v41, 4 }
  0xf1   : > { %v520_v50 = vrot.slane %v517_v46, 4 }
  0xf2   : > { %v716_v62 = vmul.bf16 %v706_v52, %v650_v57 }
  0xf3   : > { %v4785_v47 = vpop.permute.xlu1 %611  ;;  %v523_v6 = vsel %vm522_vm1, %v520_v50, %v517_v46 }
  0xf4   : > { %v519_v48 = vpop.permute.xlu0 %518  ;;  %v530_v11 = vmul.bf16 %v4776_v13, %v523_v6  ;;  %v615_v20 = vrot.slane %v4785_v47, 4 }
  0xf5   : > { %v521_v51 = vrot.slane %v519_v48, 4 }
  0xf6   : > { %v618_v29 = vsel %vm617_vm4, %v615_v20, %v4785_v47 }
  0xf7   : > { %v525_v53 = vsel %vm524_vm0, %v520_v50, %v521_v51  ;;  %v532_v4 = vmul.bf16 %v521_v51, %v465_v49  ;;  %v624_v37 = vmul.bf16 %v4776_v13, %v618_v29 }
  0xf8   : > { %v526_v54 = vsel %vm522_vm1, %v525_v53, %v519_v48  ;;  %v614_v55 = vpop.permute.xlu1 %613  ;;  %v702_v56 = vpop.permute.xlu0 %701 }
  0xf9   : > { %v616_v59 = vrot.slane %v614_v55, 4  ;;  %v705_v60 = vrot.slane %v702_v56, 4  ;;  %540 = vrot.lane.b32.xlu0 %v532_v4, %s4140_s10  ;;  %v531_v61 = vmul.bf16 %v4778_v45, %v526_v54 }
  0xfb   : > { %538 = vrot.lane.b32.xlu1 %v531_v61, %s4140_s10  ;;  %v626_v63 = vmul.bf16 %v616_v59, %v556_v58  ;;  %v709_v1 = vsel %vm524_vm0, %v705_v60, %v706_v52  ;;  %v708_v5 = vsel %vm707_vm2, %v705_v60, %v702_v56  ;;  %v619_v36 = vsel %vm524_vm0, %v615_v20, %v616_v59 }
  0xfc   : > { %v796_v8 = vpop.permute.xlu0 %795  ;;  %v710_v10 = vsel %vm707_vm2, %v709_v1, %v704_v41  ;;  %v714_v18 = vmul.bf16 %v4776_v13, %v708_v5  ;;  %v620_v7 = vsel %vm617_vm4, %v619_v36, %v614_v55 }
  0xfd   : > { %v798_v9 = vpop.permute.xlu1 %797  ;;  %724 = vrot.lane.b32.xlu0 %v716_v62, %s4138_s17  ;;  %v715_v14 = vmul.bf16 %v4778_v45, %v710_v10  ;;  %v799_v30 = vrot.slane %v796_v8, 4  ;;  %v625_v47 = vmul.bf16 %v4778_v45, %v620_v7  ;;  %v950_v62 = vld [vmem:[#allocation2 + $0x10] sm:$0xf] }
  0xfe   : > { %v800_v17 = vrot.slane %v798_v9, 4 }
  0xff   : > { %634 = vrot.lane.b32.xlu1 %v626_v63, %s4139_s30  ;;  %v802_v38 = vsel %vm801_vm5, %v799_v30, %v796_v8 }
 0x100   : > { %v914_v12 = vpop.permute.xlu0 %913  ;;  %v810_v22 = vmul.bf16 %v800_v17, %v740_v16  ;;  %v803_v44 = vsel %vm524_vm0, %v799_v30, %v800_v17  ;;  %v808_v41 = vmul.bf16 %v4776_v13, %v802_v38 }
 0x101   : > { %536 = vrot.lane.b32.xlu0 %v530_v11, %s4140_s10  ;;  %v917_v39 = vrot.slane %v914_v12, 4  ;;  %v804_v49 = vsel %vm801_vm5, %v803_v44, %v798_v9 }
 0x102   : > { %v916_v15 = vpop.permute.xlu1 %915  ;;  %v809_v54 = vmul.bf16 %v4778_v45, %v804_v49 }
 0x103   : > { %722 = vrot.lane.b32.xlu1 %v715_v14, %s4138_s17  ;;  %v918_v25 = vrot.slane %v916_v15, 4  ;;  %v919_v46 = vsel %vm824_vm6, %v917_v39, %v914_v12 }
 0x104   : > { %v1002_v19 = vpop.permute.xlu0 %1001  ;;  %v925_v4 = vmul.bf16 %v919_v46, %v4776_v13 }
 0x105   : > { %v1005_v21 = vrot.slane %v1002_v19, 4  ;;  %720 = vrot.lane.b32.xlu0 %v714_v18, %s4138_s17  ;;  %v927_v32 = vmul.bf16 %v918_v25, %v858_v24  ;;  %v920_v51 = vsel %vm524_vm0, %v917_v39, %v918_v25  ;;  %v1218_v39 = vld [vmem:[#allocation2 + $0x10] sm:$0xf] }
 0x106   : > { %v4805_v23 = vpop.permute.xlu1 %1003  ;;  %v921_v56 = vsel %vm824_vm6, %v920_v51, %v916_v15  ;;  %v1038_v15 = vld [vmem:[#allocation2 + $0x10] sm:$0xf] }
 0x107   : > { %v1007_v26 = vsel %vm730_vm3, %v1005_v21, %v1002_v19  ;;  %v1006_v27 = vrot.slane %v4805_v23, 4  ;;  %818 = vrot.lane.b32.xlu1 %v810_v22, %s4137_s7  ;;  %v926_v61 = vmul.bf16 %v921_v56, %v4778_v45 }
 0x108   : > { %v1013_v28 = vmul.bf16 %v1007_v26, %v4776_v13  ;;  %v1094_v33 = vpop.permute.xlu0 %1093 }
 0x109   : > { %v1008_v31 = vsel %vm524_vm0, %v1005_v21, %v1006_v27  ;;  %v1097_v3 = vrot.slane %v1094_v33, 4  ;;  %v1015_v11 = vmul.bf16 %v1006_v27, %v950_v62 }
 0x10a   : > { %v1009_v34 = vsel %vm730_vm3, %v1008_v31, %v4805_v23  ;;  %1019 = vrot.lane.b32.xlu0 %v1013_v28, %s4133_s13  ;;  %v1096_v35 = vpop.permute.xlu1 %1095  ;;  %v1130_v28 = vld [vmem:[#allocation2 + $0x10] sm:$0xf] }
 0x10b   : > { %935 = vrot.lane.b32.xlu1 %v927_v32, %s4136_s5  ;;  %v1014_v40 = vmul.bf16 %v1009_v34, %v4778_v45  ;;  %v1099_v52 = vsel %vm640_vm7, %v1097_v3, %v1094_v33  ;;  %v1098_v53 = vrot.slane %v1096_v35, 4 }
 0x10c   : > { %v1182_v42 = vpop.permute.xlu0 %1181  ;;  %v1105_v57 = vmul.bf16 %v1099_v52, %v4776_v13 }
 0x10d   : > { %v1100_v59 = vsel %vm524_vm0, %v1097_v3, %v1098_v53  ;;  %v1185_v60 = vrot.slane %v1182_v42, 4  ;;  %v1107_v20 = vmul.bf16 %v1098_v53, %v1038_v15  ;;  %v4942_v15 = vld [vmem:[#allocation2 + $0xc] sm:$0xff] }
 0x10e   : > { %630 = vrot.lane.b32.xlu0 %v624_v37, %s4139_s30  ;;  %v4824_v43 = vpop.permute.xlu1 %1183  ;;  %v1101_v1 = vsel %vm640_vm7, %v1100_v59, %v1096_v35  ;;  %v1402_v59 = vld [vmem:[#allocation2 + $0x10] sm:$0xf] }
 0x10f   : > { %1021 = vrot.lane.b32.xlu1 %v1014_v40, %s4133_s13  ;;  %v1187_v8 = vsel %vm546_vm8, %v1185_v60, %v1182_v42  ;;  %v1186_v9 = vrot.slane %v4824_v43, 4  ;;  %v1106_v5 = vmul.bf16 %v1101_v1, %v4778_v45  ;;  %v1492_v1 = vld [vmem:[#allocation2 + $0x10] sm:$0xf] }
 0x110   : > { %v1270_v48 = vpop.permute.xlu0 %1269  ;;  %v1193_v14 = vmul.bf16 %v1187_v8, %v4776_v13 }
 0x111   : > { %v1273_v10 = vrot.slane %v1270_v48, 4  ;;  %v1188_v17 = vsel %vm524_vm0, %v1185_v60, %v1186_v9  ;;  %v1195_v35 = vmul.bf16 %v1186_v9, %v1130_v28  ;;  %v1682_v28 = vld [vmem:[#allocation2 + $0x14] sm:$0xf] }
 0x112   : > { %814 = vrot.lane.b32.xlu0 %v808_v41, %s4137_s7  ;;  %v4833_v50 = vpop.permute.xlu1 %1271  ;;  %v1189_v22 = vsel %vm546_vm8, %v1188_v17, %v4824_v43 }
 0x113   : > { %632 = vrot.lane.b32.xlu1 %v625_v47, %s4139_s30  ;;  %v1276_v18 = vsel %vm5431_vm9, %v1273_v10, %v1270_v48  ;;  %v1274_v19 = vrot.slane %v4833_v50, 4  ;;  %v1194_v27 = vmul.bf16 %v1189_v22, %v4778_v45 }
 0x114   : > { %v1364_v55 = vpop.permute.xlu0 %1363  ;;  %v1282_v23 = vmul.bf16 %v1276_v18, %v4776_v13  ;;  %v4948_v18 = vld [vmem:[#allocation2 + $0x4] sm:$0xff] }
 0x115   : > { %v1277_v25 = vsel %vm524_vm0, %v1273_v10, %v1274_v19  ;;  %v1367_v26 = vrot.slane %v1364_v55, 4  ;;  %v1284_v43 = vmul.bf16 %v1274_v19, %v1218_v39 }
 0x116   : > { %931 = vrot.lane.b32.xlu0 %v925_v4, %s4136_s5  ;;  %v4843_v58 = vpop.permute.xlu1 %1365  ;;  %v1278_v30 = vsel %vm5431_vm9, %v1277_v25, %v4833_v50  ;;  %v1308_v50 = vld [vmem:[#allocation2 + $0x10] sm:$0xf]  ;;  %vm1298_vm9 = vcmask 72704  }
 0x117   : > { %816 = vrot.lane.b32.xlu1 %v809_v54, %s4137_s7  ;;  %v1370_v31 = vsel %vm5432_vm10, %v1367_v26, %v1364_v55  ;;  %v1368_v32 = vrot.slane %v4843_v58, 4  ;;  %v1283_v36 = vmul.bf16 %v1278_v30, %v4778_v45 }
 0x118   : > { %v1454_v63 = vpop.permute.xlu0 %1453  ;;  %v1376_v38 = vmul.bf16 %v1370_v31, %v4776_v13 }
 0x119   : > { %v1457_v33 = vrot.slane %v1454_v63, 4  ;;  %v1371_v40 = vsel %vm524_vm0, %v1367_v26, %v1368_v32  ;;  %v1378_v54 = vmul.bf16 %v1368_v32, %v1308_v50 }
 0x11a   : > { %1111 = vrot.lane.b32.xlu0 %v1105_v57, %s4135_s19  ;;  %v4850_v6 = vpop.permute.xlu1 %1455  ;;  %v1372_v41 = vsel %vm5432_vm10, %v1371_v40, %v4843_v58  ;;  %vm3022_vm10 = vcmask 719872  }
 0x11b   : > { %933 = vrot.lane.b32.xlu1 %v926_v61, %s4136_s5  ;;  %v1460_v42 = vsel %vm5433_vm11, %v1457_v33, %v1454_v63  ;;  %v1458_v7 = vrot.slane %v4850_v6, 4  ;;  %v1377_v49 = vmul.bf16 %v1372_v41, %v4778_v45 }
 0x11c   : > { %v4856_v12 = vpop.permute.xlu0 %1547  ;;  %v1466_v46 = vmul.bf16 %v1460_v42, %v4776_v13 }
 0x11d   : > { %v1461_v47 = vsel %vm524_vm0, %v1457_v33, %v1458_v7  ;;  %v1551_v48 = vrot.slane %v4856_v12, 4  ;;  %v1468_v63 = vmul.bf16 %v1458_v7, %v1402_v59 }
 0x11e   : > { %1023 = vrot.lane.b32.xlu0 %v1015_v11, %s4133_s13  ;;  %v4860_v16 = vpop.permute.xlu1 %1549  ;;  %v1462_v52 = vsel %vm5433_vm11, %v1461_v47, %v4850_v6  ;;  %vm848_vm11 = vcmask 523264  }
 0x11f   : > { %1113 = vrot.lane.b32.xlu1 %v1106_v5, %s4135_s19  ;;  %v1552_v53 = vrot.slane %v4860_v16, 4  ;;  %v1554_v55 = vsel %vm1553_vm12, %v1551_v48, %v4856_v12  ;;  %v1467_v56 = vmul.bf16 %v1462_v52, %v4778_v45 }
 0x120   : > { %v4866_v21 = vpop.permute.xlu0 %1645  ;;  %v1560_v62 = vmul.bf16 %v1554_v55, %v4776_v13 }
 0x121   : > { %v1555_v60 = vsel %vm524_vm0, %v1551_v48, %v1552_v53  ;;  %v1649_v61 = vrot.slane %v4866_v21, 4  ;;  %v1562_v5 = vmul.bf16 %v1552_v53, %v1492_v1 }
 0x122   : > { %1199 = vrot.lane.b32.xlu0 %v1193_v14, %s4134_s18  ;;  %v4872_v24 = vpop.permute.xlu1 %1647  ;;  %v1556_v8 = vsel %vm1553_vm12, %v1555_v60, %v4860_v16 }
 0x123   : > { %1115 = vrot.lane.b32.xlu1 %v1107_v20, %s4135_s19  ;;  %v1650_v58 = vrot.slane %v4872_v24, 4  ;;  %v1561_v14 = vmul.bf16 %v1556_v8, %v4778_v45  ;;  %v1651_v16 = vsel %vm1576_vm13, %v1649_v61, %v4866_v21 }
 0x124   : > { %v4877_v29 = vpop.permute.xlu0 %1733  ;;  %v1657_v22 = vmul.bf16 %v4948_v18, %v1651_v16  ;;  %v1950_v16 = vld [vmem:[#allocation2 + $0x14] sm:$0xf] }
 0x125   : > { %v1652_v9 = vsel %vm524_vm0, %v1649_v61, %v1650_v58  ;;  %v1737_v13 = vrot.slane %v4877_v29, 4 }
 0x126   : > { %1288 = vrot.lane.b32.xlu0 %v1282_v23, %s4148_s16  ;;  %v4885_v34 = vpop.permute.xlu1 %1735  ;;  %v1653_v12 = vsel %vm1576_vm13, %v1652_v9, %v4872_v24 }
 0x127   : > { %1201 = vrot.lane.b32.xlu1 %v1194_v27, %s4134_s18  ;;  %v1738_v10 = vrot.slane %v4885_v34, 4  ;;  %v1658_v20 = vmul.bf16 %v1653_v12, %v4942_v15  ;;  %v1739_v21 = vsel %vm1482_vm14, %v1737_v13, %v4877_v29  ;;  %v1590_v29 = vld [vmem:[#allocation2 + $0x14] sm:$0xf] }
 0x128   : > { %v4888_v37 = vpop.permute.xlu0 %1825  ;;  %v1745_v27 = vmul.bf16 %v4948_v18, %v1739_v21  ;;  %v2038_v12 = vld [vmem:[#allocation2 + $0x14] sm:$0xf] }
 0x129   : > { %v1740_v17 = vsel %vm524_vm0, %v1737_v13, %v1738_v10  ;;  %v1829_v25 = vrot.slane %v4888_v37, 4 }
 0x12a   : > { %1203 = vrot.lane.b32.xlu0 %v1195_v35, %s4134_s18  ;;  %v4896_v44 = vpop.permute.xlu1 %1827  ;;  %v1741_v45 = vsel %vm1482_vm14, %v1740_v17, %v4885_v34  ;;  %v1747_v35 = vmul.bf16 %v1738_v10, %v1682_v28 }
 0x12b   : > { %1290 = vrot.lane.b32.xlu1 %v1283_v36, %s4148_s16  ;;  %v1830_v24 = vrot.slane %v4896_v44, 4  ;;  %v1746_v26 = vmul.bf16 %v1741_v45, %v4942_v15  ;;  %v1831_v39 = vsel %vm1392_vm15, %v1829_v25, %v4888_v37 }
 0x12c   : > { %v4898_v3 = vpop.permute.xlu0 %1913 }
 0x12d   : > { %v1832_v31 = vsel %vm524_vm0, %v1829_v25, %v1830_v24  ;;  %v1917_v34 = vrot.slane %v4898_v3, 4 }
 0x12e   : > { %1382 = vrot.lane.b32.xlu0 %v1376_v38, %s5463_s27  ;;  %v4915_v4 = vpop.permute.xlu1 %1915  ;;  %v1833_v36 = vsel %vm1392_vm15, %v1832_v31, %v4896_v44  ;;  %v1659_v38 = vmul.bf16 %v1650_v58, %v1590_v29  ;;  %v1837_v44 = vmul.bf16 %v4948_v18, %v1831_v39 }
 0x12f   : > { %1292 = vrot.lane.b32.xlu1 %v1284_v43, %s4148_s16  ;;  %s5465_s16 = smov 1   ;;  %v1918_v32 = vrot.slane %v4915_v4, 4  ;;  %v1838_v7 = vmul.bf16 %v1833_v36, %v4942_v15  ;;  %v1919_v37 = vsel %vm1298_vm9, %v1917_v34, %v4898_v3  ;;  %v1770_v3 = vld [vmem:[#allocation2 + $0x14] sm:$0xf] }
 0x130   : > { %v4908_v51 = vpop.permute.xlu0 %2001  ;;  %v1925_v52 = vmul.bf16 %v4948_v18, %v1919_v37  ;;  %v1839_v59 = vmul.bf16 %v1830_v24, %v1770_v3  ;;  %v2130_v36 = vld [vmem:[#allocation2 + $0x14] sm:$0xf] }
 0x131   : > { %v1920_v40 = vsel %vm524_vm0, %v1917_v34, %v1918_v32  ;;  %v2005_v47 = vrot.slane %v4908_v51, 4  ;;  %v2218_v34 = vld [vmem:[#allocation2 + $0x14] sm:$0xf] }
 0x132   : > { %1472 = vrot.lane.b32.xlu0 %v1466_v46, %s5464_s21  ;;  %v4928_v6 = vpop.permute.xlu1 %2003  ;;  %v1921_v43 = vsel %vm1298_vm9, %v1920_v40, %v4915_v4 }
 0x133   : > { %1384 = vrot.lane.b32.xlu1 %v1377_v49, %s5463_s27  ;;  %v2006_v46 = vrot.slane %v4928_v6, 4  ;;  %v1926_v48 = vmul.bf16 %v1921_v43, %v4942_v15  ;;  %v1862_v49 = vld [vmem:[#allocation2 + $0x14] sm:$0xf]  ;;  %v2007_v60 = vsel %vm522_vm1, %v2005_v47, %v4908_v51 }
 0x134   : > { %v4920_v57 = vpop.permute.xlu0 %2093  ;;  %v1927_v55 = vmul.bf16 %v1918_v32, %v1862_v49  ;;  %v2013_v1 = vmul.bf16 %v2007_v60, %v4948_v18  ;;  %v2310_v60 = vld [vmem:[#allocation2 + $0x14] sm:$0xf] }
 0x135   : > { %v2008_v53 = vsel %vm524_vm0, %v2005_v47, %v2006_v46 }
 0x136   : > { %1386 = vrot.lane.b32.xlu0 %v1378_v54, %s5463_s27  ;;  %v4951_v19 = vpop.permute.xlu1 %2095  ;;  %s5467_s27 = smov 121   ;;  %v2009_v58 = vsel %vm522_vm1, %v2008_v53, %v4928_v6 }
 0x137   : > { %1474 = vrot.lane.b32.xlu1 %v1467_v56, %s5464_s21  ;;  %v2098_v4 = vrot.slane %v4951_v19, 4  ;;  %v2097_v56 = vrot.slane %v4920_v57, 4 }
 0x138   : > { %v4936_v11 = vpop.permute.xlu0 %2181 }
 0x139   : > { %v2100_v61 = vsel %vm524_vm0, %v2097_v56, %v2098_v4  ;;  %v2099_v51 = vsel %vm617_vm4, %v2097_v56, %v4920_v57  ;;  %v2185_v13 = vrot.slane %v4936_v11, 4 }
 0x13a   : > { %1566 = vrot.lane.b32.xlu0 %v1560_v62, %s5465_s16  ;;  %v4967_v30 = vpop.permute.xlu1 %2183  ;;  %v2101_v8 = vsel %vm617_vm4, %v2100_v61, %v4951_v19 }
 0x13b   : > { %1476 = vrot.lane.b32.xlu1 %v1468_v63, %s5464_s21  ;;  %s5468_s21 = smov 120   ;;  %v2014_v63 = vmul.bf16 %v2009_v58, %v4942_v15  ;;  %v2186_v9 = vrot.slane %v4967_v30, 4  ;;  %v2106_v10 = vmul.bf16 %v2101_v8, %v4942_v15  ;;  %v2187_v24 = vsel %vm707_vm2, %v2185_v13, %v4936_v11 }
 0x13c   : > { %v4957_v23 = vpop.permute.xlu0 %2273  ;;  %v2193_v28 = vmul.bf16 %v2187_v24, %v4948_v18  ;;  %v2605_v24 = vld [vmem:[#allocation2 + $0x14] sm:$0xf] }
 0x13d   : > { %v2188_v17 = vsel %vm524_vm0, %v2185_v13, %v2186_v9  ;;  %v2277_v45 = vrot.slane %v4957_v23, 4 }
 0x13e   : > { %1570 = vrot.lane.b32.xlu0 %v1562_v5, %s5465_s16  ;;  %v4983_v42 = vpop.permute.xlu1 %2275  ;;  %v2105_v5 = vmul.bf16 %v2099_v51, %v4948_v18  ;;  %v2189_v21 = vsel %vm707_vm2, %v2188_v17, %v4967_v30  ;;  %v2425_v17 = vld [vmem:[#allocation2 + $0x14] sm:$0xf] }
 0x13f   : > { %1568 = vrot.lane.b32.xlu1 %v1561_v14, %s5465_s16  ;;  %s5469_s16 = smov 119   ;;  %v2278_v57 = vrot.slane %v4983_v42, 4  ;;  %v2279_v11 = vsel %vm801_vm5, %v2277_v45, %v4957_v23 }
 0x140   : > { %v4973_v33 = vpop.permute.xlu0 %2388  ;;  %v2285_v29 = vmul.bf16 %v2279_v11, %v4948_v18 }
 0x141   : > { %v2280_v25 = vsel %vm524_vm0, %v2277_v45, %v2278_v57  ;;  %v2287_v23 = vmul.bf16 %v2278_v57, %v2218_v34  ;;  %v2392_v40 = vrot.slane %v4973_v33, 4  ;;  %v2513_v57 = vld [vmem:[#allocation2 + $0x14] sm:$0xf] }
 0x142   : > { %1665 = vrot.lane.b32.xlu0 %v1658_v20, %s5466_s1  ;;  %v4998_v50 = vpop.permute.xlu1 %2390  ;;  %v2107_v20 = vmul.bf16 %v2098_v4, %v2038_v12  ;;  %v2281_v31 = vsel %vm801_vm5, %v2280_v25, %v4983_v42  ;;  %v2195_v42 = vmul.bf16 %v2186_v9, %v2130_v36  ;;  %v2333_v4 = vld [vmem:[#allocation2 + $0x14] sm:$0xf] }
 0x143   : > { %1663 = vrot.lane.b32.xlu1 %v1657_v22, %s5466_s1  ;;  %v2015_v22 = vmul.bf16 %v2006_v46, %v1950_v16  ;;  %v2286_v30 = vmul.bf16 %v2281_v31, %v4942_v15  ;;  %v2394_v47 = vsel %vm824_vm6, %v2392_v40, %v4973_v33 }
 0x144   : > { %v4989_v41 = vpop.permute.xlu0 %2476 }
 0x145   : > { %v2480_v53 = vrot.slane %v4989_v41, 4 }
 0x146   : > { %1753 = vrot.lane.b32.xlu0 %v1746_v26, %s5467_s27  ;;  %v5014_v62 = vpop.permute.xlu1 %2478 }
 0x147   : > { %1751 = vrot.lane.b32.xlu1 %v1745_v27, %s5467_s27  ;;  %v2194_v27 = vmul.bf16 %v2189_v21, %v4942_v15 }
 0x148   : > { %v5005_v54 = vpop.permute.xlu0 %2568 }
 0x14a   : > { %1755 = vrot.lane.b32.xlu0 %v1747_v35, %s5467_s27  ;;  %v5031_v14 = vpop.permute.xlu1 %2570 }
 0x14b   : > { %1667 = vrot.lane.b32.xlu1 %v1659_v38, %s5466_s1  ;;  %v2393_v38 = vrot.slane %v4998_v50, 4  ;;  %s5479_s1 = sld [smem:[#allocation20_spill]] }
 0x14c   : > { %v5021_v6 = vpop.permute.xlu0 %2656 }
 0x14d   : > { %v2395_v43 = vsel %vm524_vm0, %v2392_v40, %v2393_v38  ;;  %v2402_v58 = vmul.bf16 %v2393_v38, %v2333_v4 }
 0x14e   : > { %1845 = vrot.lane.b32.xlu0 %v1838_v7, %s5468_s21  ;;  %v5046_v26 = vpop.permute.xlu1 %2658  ;;  %v2396_v37 = vsel %vm824_vm6, %v2395_v43, %v4998_v50  ;;  %v2400_v50 = vmul.bf16 %v2394_v47, %v4948_v18 }
 0x14f   : > { %1843 = vrot.lane.b32.xlu1 %v1837_v44, %s5468_s21  ;;  %v2661_v51 = vrot.slane %v5046_v26, 4 }
 0x150   : > { %v5037_v19 = vpop.permute.xlu0 %838 }
 0x151   : > { %v844_v25 = vrot.slane %v5037_v19, 4  ;;  %v5142_v36 = vmul.bf16 %v2661_v51, %v2605_v24 }
 0x152   : > { %1933 = vrot.lane.b32.xlu0 %v1926_v48, %s5469_s16  ;;  %v5061_v35 = vpop.permute.xlu1 %840  ;;  %v2481_v48 = vrot.slane %v5014_v62, 4 }
 0x153   : > { %1931 = vrot.lane.b32.xlu1 %v1925_v52, %s5469_s16  ;;  %v2401_v52 = vmul.bf16 %v2396_v37, %v4942_v15 }
 0x154   : > { %v5053_v32 = vpop.permute.xlu0 %842  ;;  %v2483_v33 = vsel %vm524_vm0, %v2480_v53, %v2481_v48 }
 0x155   : > { %v2484_v61 = vsel %vm730_vm3, %v2483_v33, %v5014_v62  ;;  %v846_v4 = vrot.slane %v5053_v32, 4 }
 0x156   : > { %1935 = vrot.lane.b32.xlu0 %v1927_v55, %s5469_s16  ;;  %v2573_v55 = vrot.slane %v5031_v14, 4  ;;  %v2489_v9 = vmul.bf16 %v2484_v61, %v4942_v15 }
 0x157   : > { %1847 = vrot.lane.b32.xlu1 %v1839_v59, %s5468_s21  ;;  %v2572_v59 = vrot.slane %v5005_v54, 4 }
 0x159   : > { %v2575_v8 = vsel %vm524_vm0, %v2572_v59, %v2573_v55  ;;  %v2574_v12 = vsel %vm640_vm7, %v2572_v59, %v5005_v54 }
 0x15a   : > { %2021 = vrot.lane.b32.xlu0 %v2014_v63, %s4140_s10  ;;  %v2580_v54 = vmul.bf16 %v2574_v12, %v4948_v18 }
 0x15b   : > { %2019 = vrot.lane.b32.xlu1 %v2013_v1, %s4140_s10  ;;  %v2482_v1 = vsel %vm730_vm3, %v2480_v53, %v4989_v41 }
 0x15c   : > { %v2488_v62 = vmul.bf16 %v2482_v1, %v4948_v18 }
 0x15e   : > { %2113 = vrot.lane.b32.xlu0 %v2106_v10, %s4139_s30  ;;  %v2660_v10 = vrot.slane %v5021_v6, 4 }
 0x15f   : > { %2111 = vrot.lane.b32.xlu1 %v2105_v5, %s4139_s30  ;;  %v2576_v5 = vsel %vm640_vm7, %v2575_v8, %v5031_v14 }
 0x160   : > { %v2663_v16 = vsel %vm524_vm0, %v2660_v10, %v2661_v51  ;;  %v2662_v45 = vsel %vm546_vm8, %v2660_v10, %v5021_v6  ;;  %v2490_v6 = vmul.bf16 %v2481_v48, %v2425_v17 }
 0x161   : > { %v2664_v31 = vsel %vm546_vm8, %v2663_v16, %v5046_v26 }
 0x162   : > { %2115 = vrot.lane.b32.xlu0 %v2107_v20, %s4139_s30  ;;  %v2581_v20 = vmul.bf16 %v2576_v5, %v4942_v15  ;;  %v2669_v40 = vmul.bf16 %v2664_v31, %v4942_v15 }
 0x163   : > { %2023 = vrot.lane.b32.xlu1 %v2015_v22, %s4140_s10 }
 0x166   : > { %2201 = vrot.lane.b32.xlu0 %v2194_v27, %s4138_s17  ;;  %v845_v27 = vrot.slane %v5061_v35, 4 }
 0x167   : > { %2199 = vrot.lane.b32.xlu1 %v2193_v28, %s4138_s17 }
 0x16a   : > { %2293 = vrot.lane.b32.xlu0 %v2286_v30, %s4137_s7  ;;  %v2582_v30 = vmul.bf16 %v2573_v55, %v2513_v57 }
 0x16b   : > { %2291 = vrot.lane.b32.xlu1 %v2285_v29, %s4137_s7  ;;  %v5066_v39 = vpop.permute.xlu0 %540  ;;  %v2668_v29 = vmul.bf16 %v2662_v45, %v4948_v18 }
 0x16c   : > { %v544_v11 = vrot.slane %v5066_v39, 4 }
 0x16d   : > { %v5069_v7 = vpop.permute.xlu1 %538 }
 0x16e   : > { %2295 = vrot.lane.b32.xlu0 %v2287_v23, %s4137_s7  ;;  %v543_v14 = vrot.slane %v5069_v7, 4 }
 0x16f   : > { %2203 = vrot.lane.b32.xlu1 %v2195_v42, %s4138_s17  ;;  %v5074_v44 = vpop.permute.xlu0 %724  ;;  %v847_v42 = vsel %vm524_vm0, %v844_v25, %v845_v27  ;;  %s5478_s17 = sld [smem:[#allocation19_spill]] }
 0x170   : > { %v548_v39 = vsel %vm524_vm0, %v543_v14, %v544_v11  ;;  %v728_v43 = vrot.slane %v5074_v44, 4 }
 0x171   : > { %v5078_v46 = vpop.permute.xlu1 %634  ;;  %v549_v55 = vsel %vm546_vm8, %v5069_v7, %v548_v39 }
 0x172   : > { %2316 = vrot.lane.b32.xlu0 %v4942_v15, %s4149_s12  ;;  %v638_v48 = vrot.slane %v5078_v46, 4 }
 0x173   : > { %2314 = vrot.lane.b32.xlu1 %v4948_v18, %s4149_s12  ;;  %v5087_v49 = vpop.permute.xlu0 %536 }
 0x174   : > { %v542_v22 = vrot.slane %v5087_v49, 4 }
 0x175   : > { %v5092_v3 = vpop.permute.xlu1 %722 }
 0x176   : > { %2408 = vrot.lane.b32.xlu0 %v2401_v52, %s4136_s5  ;;  %v727_v34 = vrot.slane %v5092_v3, 4  ;;  %v545_v26 = vsel %vm524_vm0, %v542_v22, %v543_v14 }
 0x177   : > { %2406 = vrot.lane.b32.xlu1 %v2400_v50, %s4136_s5  ;;  %v5098_v56 = vpop.permute.xlu0 %720  ;;  %v547_v44 = vsel %vm546_vm8, %v5087_v49, %v545_v26 }
 0x178   : > { %v726_v38 = vrot.slane %v5098_v56, 4  ;;  %v732_v33 = vsel %vm524_vm0, %v727_v34, %v728_v43 }
 0x179   : > { %v5103_v63 = vpop.permute.xlu1 %818  ;;  %v733_v5 = vsel %vm730_vm3, %v5092_v3, %v732_v33 }
 0x17a   : > { %2410 = vrot.lane.b32.xlu0 %v2402_v58, %s4136_s5  ;;  %s5470_s5 = scalar_lea.vmem [#allocation7], %s4444_s23  ;;  %v729_v46 = vsel %vm524_vm0, %v726_v38, %v727_v34  ;;  %v822_v32 = vrot.slane %v5103_v63, 4  ;;  %s5477_s23 = sld [smem:[#allocation13_spill]] }
 0x17b   : > { %2318 = vrot.lane.b32.xlu1 %v2310_v60, %s4149_s12  ;;  %v5152_v47 = vld [vmem:[%s5470_s5] sm:$0xff]  ;;  %v731_v63 = vsel %vm730_vm3, %v5098_v56, %v729_v46  ;;  %s5480_s5 = sld [smem:[#allocation21_spill]] }
 0x17c   : > { %v5113_v13 = vpop.permute.xlu0 %1019  ;;  %v3590_v50 = vcombine.high %v5152_v47, %v5152_v47 }
 0x17d   : > { %v5118_v41 = vpop.permute.xlu1 %935  ;;  %v1025_v16 = vrot.slane %v5113_v13, 4 }
 0x17e   : > { %2496 = vrot.lane.b32.xlu0 %v2489_v9, %s4133_s13  ;;  %3648 = vmatprep.mubr.msk.bf16.mxu0 %vm3022_vm10, %v3590_v50  ;;  %v939_v14 = vrot.slane %v5118_v41, 4  ;;  %v849_v41 = vsel %vm848_vm11, %v5037_v19, %v847_v42 }
 0x17f   : > { %2494 = vrot.lane.b32.xlu1 %v2488_v62, %s4133_s13  ;;  %3650 = vmatprep.mubr.msk.bf16.mxu1 %vm3022_vm10, %v3590_v50  ;;  %v850_v62 = vsel %vm524_vm0, %v845_v27, %v846_v4 }
 0x180   : > { %v631_v21 = vpop.permute.xlu0 %630  ;;  %v851_v31 = vsel %vm848_vm11, %v5061_v35, %v850_v62  ;;  %p406_p2 = scmp.lt.s32.totalorder %s5477_s23, 1 }
 0x181   : > { %v5133_v28 = vpop.permute.xlu1 %1021  ;;  %v636_v52 = vrot.slane %v631_v21, 4 }
 0x182   : > { %2588 = vrot.lane.b32.xlu0 %v2581_v20, %s4135_s19  ;;  %v1026_v17 = vrot.slane %v5133_v28, 4 }
 0x183   : > { %2586 = vrot.lane.b32.xlu1 %v2580_v54, %s4135_s19 }
 0x184   : > { %v815_v23 = vpop.permute.xlu0 %814 }
 0x185   : > { %v633_v37 = vpop.permute.xlu1 %632  ;;  %v820_v61 = vrot.slane %v815_v23, 4 }
 0x186   : > { %v637_v53 = vrot.slane %v633_v37, 4  ;;  %2590 = vrot.lane.b32.xlu0 %v2582_v30, %s4135_s19  ;;  %s398_s19 = sand.u32 1, %s4080_s25  }
 0x187   : > { %2498 = vrot.lane.b32.xlu1 %v2490_v6, %s4133_s13  ;;  %v1028_v6 = vsel %vm524_vm0, %v1025_v16, %v1026_v17  ;;  %s407_s13 = scalar_select %p406_p2, %s5477_s23, 1 }
 0x188   : > { %v932_v58 = vpop.permute.xlu0 %931  ;;  %v639_v59 = vsel %vm524_vm0, %v636_v52, %v637_v53  ;;  %v642_v60 = vsel %vm524_vm0, %v637_v53, %v638_v48  ;;  %v1029_v53 = vsel %vm707_vm2, %v5113_v13, %v1028_v6  ;;  %s3435_s7 = sshll.u32 %s398_s19, 4 }
 0x189   : > { %v817_v1 = vpop.permute.xlu1 %816  ;;  %v641_v49 = vsel %vm640_vm7, %v631_v21, %v639_v59  ;;  %v643_v7 = vsel %vm640_vm7, %v633_v37, %v642_v60  ;;  %v937_v3 = vrot.slane %v932_v58, 4 }
 0x18a   : > { %v821_v8 = vrot.slane %v817_v1, 4  ;;  %2676 = vrot.lane.b32.xlu0 %v2669_v40, %s4134_s18  ;;  %v3592_v51 = vcombine.high %v547_v44, %v641_v49  ;;  %v3594_v9 = vcombine.high %v549_v55, %v643_v7  ;;  %v3591_v10 = vcombine.low %v547_v44, %v641_v49 }
 0x18b   : > { %2674 = vrot.lane.b32.xlu1 %v2668_v29, %s4134_s18  ;;  %v3593_v12 = vcombine.low %v549_v55, %v643_v7 }
 0x18c   : > { %v823_v57 = vsel %vm524_vm0, %v820_v61, %v821_v8  ;;  %v826_v20 = vsel %vm524_vm0, %v821_v8, %v822_v32  ;;  %3039 = vmatprep.subr.bf16.mxu0 %v3592_v51  ;;  %3080 = vmatprep.subr.bf16.mxu1 %v3594_v9  ;;  %v1112_v45 = vpop.permute.xlu0 %1111 }
 0x18d   : > { %v827_v22 = vsel %vm824_vm6, %v817_v1, %v826_v20  ;;  %v934_v56 = vpop.permute.xlu1 %933  ;;  %3040 = vmatpush1.bf16.msra.mxu0 %v3591_v10  ;;  %3081 = vmatpush1.bf16.msra.mxu1 %v3593_v12  ;;  %v825_v21 = vsel %vm824_vm6, %v815_v23, %v823_v57  ;;  %v1117_v38 = vrot.slane %v1112_v45, 4 }
 0x18e   : > { %v3597_v54 = vcombine.low %v733_v5, %v827_v22  ;;  %v3598_v24 = vcombine.high %v733_v5, %v827_v22  ;;  %v938_v25 = vrot.slane %v934_v56, 4  ;;  %v3596_v27 = vcombine.high %v731_v63, %v825_v21 }
 0x18f   : > { %2678 = vrot.lane.b32.xlu1 %v5142_v36, %s4134_s18  ;;  %v3595_v11 = vcombine.low %v731_v63, %v825_v21  ;;  %s5291_s18 = sshll.u32 %s407_s13, 3 }
 0x190   : > { %v940_v30 = vsel %vm524_vm0, %v937_v3, %v938_v25  ;;  %v942_v29 = vsel %vm524_vm0, %v938_v25, %v939_v14  ;;  %3041 = vmatprep.subr.bf16.mxu0 %v3596_v27  ;;  %3082 = vmatprep.subr.bf16.mxu1 %v3598_v24  ;;  %v1024_v34 = vpop.permute.xlu0 %1023  ;;  %s409_s30 = scalar_lea.vmem %s5478_s17, %s5291_s18  ;;  %s413_s27 = scalar_lea.vmem %s5479_s1, %s5291_s18 }
 0x191   : > { %v943_v23 = vsel %vm801_vm5, %v934_v56, %v942_v29  ;;  %v1027_v35 = vrot.slane %v1024_v34, 4  ;;  %v1114_v26 = vpop.permute.xlu1 %1113  ;;  %3042 = vmatpush1.bf16.msra.mxu0 %v3595_v11  ;;  %3083 = vmatpush1.bf16.msra.mxu1 %v3597_v54  ;;  %v941_v36 = vsel %vm801_vm5, %v932_v58, %v940_v30  ;;  %s417_s13 = scalar_lea.vmem %s5480_s5, %s5291_s18  ;;  %s3655_s17 = sshll.u32 %s5477_s23, 2 }
 0x192   : > { %v3601_v39 = vcombine.low %v851_v31, %v943_v23  ;;  %v3602_v19 = vcombine.high %v851_v31, %v943_v23  ;;  %v1118_v40 = vrot.slane %v1114_v26, 4  ;;  %v3600_v42 = vcombine.high %v849_v41, %v941_v36  ;;  %s400_s18 = scalar_lea.vmem [#allocation9], %s3435_s7  ;;  %s3251_s5 = scalar_lea.sflag [#allocation6], %s398_s19 }
 0x193   : > { %v3599_v43 = vcombine.low %v849_v41, %v941_v36  ;;  %v1030_v4 = vsel %vm524_vm0, %v1026_v17, %v1027_v35  ;;  %s3267_s1 = sshll.u32 %s400_s18, 4  ;;  %s4151_s7 = smov [#allocation9]   ;;  %s5322_s1 = int_to_ptr.vmem [resolvable:$true] %s3267_s1 }
 0x194   : > { %v1120_v37 = vsel %vm524_vm0, %v1117_v38, %v1118_v40  ;;  %3043 = vmatprep.subr.bf16.mxu0 %v3600_v42  ;;  %3084 = vmatprep.subr.bf16.mxu1 %v3602_v19  ;;  %v1200_v48 = vpop.permute.xlu0 %1199  ;;  %v1031_v60 = vsel %vm707_vm2, %v5133_v28, %v1030_v4 }
 0x195   : > { %v1116_v52 = vpop.permute.xlu1 %1115  ;;  %3044 = vmatpush1.bf16.msra.mxu0 %v3599_v43  ;;  %3085 = vmatpush1.bf16.msra.mxu1 %v3601_v39  ;;  %v1121_v50 = vsel %vm617_vm4, %v1112_v45, %v1120_v37  ;;  %v1205_v49 = vrot.slane %v1200_v48, 4 }
 0x196   : > { %v1119_v33 = vrot.slane %v1116_v52, 4  ;;  %v3604_v44 = vcombine.high %v1029_v53, %v1121_v50  ;;  %v3603_v55 = vcombine.low %v1029_v53, %v1121_v50 }
 0x198   : > { %v1122_v46 = vsel %vm524_vm0, %v1118_v40, %v1119_v33  ;;  %3045 = vmatprep.subr.bf16.mxu0 %v3604_v44  ;;  %v1289_v58 = vpop.permute.xlu0 %1288 }
 0x199   : > { %v1202_v59 = vpop.permute.xlu1 %1201  ;;  %3046 = vmatpush1.bf16.msra.mxu0 %v3603_v55  ;;  %v1123_v32 = vsel %vm617_vm4, %v1114_v26, %v1122_v46  ;;  %v1294_v51 = vrot.slane %v1289_v58, 4 }
 0x19a   : > { %v1206_v61 = vrot.slane %v1202_v59, 4  ;;  %v3606_v13 = vcombine.high %v1031_v60, %v1123_v32  ;;  %v3605_v1 = vcombine.low %v1031_v60, %v1123_v32 }
 0x19c   : > { %3086 = vmatprep.subr.bf16.mxu1 %v3606_v13  ;;  %v1204_v7 = vpop.permute.xlu0 %1203  ;;  %v1208_v9 = vsel %vm524_vm0, %v1205_v49, %v1206_v61 }
 0x19d   : > { %v1291_v8 = vpop.permute.xlu1 %1290  ;;  %3087 = vmatpush1.bf16.msra.mxu1 %v3605_v1  ;;  %v1207_v10 = vrot.slane %v1204_v7, 4  ;;  %v1209_v28 = vsel %vm522_vm1, %v1200_v48, %v1208_v9 }
 0x19e   : > { %v1295_v62 = vrot.slane %v1291_v8, 4 }
 0x19f   : > { %v1210_v17 = vsel %vm524_vm0, %v1206_v61, %v1207_v10 }
 0x1a0   : > { %v1297_v5 = vsel %vm524_vm0, %v1294_v51, %v1295_v62  ;;  %v1383_v63 = vpop.permute.xlu0 %1382  ;;  %v1211_v56 = vsel %vm522_vm1, %v1202_v59, %v1210_v17 }
 0x1a1   : > { %v1293_v12 = vpop.permute.xlu1 %1292  ;;  %v1299_v16 = vsel %vm1298_vm9, %v1289_v58, %v1297_v5  ;;  %v1388_v27 = vrot.slane %v1383_v63, 4 }
 0x1a2   : > { %v1296_v57 = vrot.slane %v1293_v12, 4  ;;  %v3608_v20 = vcombine.high %v1209_v28, %v1299_v16  ;;  %v3607_v45 = vcombine.low %v1209_v28, %v1299_v16 }
 0x1a4   : > { %v1300_v14 = vsel %vm524_vm0, %v1295_v62, %v1296_v57  ;;  %3047 = vmatprep.subr.bf16.mxu0 %v3608_v20  ;;  %v1473_v3 = vpop.permute.xlu0 %1472 }
 0x1a5   : > { %v1385_v22 = vpop.permute.xlu1 %1384  ;;  %3048 = vmatpush1.bf16.msra.mxu0 %v3607_v45  ;;  %v1301_v21 = vsel %vm1298_vm9, %v1291_v8, %v1300_v14  ;;  %v1478_v41 = vrot.slane %v1473_v3, 4  ;;  %vm5471_vm9 = vcmask 990208  }
 0x1a6   : > { %v1389_v54 = vrot.slane %v1385_v22, 4  ;;  %v3610_v24 = vcombine.high %v1211_v56, %v1301_v21  ;;  %v3609_v25 = vcombine.low %v1211_v56, %v1301_v21  ;;  %vm5472_vm10 = vmmov %vm5471_vm9 }
 0x1a8   : > { %3088 = vmatprep.subr.bf16.mxu1 %v3610_v24  ;;  %v1387_v31 = vpop.permute.xlu0 %1386  ;;  %v1391_v6 = vsel %vm524_vm0, %v1388_v27, %v1389_v54 }
 0x1a9   : > { %v1475_v11 = vpop.permute.xlu1 %1474  ;;  %3089 = vmatpush1.bf16.msra.mxu1 %v3609_v25  ;;  %v1390_v30 = vrot.slane %v1387_v31, 4  ;;  %v1393_v35 = vsel %vm1392_vm15, %v1383_v63, %v1391_v6 }
 0x1aa   : > { %v1479_v29 = vrot.slane %v1475_v11, 4 }
 0x1ab   : > { %v1394_v36 = vsel %vm524_vm0, %v1389_v54, %v1390_v30 }
 0x1ac   : > { %v1481_v34 = vsel %vm524_vm0, %v1478_v41, %v1479_v29  ;;  %v1567_v38 = vpop.permute.xlu0 %1566  ;;  %v1395_v52 = vsel %vm1392_vm15, %v1385_v22, %v1394_v36 }
 0x1ad   : > { %v1477_v23 = vpop.permute.xlu1 %1476  ;;  %v1483_v26 = vsel %vm1482_vm14, %v1473_v3, %v1481_v34  ;;  %v1572_v50 = vrot.slane %v1567_v38, 4 }
 0x1ae   : > { %v1480_v39 = vrot.slane %v1477_v23, 4  ;;  %v3612_v19 = vcombine.high %v1393_v35, %v1483_v26  ;;  %v3611_v40 = vcombine.low %v1393_v35, %v1483_v26 }
 0x1b0   : > { %v1484_v42 = vsel %vm524_vm0, %v1479_v29, %v1480_v39  ;;  %3049 = vmatprep.subr.bf16.mxu0 %v3612_v19  ;;  %v1571_v43 = vpop.permute.xlu0 %1570 }
 0x1b1   : > { %v1574_v37 = vrot.slane %v1571_v43, 4  ;;  %v1569_v48 = vpop.permute.xlu1 %1568  ;;  %3050 = vmatpush1.bf16.msra.mxu0 %v3611_v40  ;;  %v1485_v53 = vsel %vm1482_vm14, %v1475_v11, %v1484_v42  ;;  %vm5474_vm14 = vcmask 973824  }
 0x1b2   : > { %v1573_v4 = vrot.slane %v1569_v48, 4  ;;  %v3614_v33 = vcombine.high %v1395_v52, %v1485_v53  ;;  %v3613_v44 = vcombine.low %v1395_v52, %v1485_v53 }
 0x1b4   : > { %v1575_v55 = vsel %vm524_vm0, %v1572_v50, %v1573_v4  ;;  %v1578_v46 = vsel %vm524_vm0, %v1573_v4, %v1574_v37  ;;  %3090 = vmatprep.subr.bf16.mxu1 %v3614_v33  ;;  %v1666_v58 = vpop.permute.xlu0 %1665 }
 0x1b5   : > { %v1579_v59 = vsel %vm1576_vm13, %v1569_v48, %v1578_v46  ;;  %v1670_v60 = vrot.slane %v1666_v58, 4  ;;  %v1664_v32 = vpop.permute.xlu1 %1663  ;;  %3091 = vmatpush1.bf16.msra.mxu1 %v3613_v44  ;;  %v1577_v61 = vsel %vm1576_vm13, %v1567_v38, %v1575_v55  ;;  %vm5473_vm13 = vcmask 982016  }
 0x1b6   : > { %v3617_v13 = vcombine.low %v1579_v59, %v4942_v15  ;;  %v3618_v1 = vcombine.high %v1579_v59, %v4942_v15  ;;  %v1669_v49 = vrot.slane %v1664_v32, 4  ;;  %v3616_v7 = vcombine.high %v1577_v61, %v4948_v18  ;;  %vm5476_vm15 = vmmov %vm5473_vm13 }
 0x1b7   : > { %v3615_v8 = vcombine.low %v1577_v61, %v4948_v18 }
 0x1b8   : > { %3051 = vmatprep.subr.bf16.mxu0 %v3616_v7  ;;  %3092 = vmatprep.subr.bf16.mxu1 %v3618_v1  ;;  %v1754_v51 = vpop.permute.xlu0 %1753  ;;  %v1672_v62 = vsel %vm524_vm0, %v1669_v49, %v1670_v60 }
 0x1b9   : > { %v1758_v9 = vrot.slane %v1754_v51, 4  ;;  %v1752_v10 = vpop.permute.xlu1 %1751  ;;  %3052 = vmatpush1.bf16.msra.mxu0 %v3615_v8  ;;  %3093 = vmatpush1.bf16.msra.mxu1 %v3617_v13  ;;  %v1673_v15 = vsel %vm1553_vm12, %v1664_v32, %v1672_v62 }
 0x1ba   : > { %v1757_v5 = vrot.slane %v1752_v10, 4 }
 0x1bc   : > { %v1760_v63 = vsel %vm524_vm0, %v1757_v5, %v1758_v9  ;;  %v1756_v12 = vpop.permute.xlu0 %1755 }
 0x1bd   : > { %v1761_v28 = vsel %vm5471_vm9, %v1752_v10, %v1760_v63  ;;  %v1759_v16 = vrot.slane %v1756_v12, 4  ;;  %v1668_v17 = vpop.permute.xlu1 %1667 }
 0x1be   : > { %v3619_v18 = vcombine.low %v1673_v15, %v1761_v28  ;;  %v3620_v57 = vcombine.high %v1673_v15, %v1761_v28  ;;  %v1671_v20 = vrot.slane %v1668_v17, 4 }
 0x1bf   : > { %v1762_v45 = vsel %vm524_vm0, %v1758_v9, %v1759_v16 }
 0x1c0   : > { %v1674_v14 = vsel %vm524_vm0, %v1670_v60, %v1671_v20  ;;  %3053 = vmatprep.subr.bf16.mxu0 %v3620_v57  ;;  %v1846_v3 = vpop.permute.xlu0 %1845  ;;  %v1763_v22 = vsel %vm5472_vm10, %v1754_v51, %v1762_v45 }
 0x1c1   : > { %v1844_v56 = vpop.permute.xlu1 %1843  ;;  %3054 = vmatpush1.bf16.msra.mxu0 %v3619_v18  ;;  %v1675_v21 = vsel %vm1553_vm12, %v1666_v58, %v1674_v14  ;;  %v1850_v54 = vrot.slane %v1846_v3, 4  ;;  %vm5475_vm12 = vmmov %vm5474_vm14 }
 0x1c2   : > { %v1849_v24 = vrot.slane %v1844_v56, 4  ;;  %v3622_v25 = vcombine.high %v1675_v21, %v1763_v22  ;;  %v3621_v27 = vcombine.low %v1675_v21, %v1763_v22 }
 0x1c4   : > { %3094 = vmatprep.subr.bf16.mxu1 %v3622_v25  ;;  %v1934_v31 = vpop.permute.xlu0 %1933  ;;  %v1852_v6 = vsel %vm524_vm0, %v1849_v24, %v1850_v54 }
 0x1c5   : > { %v1938_v11 = vrot.slane %v1934_v31, 4  ;;  %v1932_v41 = vpop.permute.xlu1 %1931  ;;  %3095 = vmatpush1.bf16.msra.mxu1 %v3621_v27  ;;  %v1853_v38 = vsel %vm5473_vm13, %v1844_v56, %v1852_v6 }
 0x1c6   : > { %v1937_v30 = vrot.slane %v1932_v41, 4 }
 0x1c8   : > { %v1940_v29 = vsel %vm524_vm0, %v1937_v30, %v1938_v11  ;;  %v1936_v34 = vpop.permute.xlu0 %1935 }
 0x1c9   : > { %v1941_v23 = vsel %vm5474_vm14, %v1932_v41, %v1940_v29  ;;  %v1939_v35 = vrot.slane %v1936_v34, 4  ;;  %v1848_v26 = vpop.permute.xlu1 %1847 }
 0x1ca   : > { %v3623_v36 = vcombine.low %v1853_v38, %v1941_v23  ;;  %v3624_v39 = vcombine.high %v1853_v38, %v1941_v23  ;;  %v1851_v19 = vrot.slane %v1848_v26, 4 }
 0x1cb   : > { %v1942_v40 = vsel %vm524_vm0, %v1938_v11, %v1939_v35 }
 0x1cc   : > { %v1854_v42 = vsel %vm524_vm0, %v1850_v54, %v1851_v19  ;;  %3055 = vmatprep.subr.bf16.mxu0 %v3624_v39  ;;  %v2022_v43 = vpop.permute.xlu0 %2021  ;;  %v1943_v37 = vsel %vm5475_vm12, %v1934_v31, %v1942_v40 }
 0x1cd   : > { %v2020_v48 = vpop.permute.xlu1 %2019  ;;  %3056 = vmatpush1.bf16.msra.mxu0 %v3623_v36  ;;  %v1855_v52 = vsel %vm5476_vm15, %v1846_v3, %v1854_v42  ;;  %v2026_v53 = vrot.slane %v2022_v43, 4 }
 0x1ce   : > { %v2025_v50 = vrot.slane %v2020_v48, 4  ;;  %v3626_v4 = vcombine.high %v1855_v52, %v1943_v37  ;;  %v3625_v33 = vcombine.low %v1855_v52, %v1943_v37 }
 0x1d0   : > { %3096 = vmatprep.subr.bf16.mxu1 %v3626_v4  ;;  %v2114_v44 = vpop.permute.xlu0 %2113  ;;  %v2028_v58 = vsel %vm524_vm0, %v2025_v50, %v2026_v53 }
 0x1d1   : > { %v2118_v55 = vrot.slane %v2114_v44, 4  ;;  %v2112_v46 = vpop.permute.xlu1 %2111  ;;  %3097 = vmatpush1.bf16.msra.mxu1 %v3625_v33  ;;  %v2029_v61 = vsel %vm546_vm8, %v2020_v48, %v2028_v58 }
 0x1d2   : > { %v2117_v59 = vrot.slane %v2112_v46, 4 }
 0x1d4   : > { %v2120_v60 = vsel %vm524_vm0, %v2117_v59, %v2118_v55  ;;  %v2116_v32 = vpop.permute.xlu0 %2115 }
 0x1d5   : > { %v2121_v13 = vsel %vm640_vm7, %v2112_v46, %v2120_v60  ;;  %v2119_v1 = vrot.slane %v2116_v32, 4  ;;  %v2024_v49 = vpop.permute.xlu1 %2023 }
 0x1d6   : > { %v3627_v7 = vcombine.low %v2029_v61, %v2121_v13  ;;  %v3628_v8 = vcombine.high %v2029_v61, %v2121_v13  ;;  %v2027_v51 = vrot.slane %v2024_v49, 4 }
 0x1d7   : > { %v2122_v9 = vsel %vm524_vm0, %v2118_v55, %v2119_v1 }
 0x1d8   : > { %v2030_v10 = vsel %vm524_vm0, %v2026_v53, %v2027_v51  ;;  %3057 = vmatprep.subr.bf16.mxu0 %v3628_v8  ;;  %v2202_v62 = vpop.permute.xlu0 %2201  ;;  %v2123_v5 = vsel %vm640_vm7, %v2114_v44, %v2122_v9 }
 0x1d9   : > { %v2200_v63 = vpop.permute.xlu1 %2199  ;;  %3058 = vmatpush1.bf16.msra.mxu0 %v3627_v7  ;;  %v2031_v12 = vsel %vm546_vm8, %v2022_v43, %v2030_v10  ;;  %v2206_v15 = vrot.slane %v2202_v62, 4 }
 0x1da   : > { %v2205_v28 = vrot.slane %v2200_v63, 4  ;;  %v3630_v16 = vcombine.high %v2031_v12, %v2123_v5  ;;  %v3629_v17 = vcombine.low %v2031_v12, %v2123_v5 }
 0x1dc   : > { %3098 = vmatprep.subr.bf16.mxu1 %v3630_v16  ;;  %v2294_v18 = vpop.permute.xlu0 %2293  ;;  %v2208_v45 = vsel %vm524_vm0, %v2205_v28, %v2206_v15 }
 0x1dd   : > { %v2298_v57 = vrot.slane %v2294_v18, 4  ;;  %v2292_v20 = vpop.permute.xlu1 %2291  ;;  %3099 = vmatpush1.bf16.msra.mxu1 %v3629_v17  ;;  %v2209_v56 = vsel %vm730_vm3, %v2200_v63, %v2208_v45 }
 0x1de   : > { %v2297_v14 = vrot.slane %v2292_v20, 4 }
 0x1e0   : > { %v2300_v3 = vsel %vm524_vm0, %v2297_v14, %v2298_v57  ;;  %v2296_v22 = vpop.permute.xlu0 %2295 }
 0x1e1   : > { %v2301_v21 = vsel %vm824_vm6, %v2292_v20, %v2300_v3  ;;  %v2299_v54 = vrot.slane %v2296_v22, 4  ;;  %v2204_v24 = vpop.permute.xlu1 %2203 }
 0x1e2   : > { %v3631_v25 = vcombine.low %v2209_v56, %v2301_v21  ;;  %v3632_v27 = vcombine.high %v2209_v56, %v2301_v21  ;;  %v2207_v31 = vrot.slane %v2204_v24, 4 }
 0x1e3   : > { %v2302_v11 = vsel %vm524_vm0, %v2298_v57, %v2299_v54 }
 0x1e4   : > { %v2210_v41 = vsel %vm524_vm0, %v2206_v15, %v2207_v31  ;;  %3059 = vmatprep.subr.bf16.mxu0 %v3632_v27  ;;  %v2317_v6 = vpop.permute.xlu0 %2316  ;;  %v2303_v30 = vsel %vm824_vm6, %v2294_v18, %v2302_v11 }
 0x1e5   : > { %v2315_v29 = vpop.permute.xlu1 %2314  ;;  %3060 = vmatpush1.bf16.msra.mxu0 %v3631_v25  ;;  %v2211_v34 = vsel %vm730_vm3, %v2202_v62, %v2210_v41  ;;  %v2321_v38 = vrot.slane %v2317_v6, 4  ;;  %vm3142_vm3 = vcmask 31744  }
 0x1e6   : > { %v2320_v23 = vrot.slane %v2315_v29, 4  ;;  %v3634_v35 = vcombine.high %v2211_v34, %v2303_v30  ;;  %v3633_v26 = vcombine.low %v2211_v34, %v2303_v30  ;;  %v3589_v34 = vcombine.low %v5152_v47, %v5152_v47  ;;  %v3121_v47 = vld [vmem:[%s409_s30] sm:$0xff]  ;;  %s3656_s30 = sshll.u32 %s4116_s11, 3 }
 0x1e7   : > { %3156 = vperm.xlu1 %3815, %v3121_v47   ;;  %s3263_s10 = sadd.s32 %s3656_s30, %s3655_s17  ;;  %s3982_s17 = sshll.u32 %s4151_s7, 4  ;;  %s3983_s17 = int_to_ptr.vmem [resolvable:$false] %s3982_s17 }
 0x1e8   : > { %3100 = vmatprep.subr.bf16.mxu1 %v3634_v35  ;;  %v2409_v36 = vpop.permute.xlu0 %2408  ;;  %v2323_v40 = vsel %vm524_vm0, %v2320_v23, %v2321_v38  ;;  %s3657_s12 = sshll.u32 %s3263_s10, 6  ;;  %s3984_s30 = scalar_lea.vmem %s3983_s17, 512 }
 0x1e9   : > { %v2413_v39 = vrot.slane %v2409_v36, 4  ;;  %v2407_v19 = vpop.permute.xlu1 %2406  ;;  %3101 = vmatpush1.bf16.msra.mxu1 %v3633_v26  ;;  %v2324_v48 = vsel %vm848_vm11, %v2315_v29, %v2323_v40  ;;  %p3985_p7 = scmp.lt.s32.totalorder %s5322_s1, %s3983_s17 }
 0x1ea   : > { %v2412_v42 = vrot.slane %v2407_v19, 4 }
 0x1ec   : > { %v2415_v43 = vsel %vm524_vm0, %v2412_v42, %v2413_v39  ;;  %v2411_v37 = vpop.permute.xlu0 %2410 }
 0x1ed   : > { %v2416_v52 = vsel %vm801_vm5, %v2407_v19, %v2415_v43  ;;  %v2414_v53 = vrot.slane %v2411_v37, 4  ;;  %v2319_v50 = vpop.permute.xlu1 %2318 }
 0x1ee   : > { %v3635_v4 = vcombine.low %v2324_v48, %v2416_v52  ;;  %v3636_v33 = vcombine.high %v2324_v48, %v2416_v52  ;;  %v2322_v44 = vrot.slane %v2319_v50, 4 }
 0x1ef   : > { %v2417_v55 = vsel %vm524_vm0, %v2413_v39, %v2414_v53 }
 0x1f0   : > { %v2325_v46 = vsel %vm524_vm0, %v2321_v38, %v2322_v44  ;;  %3061 = vmatprep.subr.bf16.mxu0 %v3636_v33  ;;  %v2497_v58 = vpop.permute.xlu0 %2496  ;;  %v2418_v59 = vsel %vm801_vm5, %v2409_v36, %v2417_v55  ;;  %v3127_v36 = vand.u32 127, %v481_v0  ;;  %v4150_v0 = vmov 0.0  }
 0x1f1   : > { %v2495_v60 = vpop.permute.xlu1 %2494  ;;  %3062 = vmatpush1.bf16.msra.mxu0 %v3635_v4  ;;  %v2326_v32 = vsel %vm848_vm11, %v2317_v6, %v2325_v46  ;;  %v2501_v61 = vrot.slane %v2497_v58, 4 }
 0x1f2   : > { %v2500_v13 = vrot.slane %v2495_v60, 4  ;;  %v3638_v1 = vcombine.high %v2326_v32, %v2418_v59  ;;  %v3637_v49 = vcombine.low %v2326_v32, %v2418_v59  ;;  %v3130_v39 = vadd.s32 1, %v3127_v36 }
 0x1f3   : > { %v3128_v48 = vmul.u32 2, %v3127_v36 }
 0x1f4   : > { %3102 = vmatprep.subr.bf16.mxu1 %v3638_v1  ;;  %v2589_v7 = vpop.permute.xlu0 %2588  ;;  %v2503_v9 = vsel %vm524_vm0, %v2500_v13, %v2501_v61  ;;  %v3131_v52 = vmul.u32 2, %v3130_v39 }
 0x1f5   : > { %v2593_v8 = vrot.slane %v2589_v7, 4  ;;  %v2587_v51 = vpop.permute.xlu1 %2586  ;;  %3103 = vmatpush1.bf16.msra.mxu1 %v3637_v49  ;;  %v2504_v63 = vsel %vm707_vm2, %v2495_v60, %v2503_v9 }
 0x1f6   : > { %v2592_v10 = vrot.slane %v2587_v51, 4 }
 0x1f8   : > { %v2595_v62 = vsel %vm524_vm0, %v2592_v10, %v2593_v8  ;;  %v2591_v5 = vpop.permute.xlu0 %2590 }
 0x1f9   : > { %v2596_v12 = vsel %vm617_vm4, %v2587_v51, %v2595_v62  ;;  %v2594_v15 = vrot.slane %v2591_v5, 4  ;;  %v2499_v28 = vpop.permute.xlu1 %2498 }
 0x1fa   : > { %v3639_v16 = vcombine.low %v2504_v63, %v2596_v12  ;;  %v3640_v17 = vcombine.high %v2504_v63, %v2596_v12  ;;  %v2502_v18 = vrot.slane %v2499_v28, 4 }
 0x1fb   : > { %v2597_v57 = vsel %vm524_vm0, %v2593_v8, %v2594_v15 }
 0x1fc   : > { %v2505_v20 = vsel %vm524_vm0, %v2501_v61, %v2502_v18  ;;  %3063 = vmatprep.subr.bf16.mxu0 %v3640_v17  ;;  %v2677_v45 = vpop.permute.xlu0 %2676  ;;  %v2598_v14 = vsel %vm617_vm4, %v2589_v7, %v2597_v57 }
 0x1fd   : > { %v2681_v3 = vrot.slane %v2677_v45, 4  ;;  %v2675_v22 = vpop.permute.xlu1 %2674  ;;  %3064 = vmatpush1.bf16.msra.mxu0 %v3639_v16  ;;  %v2506_v56 = vsel %vm707_vm2, %v2497_v58, %v2505_v20 }
 0x1fe   : > { %v2680_v21 = vrot.slane %v2675_v22, 4  ;;  %v3642_v54 = vcombine.high %v2506_v56, %v2598_v14  ;;  %v3641_v24 = vcombine.low %v2506_v56, %v2598_v14 }
 0x200   : > { %v2683_v25 = vsel %vm524_vm0, %v2680_v21, %v2681_v3  ;;  %3104 = vmatprep.subr.bf16.mxu1 %v3642_v54 }
 0x201   : > { %v2684_v27 = vsel %vm522_vm1, %v2675_v22, %v2683_v25  ;;  %v2679_v31 = vpop.permute.xlu1 %2678  ;;  %3105 = vmatpush1.bf16.msra.mxu1 %v3641_v24 }
 0x202   : > { %v3643_v11 = vcombine.low %v2684_v27, %v2684_v27  ;;  %v3644_v41 = vcombine.high %v2684_v27, %v2684_v27  ;;  %v2682_v6 = vrot.slane %v2679_v31, 4 }
 0x204   : > { %v2685_v30 = vsel %vm524_vm0, %v2681_v3, %v2682_v6  ;;  %3647 = vmatprep.subr.msk.bf16.mxu0 %vm524_vm0, %v3644_v41  ;;  %v3028_v29 = vsel %vm524_vm0, %v3643_v11, 0 }
 0x205   : > { %v2686_v38 = vsel %vm522_vm1, %v2677_v45, %v2685_v30  ;;  %3066 = vmatpush1.bf16.msra.mxu0 %v3028_v29  ;;  %vm3132_vm1 = vcmp.lt.s32.totalorder %v4452_v2, %v3131_v52 }
 0x206   : > { %v3646_v23 = vcombine.high %v2686_v38, %v2686_v38  ;;  %v3645_v35 = vcombine.low %v2686_v38, %v2686_v38 }
 0x208   : > { %3072 = vmatmul.mubr.bf16.vlgmr.msra.gmra.mrb[0].mxu0 %v3589_v34  ;;  %3649 = vmatprep.subr.msk.bf16.mxu1 %vm524_vm0, %v3646_v23  ;;  %v3034_v26 = vsel %vm524_vm0, %v3645_v35, 0  ;;  %vm3129_vm0 = vcmp.ge.s32.totalorder %v4452_v2, %v3128_v48  ;;  %v3122_v48 = vld [vmem:[%s413_s27] sm:$0xff]  ;;  %s5481_s27 = sld [smem:[#allocation22_spill]] }
 0x209   : > { %3107 = vmatpush1.bf16.msra.mxu1 %v3034_v26  ;;  %vm3133_vm2 = vmand %vm3129_vm0, %vm3132_vm1 }
 0x20a   : > { %v3651_v46 = vsel %vm3133_vm2, 1.0, %v4150_v0 }
 0x20c   : > { %3113 = vmatmul.mubr.bf16.vlgmr.msra.gmra.mrb[0].mxu1 %v3589_v34 }
 0x20e   : > { %s5482_s21 = smov %s5481_s27  ;;  %s5320_s16 = scalar_lea.hbm %s5481_s27, %s3657_s12 }
 0x266   : > { %v3157_v58 = vpop.permute.xlu1 %3156 }
 0x267   : > { %v3159_v59 = vmul.f32 %v3651_v46, %v3157_v58 }
 0x269   : > { %v3160_v60 = vsel %vm3142_vm3, %v3159_v59, 0.0 }
 0x26a   : > { %v3161_v32 = vrot.slane %v3160_v60, 4 }
 0x26c   : > { %v3162_v61 = vadd.f32 %v3161_v32, %v3160_v60 }
 0x26e   : > { %v3163_v13 = vrot.slane %v3162_v61, 2 }
 0x270   : > { %v3164_v1 = vadd.f32 %v3163_v13, %v3162_v61 }
 0x272   : > { %v3165_v49 = vrot.slane %v3164_v1, 1 }
 0x274   : > { %v3166_v7 = vadd.f32 %v3165_v49, %v3164_v1 }
 0x276   : > { %v3167_v8 = vmul.f32 %v3651_v46, %v3166_v7 }
 0x278   : > { %v3168_v51 = vsel %vm3142_vm3, %v3167_v8, 0.0 }
 0x279   : > { %3169 = vadd.xlane.f32.xlu1 %v3168_v51 }
 0x2db   : > { %v3073_v19 = vpop.f32.mrb[0].mxu0 }
 0x2dc   : > { %v3075_v40 = vpop.f32.mrb[1].mxu0 }
 0x2dd   : > { %v3136_v42 = vadd.f32 %v3075_v40, %v3073_v19  ;;  %v3077_v43 = vpop.f32.mrb[2].mxu0 }
 0x2de   : > { %v3078_v37 = vpop.f32.mrb[3].mxu0 }
 0x2df   : > { %v3114_v53 = vpop.f32.mrb[0].mxu1 }
 0x2e0   : > { %v3137_v50 = vadd.f32 %v3136_v42, %v3114_v53  ;;  %v3116_v4 = vpop.f32.mrb[1].mxu1 }
 0x2e1   : > { %v3118_v33 = vpop.f32.mrb[2].mxu1 }
 0x2e2   : > { %v3138_v44 = vadd.f32 %v3137_v50, %v3116_v4  ;;  %v3119_v55 = vpop.f32.mrb[3].mxu1  ;;  %v3123_v50 = vld [vmem:[%s417_s13] sm:$0xff]  ;;  %s3978_s13 = scalar_lea.vmem %s5322_s1, 256 }
 0x2e3   : > { %p3979_p4 = scmp.ne.s32.totalorder %s5322_s1, %s3978_s13  ;;  %p3986_p10 = scmp.lt.s32.totalorder %s3984_s30, %s3978_s13 }
 0x2e4   : > { %3139 = vadd.xlane.f32.xlu0 %v3138_v44 }
 0x2e5   : > { %p3980_p3 = pnand %p3979_p4, %p5483_p0  ;;  %p3987_p6 = por %p3986_p10, %p3985_p7 }
 0x2e7   : > { %p3981_p13 = pneg %p3980_p3 }
 0x2e9   : > { %p3988_p5 = pnand %p3987_p6, %p3981_p13 }
 0x306   : > { %v3170_v18 = vpop.xlane.xlu1 %3169 }
 0x307   : > { %v3171_v57 = vmul.f32 512.0, %v3170_v18 }
 0x371   : > { %v3140_v2 = vpop.xlane.xlu0 %3139 }
 0x372   : > { %v3141_v9 = vmul.f32 %v3651_v46, %v3140_v2 }
 0x374   : > { %v3143_v10 = vsel %vm3142_vm3, %v3141_v9, 0.0 }
 0x375   : > { %v3144_v62 = vrot.slane %v3143_v10, 4 }
 0x377   : > { %v3145_v5 = vadd.f32 %v3144_v62, %v3143_v10 }
 0x379   : > { %v3146_v63 = vrot.slane %v3145_v5, 2 }
 0x37b   : > { %v3147_v12 = vadd.f32 %v3146_v63, %v3145_v5 }
 0x37d   : > { %v3148_v15 = vrot.slane %v3147_v12, 1 }
 0x37f   : > { %v3149_v28 = vadd.f32 %v3148_v15, %v3147_v12 }
 0x381   : > { %v3150_v16 = vmul.f32 %v3651_v46, %v3149_v28 }
 0x383   : > { %v3151_v17 = vsel %vm3142_vm3, %v3150_v16, 0.0 }
 0x384   : > { %3152 = vadd.xlane.f32.xlu0 %v3151_v17 }
 0x411   : > { %v3153_v20 = vpop.xlane.xlu0 %3152 }
 0x412   : > { %v3172_v45 = vadd.f32 %v3171_v57, %v3153_v20 }
 0x414   : > { %v3174_v14 = vmul.f32 0.0009765625, %v3172_v45 }
 0x416   : > { %v3175_v3 = vsub.f32 %v3174_v14, %v3121_v47 }
 0x418   : > { %3178 = vperm.xlu0 %3816, %v3175_v3  }
 0x497   : > { %v3179_v22 = vpop.permute.xlu0 %3178 }
 0x498   : > { %v3181_v56 = vsub.f32 %v3073_v19, %v3179_v22  ;;  %v3182_v21 = vsub.f32 %v3075_v40, %v3179_v22  ;;  %v3183_v54 = vsub.f32 %v3114_v53, %v3179_v22  ;;  %v3184_v24 = vsub.f32 %v3116_v4, %v3179_v22 }
 0x49a   : > { %v3185_v25 = vmul.f32 %v3181_v56, %v3181_v56  ;;  %v3186_v27 = vmul.f32 %v3182_v21, %v3182_v21  ;;  %v3187_v31 = vmul.f32 %v3183_v54, %v3183_v54  ;;  %v3188_v41 = vmul.f32 %v3184_v24, %v3184_v24 }
 0x49c   : > { %v3189_v11 = vadd.f32 %v3186_v27, %v3185_v25 }
 0x49e   : > { %v3190_v6 = vadd.f32 %v3189_v11, %v3187_v31 }
 0x4a0   : > { %v3191_v30 = vadd.f32 %v3190_v6, %v3188_v41 }
 0x4a2   : > { %3192 = vadd.xlane.f32.xlu1 %v3191_v30 }
 0x52f   : > { %v3193_v29 = vpop.xlane.xlu1 %3192 }
 0x530   : > { %v3194_v34 = vmul.f32 %v3651_v46, %v3193_v29 }
 0x532   : > { %v3195_v38 = vsel %vm3142_vm3, %v3194_v34, 0.0 }
 0x533   : > { %v3196_v23 = vrot.slane %v3195_v38, 4 }
 0x535   : > { %v3197_v35 = vadd.f32 %v3196_v23, %v3195_v38 }
 0x537   : > { %v3198_v26 = vrot.slane %v3197_v35, 2 }
 0x539   : > { %v3199_v47 = vadd.f32 %v3198_v26, %v3197_v35 }
 0x53b   : > { %v3200_v36 = vrot.slane %v3199_v47, 1 }
 0x53d   : > { %v3201_v39 = vadd.f32 %v3200_v36, %v3199_v47 }
 0x53f   : > { %v3202_v19 = vmul.f32 %v3651_v46, %v3201_v39 }
 0x541   : > { %v3203_v40 = vsel %vm3142_vm3, %v3202_v19, 0.0 }
 0x542   : > { %3204 = vadd.xlane.f32.xlu1 %v3203_v40 }
 0x5cf   : > { %v3205_v42 = vpop.xlane.xlu1 %3204 }
 0x5d0   : > { %v3206_v43 = vmul.f32 0.0009765625, %v3205_v42 }
 0x5d2   : > { %v3207_v37 = vadd.f32 1e-05, %v3206_v43 }
 0x5d4   : > { %3916 = vrsqrt.f32 %v3207_v37 }
 0x5de   : > { %v3917_v52 = vpop.eup %3916 }
 0x5df   : > { %v3209_v53 = vmul.f32 %v3917_v52, %v3122_v48 }
 0x5e1   : > { %3212 = vperm.xlu1 %3815, %v3209_v53  }
 0x5e5   : > { %3221 = vperm.xlu1 %3815, %v3123_v50  }
 0x660   : > { %v3213_v4 = vpop.permute.xlu1 %3212 }
 0x661   : > { %v3215_v33 = vmul.f32 %v3213_v4, %v3181_v56  ;;  %v3216_v44 = vmul.f32 %v3213_v4, %v3182_v21  ;;  %v3217_v55 = vmul.f32 %v3213_v4, %v3183_v54  ;;  %v3218_v0 = vmul.f32 %v3213_v4, %v3184_v24 }
 0x664   : > { %v3222_v46 = vpop.permute.xlu1 %3221 }
 0x665   : > { %v3224_v58 = vadd.f32 %v3222_v46, %v3215_v33  ;;  %v3225_v59 = vadd.f32 %v3222_v46, %v3216_v44  ;;  %v3226_v60 = vadd.f32 %v3222_v46, %v3217_v55  ;;  %v3227_v32 = vadd.f32 %v3222_v46, %v3218_v0 }
 0x667   : > { %v3228_v61 = vmax.f32 %v3224_v58, 0.0  ;;  %v3229_v13 = vmax.f32 %v3225_v59, 0.0  ;;  %v3230_v1 = vmax.f32 %v3226_v60, 0.0  ;;  %v3231_v49 = vmax.f32 %v3227_v32, 0.0 }
 0x669   : > { %v3663_v7 = vpack.c.bf16 %v3229_v13, %v3228_v61  ;;  %v3664_v8 = vpack.c.bf16 %v3231_v49, %v3230_v1 }
 0x66b   : > { %3248 = vst [vmem:[%s400_s18] sm:$0xff] %v3663_v7  ;;  %3249 = vst [vmem:[%s400_s18 + $0x8] sm:$0xff] %v3664_v8 }
 0x66c   : > { %3991 = shalt.err (!%p3988_p5)
}
 0x66d   : > { %s3992_s19 = scalar_lea.hbm %s5320_s16, 256  ;;  %s3996_s18 = scalar_lea.hbm %s5482_s21, 1024 }
 0x66e   : > { %p3993_p8 = scmp.ne.s32.totalorder %s5320_s16, %s3992_s19  ;;  %p3997_p9 = scmp.lt.u32.totalorder %s5320_s16, %s5482_s21 }
 0x66f   : > { %p3998_p12 = scmp.lt.u32.totalorder %s3996_s18, %s3992_s19  ;;  %p4000_p4 = scmp.lt.u32.totalorder %s3992_s19, %s5320_s16 }
 0x670   : > { %p3994_p11 = pnand %p3993_p8, %p5483_p0 }
 0x671   : > { %p3999_p2 = por %p3998_p12, %p3997_p9 }
 0x672   : > { %p3995_p1 = pneg %p3994_p11 }
 0x673   : > { %p4001_p3 = por %p4000_p4, %p3999_p2 }
 0x675   : > { %p4002_p13 = pnand %p4001_p3, %p3995_p1 }
 0x677   : > { %4005 = shalt.err (!%p4002_p13)
}
 0x678   : > { %3669 = dma.vmem_to_hbm [thread:$0]  (%p5483_p0), %s5322_s1, 256, %s5320_s16, %s3251_s5  }
 0x679 PF: > { %p3683_p7 = scmp.ge.s32.totalorder %s4128_s14, 2  ;;  %s3279_s27 = sand.u32 1, %s4076_s24  }
 0x67a   : > { %p5484_p10 = scmp.ne.s32.totalorder %s5458_s15, 0  ;;  %s3280_s13 = scalar_lea.sflag [#allocation6], %s3279_s27 }
 0x67c   : > { %p3679_p6 = pnand %p3683_p7, %p5484_p10 }
 0x67e   : > { %4071 = dma.done.wait (!%p3679_p6), %s3280_s13, 256  }
 0x67f   : > { %4073 = vsyncadd (!%p3679_p6), %s3280_s13, 4294967040  ;;  %s26_s14 = sadd.s32 1, %s4128_s14   ;;  %s5486_s10 = sld [smem:[#allocation14_spill]] }
 0x680   : > { %p5350_p5 = scmp.ge.s32.totalorder %s26_s14, 6   ;;  %s5487_s11 = sld [smem:[#allocation15_spill]] }
 0x681   : > { %s5488_s12 = sld [smem:[#allocation16_spill]]  ;;  %s5489_s13 = sld [smem:[#allocation17_spill]] }
 0x682   : > { %s5490_s24 = smov %s4080_s25  ;;  %s5491_s25 = smov %s4084_s26 }
 0x683   : > { %s5492_s26 = smov %s4382_s4  ;;  %s5493_s27 = smov %s4092_s28 }
 0x684   : > { %s5494_s28 = smov %s4096_s29  ;;  %s5495_s29 = smov %s4364_s22 }
 0x685   : > { %s5496_s30 = smov %s4104_s8  ;;  %s5497_s8 = smov %s4108_s9 }
 0x686   : > { %s5498_s9 = smov %s4379_s20  ;;  %25 = sbr.rel (!%p5350_p5) target bundleno = 18 (0x12), region = 118 }
 0x68d   :  { %3285 = vsyncpa [#allocation5], 1 }
 0x68e   :  { %3287 = vsyncpa [#allocation5 + $0x1], 1 }
 0x68f   :  { %3288 = vsyncpa [#allocation8], 1 }
 0x690   :  { %3290 = vsyncpa [#allocation8 + $0x1], 1 }
 0x691   :  { %3291 = vsyncpa [#allocation6], 1 }
 0x692   :  { %3293 = vsyncpa [#allocation6 + $0x1], 1 }

</bundles_post_ra>
